<compile_context>
chip_gen: v5e
topology: v5e:2x2
jax: 0.10.0
libtpu: 0.0.40
codegen_flags: <defaults>
</compile_context>

<pallas_src>
import functools

import jax
import jax.numpy as jnp
from jax import lax
from jax.experimental import pallas as pl
from jax.experimental.pallas import tpu as pltpu


# ----------------------------- Pallas kernel -------------------------------

def _conv3x3_im2col(pad_ref, w_ref, b_ref, *, H_in, W_in, Cin, Cout, stride):
    """3x3 conv (padding already in the scratch buffer) as one im2col matmul.

    stride==2 gathers only the even output positions per tap before the matmul.
    Returns (acc (Ho*Wo, Cout) f32, Ho, Wo).
    """
    if stride == 1:
        Ho, Wo = H_in, W_in
    else:
        Ho, Wo = H_in // 2, W_in // 2

    taps = []
    for kh in range(3):
        for kw in range(3):
            if stride == 1:
                t = pad_ref[kh:kh + Ho, kw:kw + Wo, 0:Cin]          # (Ho, Wo, Cin)
                t = t.reshape(Ho * Wo, Cin)
            else:
                t = pad_ref[kh:kh + 2 * Ho, kw:kw + 2 * Wo, 0:Cin]  # (2Ho, 2Wo, Cin)
                t = t.reshape(Ho, 2, Wo, 2, Cin)[:, 0, :, 0, :]      # even rows/cols
                t = t.reshape(Ho * Wo, Cin)
            taps.append(t)
    patch = jnp.concatenate(taps, axis=-1)                           # (P, 9*Cin)
    acc = jnp.dot(patch, w_ref[...], preferred_element_type=jnp.float32)
    return acc + b_ref[...], Ho, Wo


def _group_norm(acc, gamma, beta, a_ref, *, num_spatial, cpg, eps):
    """GroupNorm over (channels_per_group, H, W) with centred variance.

    acc: (P, Cout) f32.  a_ref: (Cout, Cout) 0/1 group-membership mask, only
    needed when cpg > 1; for cpg == 1 the group stats are per-channel (VPU only).
    """
    inv_count = 1.0 / float(num_spatial * cpg)
    s1 = jnp.sum(acc, axis=0, keepdims=True)                         # (1, Cout)
    if cpg == 1:
        mean = s1 * inv_count
    else:
        mean = jnp.dot(s1, a_ref[...], preferred_element_type=jnp.float32) * inv_count
    d = acc - mean
    s2 = jnp.sum(d * d, axis=0, keepdims=True)
    if cpg == 1:
        var = s2 * inv_count
    else:
        var = jnp.dot(s2, a_ref[...], preferred_element_type=jnp.float32) * inv_count
    inv = lax.rsqrt(var + eps)
    return d * inv * gamma + beta


def _stage_kernel(*refs, cfgs, H0, W0, Cin0, eps):
    """Runs one full Encoder stage (chain of conv[+GN]+ReLU) for one image.

    refs = (x_ref, *param_refs, o_ref, pad_ref).  Activations stay in the
    zero-padded VMEM scratch `pad_ref` between layers (halo rows/cols stay
    zero, which implements conv padding=1).
    """
    x_ref = refs[0]
    o_ref = refs[-2]
    pad_ref = refs[-1]
    params = refs[1:-2]

    # Initialise padded activation buffer with the input image.
    pad_ref[...] = jnp.zeros_like(pad_ref)
    pad_ref[1:1 + H0, 1:1 + W0, 0:Cin0] = x_ref[0]

    H, W, Cin = H0, W0, Cin0
    pi = 0
    n_layers = len(cfgs)
    for li, cfg in enumerate(cfgs):
        w_ref, b_ref = params[pi], params[pi + 1]
        pi += 2
        acc, Ho, Wo = _conv3x3_im2col(
            pad_ref, w_ref, b_ref,
            H_in=H, W_in=W, Cin=Cin, Cout=cfg['cout'], stride=cfg['stride'])

        if cfg['gn']:
            g_ref, bt_ref = params[pi], params[pi + 1]
            pi += 2
            a_ref = None
            if cfg['cpg'] > 1:
                a_ref = params[pi]
                pi += 1
            acc = _group_norm(acc, g_ref[...], bt_ref[...], a_ref,
                              num_spatial=Ho * Wo, cpg=cfg['cpg'], eps=eps)

        act = jnp.maximum(acc, 0.0)                                  # (Ho*Wo, Cout)

        if li == n_layers - 1:
            o_ref[0] = act.astype(o_ref.dtype)
        else:
            # Re-zero so the halo (and any stale region after a stride-2
            # shrink) is zero for the next layer's padding.
            pad_ref[...] = jnp.zeros_like(pad_ref)
            pad_ref[1:1 + Ho, 1:1 + Wo, 0:cfg['cout']] = act.reshape(
                Ho, Wo, cfg['cout'])

        H, W, Cin = Ho, Wo, cfg['cout']


# ------------------------------ JAX wrapper --------------------------------

def run_encoder_stage(x_nhwc, layers, num_groups, *, eps=1e-5):
    """Run a whole Encoder stage (list of conv layers) in one pallas_call."""
    N, H0, W0, Cin0 = x_nhwc.shape

    specs = [pl.BlockSpec((1, H0, W0, Cin0), lambda n: (n, 0, 0, 0))]
    args = [x_nhwc]
    cfgs = []

    H, W, Cin = H0, W0, Cin0
    cmax = Cin0
    for layer in layers:
        Cout = layer['w'].shape[-1]
        stride = layer['stride']
        gn = layer['gn']
        cpg = (Cout // num_groups) if gn else 0
        if stride == 2:
            assert H % 2 == 0 and W % 2 == 0
            Ho, Wo = H // 2, W // 2
        else:
            Ho, Wo = H, W

        w9 = layer['w'].reshape(9 * Cin, Cout)       # (kh, kw, cin) -> rows
        b2 = layer['b'].reshape(1, Cout)
        specs.append(pl.BlockSpec((9 * Cin, Cout), lambda n: (0, 0)))
        args.append(w9)
        specs.append(pl.BlockSpec((1, Cout), lambda n: (0, 0)))
        args.append(b2)
        if gn:
            specs.append(pl.BlockSpec((1, Cout), lambda n: (0, 0)))
            args.append(layer['gamma'].reshape(1, Cout))
            specs.append(pl.BlockSpec((1, Cout), lambda n: (0, 0)))
            args.append(layer['beta'].reshape(1, Cout))
            if cpg > 1:
                gid = jnp.arange(Cout) // cpg
                A = (gid[:, None] == gid[None, :]).astype(jnp.float32)
                specs.append(pl.BlockSpec((Cout, Cout), lambda n: (0, 0)))
                args.append(A)

        cfgs.append(dict(cout=Cout, stride=stride, gn=gn, cpg=cpg))
        cmax = max(cmax, Cin)
        H, W, Cin = Ho, Wo, Cout

    Hf, Wf, Cf = H, W, Cin

    kernel = functools.partial(_stage_kernel, cfgs=tuple(cfgs),
                               H0=H0, W0=W0, Cin0=Cin0, eps=eps)

    y = pl.pallas_call(
        kernel,
        out_shape=jax.ShapeDtypeStruct((N, Hf * Wf, Cf), jnp.float32),
        grid_spec=pltpu.PrefetchScalarGridSpec(
            num_scalar_prefetch=0,
            grid=(N,),
            in_specs=specs,
            out_specs=pl.BlockSpec((1, Hf * Wf, Cf), lambda n: (n, 0, 0)),
            scratch_shapes=[pltpu.VMEM((H0 + 2, W0 + 2, cmax), jnp.float32)],
        ),
        compiler_params=pltpu.CompilerParams(dimension_semantics=("parallel",)),
    )(*args)

    return y.reshape(N, Hf, Wf, Cf)


# --------------------------- Encoder construction --------------------------

def init_encoder_params(key, config):
    r = int(16 * config['reduction_ratio'])
    rr = config['reduction_ratio']
    bc = [int(c * rr / r) * r for c in config['block_channels']]
    in_ch = config['in_channels']
    nb = config['num_blocks']

    def conv_layer(k, cin, cout, gn, stride):
        k1, k2, k3, k4 = jax.random.split(k, 4)
        fan_in = cin * 9
        layer = {
            'w': jax.random.normal(k1, (3, 3, cin, cout), jnp.float32)
                 / jnp.sqrt(float(fan_in)),
            'b': 0.01 * jax.random.normal(k2, (cout,), jnp.float32),
            'gn': gn,
            'stride': stride,
        }
        if gn:
            layer['gamma'] = 1.0 + 0.1 * jax.random.normal(k3, (cout,), jnp.float32)
            layer['beta'] = 0.1 * jax.random.normal(k4, (cout,), jnp.float32)
        return layer

    keys = jax.random.split(key, 64)
    ki = 0
    stages = []
    for s in range(4):
        layers = []
        if s == 0:
            layers.append(conv_layer(keys[ki], in_ch, bc[0], True, 1)); ki += 1
        else:
            layers.append(conv_layer(keys[ki], bc[s - 1], bc[s], False, 2)); ki += 1
        for _ in range(nb[s]):  # repeat_block: conv3x3 + GN(r) + ReLU
            layers.append(conv_layer(keys[ki], bc[s], bc[s], True, 1)); ki += 1
        # nn.Identity() -> no-op
        stages.append(layers)
    return stages, r


def encoder_forward(stages, r, data_nchw, index):
    """Mirrors Encoder.forward(data, index); input/output are NCHW like PyTorch."""
    x = jnp.transpose(data_nchw, (0, 2, 3, 1))       # NCHW -> NHWC
    y = run_encoder_stage(x, stages[index], r)
    return jnp.transpose(y, (0, 3, 1, 2))            # NHWC -> NCHW


# ------------------------------- Reference ---------------------------------

def ref_forward(stages, r, data_nchw, index, eps=1e-5):
    x = data_nchw
    for layer in stages[index]:
        w = jnp.transpose(layer['w'], (3, 2, 0, 1))  # -> OIHW
        y = lax.conv_general_dilated(
            x, w, (layer['stride'],) * 2, ((1, 1), (1, 1)),
            dimension_numbers=('NCHW', 'OIHW', 'NCHW'))
        y = y + layer['b'][None, :, None, None]
        if layer['gn']:
            N, C, H, W = y.shape
            cpg = C // r
            yg = y.reshape(N, r, cpg, H, W)
            mean = yg.mean(axis=(2, 3, 4), keepdims=True)
            var = yg.var(axis=(2, 3, 4), keepdims=True)
            y = ((yg - mean) / jnp.sqrt(var + eps)).reshape(N, C, H, W)
            y = (y * layer['gamma'][None, :, None, None]
                 + layer['beta'][None, :, None, None])
        x = jnp.maximum(y, 0.0)
    return x


# --------------------------------- Main -------------------------------------

if __name__ == "__main__":
    config = {
        'in_channels': 4,
        'block_channels': [16, 32, 32, 32],
        'reduction_ratio': 1.0,     # -> r = 16 groups
        'num_blocks': [1, 1, 1, 1],
    }
    key = jax.random.PRNGKey(0)
    kp, kx = jax.random.split(key)
    stages, r = init_encoder_params(kp, config)

    x = jax.random.normal(kx, (2, config['in_channels'], 16, 16), jnp.float32)

    # index 0: conv3x3_gn_relu + repeat_block ; index 1: downsample2x + repeat_block
    y0 = encoder_forward(stages, r, x, 0)
    y1 = encoder_forward(stages, r, y0, 1)
    jax.block_until_ready((y0, y1))

    ref0 = ref_forward(stages, r, x, 0)
    ref1 = ref_forward(stages, r, ref0, 1)

    assert y0.shape == (2, 16, 16, 16), y0.shape
    assert y1.shape == (2, 32, 8, 8), y1.shape
    assert jnp.allclose(y0, ref0, atol=1e-3, rtol=1e-3)
    assert jnp.allclose(y1, ref1, atol=1e-3, rtol=1e-3)
    print("KERNEL_OK")
</pallas_src>

<mosaic_0001>
module attributes {stable_mosaic.version = 11 : i64} {
  func.func @_stage_kernel(%arg0: i32, %arg1: memref<1x16x16x4xf32, #tpu.memory_space<vmem>>, %arg2: memref<36x16xf32, #tpu.memory_space<vmem>>, %arg3: memref<1x16xf32, #tpu.memory_space<vmem>>, %arg4: memref<1x16xf32, #tpu.memory_space<vmem>>, %arg5: memref<1x16xf32, #tpu.memory_space<vmem>>, %arg6: memref<144x16xf32, #tpu.memory_space<vmem>>, %arg7: memref<1x16xf32, #tpu.memory_space<vmem>>, %arg8: memref<1x16xf32, #tpu.memory_space<vmem>>, %arg9: memref<1x16xf32, #tpu.memory_space<vmem>>, %arg10: memref<1x256x16xf32, #tpu.memory_space<vmem>>, %arg11: memref<18x18x16xf32, #tpu.memory_space<vmem>>) attributes {dimension_semantics = [#tpu.dimension_semantics<parallel>], iteration_bounds = array<i64: 2>, scalar_prefetch = 0 : i64, scratch_operands = 1 : i64, tpu.core_type = #tpu.core_type<tc>, window_params = [{transform_indices = @transform_0, window_bounds = array<i64: 1, 16, 16, 4>}, {pipeline_mode = #tpu.pipeline_mode<synchronous>, transform_indices = @transform_1, window_bounds = array<i64: 36, 16>}, {pipeline_mode = #tpu.pipeline_mode<synchronous>, transform_indices = @transform_2, window_bounds = array<i64: 1, 16>}, {pipeline_mode = #tpu.pipeline_mode<synchronous>, transform_indices = @transform_3, window_bounds = array<i64: 1, 16>}, {pipeline_mode = #tpu.pipeline_mode<synchronous>, transform_indices = @transform_4, window_bounds = array<i64: 1, 16>}, {pipeline_mode = #tpu.pipeline_mode<synchronous>, transform_indices = @transform_5, window_bounds = array<i64: 144, 16>}, {pipeline_mode = #tpu.pipeline_mode<synchronous>, transform_indices = @transform_6, window_bounds = array<i64: 1, 16>}, {pipeline_mode = #tpu.pipeline_mode<synchronous>, transform_indices = @transform_7, window_bounds = array<i64: 1, 16>}, {pipeline_mode = #tpu.pipeline_mode<synchronous>, transform_indices = @transform_8, window_bounds = array<i64: 1, 16>}, {transform_indices = @transform_9, window_bounds = array<i64: 1, 256, 16>}]} {
    %cst = arith.constant 0.000000e+00 : f32
    %0 = vector.broadcast %cst : f32 to vector<18x18x16xf32>
    %c0 = arith.constant 0 : index
    %c0_0 = arith.constant 0 : index
    %c0_1 = arith.constant 0 : index
    %1 = vector.load %arg11[%c0, %c0_0, %c0_1] : memref<18x18x16xf32, #tpu.memory_space<vmem>>, vector<18x18x16xf32>
    tpu.vector_store %arg11[%c0, %c0_0, %c0_1], %0 {strides = array<i32>} : memref<18x18x16xf32, #tpu.memory_space<vmem>>, vector<18x18x16xf32>,
    %c0_2 = arith.constant 0 : index
    %c0_3 = arith.constant 0 : index
    %c0_4 = arith.constant 0 : index
    %c0_5 = arith.constant 0 : index
    %2 = vector.load %arg1[%c0_2, %c0_3, %c0_4, %c0_5] : memref<1x16x16x4xf32, #tpu.memory_space<vmem>>, vector<1x16x16x4xf32>
    %3 = vector.shape_cast %2 : vector<1x16x16x4xf32> to vector<16x16x4xf32>
    %c1 = arith.constant 1 : index
    %c1_6 = arith.constant 1 : index
    %c0_7 = arith.constant 0 : index
    %4 = vector.load %arg11[%c1, %c1_6, %c0_7] : memref<18x18x16xf32, #tpu.memory_space<vmem>>, vector<16x16x4xf32>
    tpu.vector_store %arg11[%c1, %c1_6, %c0_7], %3 {strides = array<i32>} : memref<18x18x16xf32, #tpu.memory_space<vmem>>, vector<16x16x4xf32>,
    %c0_8 = arith.constant 0 : index
    %c0_9 = arith.constant 0 : index
    %c0_10 = arith.constant 0 : index
    %5 = vector.load %arg11[%c0_8, %c0_9, %c0_10] : memref<18x18x16xf32, #tpu.memory_space<vmem>>, vector<16x16x4xf32>
    %6 = vector.shape_cast %5 : vector<16x16x4xf32> to vector<256x4xf32>
    %c0_11 = arith.constant 0 : index
    %c1_12 = arith.constant 1 : index
    %c0_13 = arith.constant 0 : index
    %7 = vector.load %arg11[%c0_11, %c1_12, %c0_13] : memref<18x18x16xf32, #tpu.memory_space<vmem>>, vector<16x16x4xf32>
    %8 = vector.shape_cast %7 : vector<16x16x4xf32> to vector<256x4xf32>
    %c0_14 = arith.constant 0 : index
    %c2 = arith.constant 2 : index
    %c0_15 = arith.constant 0 : index
    %9 = vector.load %arg11[%c0_14, %c2, %c0_15] : memref<18x18x16xf32, #tpu.memory_space<vmem>>, vector<16x16x4xf32>
    %10 = vector.shape_cast %9 : vector<16x16x4xf32> to vector<256x4xf32>
    %c1_16 = arith.constant 1 : index
    %c0_17 = arith.constant 0 : index
    %c0_18 = arith.constant 0 : index
    %11 = vector.load %arg11[%c1_16, %c0_17, %c0_18] : memref<18x18x16xf32, #tpu.memory_space<vmem>>, vector<16x16x4xf32>
    %12 = vector.shape_cast %11 : vector<16x16x4xf32> to vector<256x4xf32>
    %c1_19 = arith.constant 1 : index
    %c1_20 = arith.constant 1 : index
    %c0_21 = arith.constant 0 : index
    %13 = vector.load %arg11[%c1_19, %c1_20, %c0_21] : memref<18x18x16xf32, #tpu.memory_space<vmem>>, vector<16x16x4xf32>
    %14 = vector.shape_cast %13 : vector<16x16x4xf32> to vector<256x4xf32>
    %c1_22 = arith.constant 1 : index
    %c2_23 = arith.constant 2 : index
    %c0_24 = arith.constant 0 : index
    %15 = vector.load %arg11[%c1_22, %c2_23, %c0_24] : memref<18x18x16xf32, #tpu.memory_space<vmem>>, vector<16x16x4xf32>
    %16 = vector.shape_cast %15 : vector<16x16x4xf32> to vector<256x4xf32>
    %c2_25 = arith.constant 2 : index
    %c0_26 = arith.constant 0 : index
    %c0_27 = arith.constant 0 : index
    %17 = vector.load %arg11[%c2_25, %c0_26, %c0_27] : memref<18x18x16xf32, #tpu.memory_space<vmem>>, vector<16x16x4xf32>
    %18 = vector.shape_cast %17 : vector<16x16x4xf32> to vector<256x4xf32>
    %c2_28 = arith.constant 2 : index
    %c1_29 = arith.constant 1 : index
    %c0_30 = arith.constant 0 : index
    %19 = vector.load %arg11[%c2_28, %c1_29, %c0_30] : memref<18x18x16xf32, #tpu.memory_space<vmem>>, vector<16x16x4xf32>
    %20 = vector.shape_cast %19 : vector<16x16x4xf32> to vector<256x4xf32>
    %c2_31 = arith.constant 2 : index
    %c2_32 = arith.constant 2 : index
    %c0_33 = arith.constant 0 : index
    %21 = vector.load %arg11[%c2_31, %c2_32, %c0_33] : memref<18x18x16xf32, #tpu.memory_space<vmem>>, vector<16x16x4xf32>
    %22 = vector.shape_cast %21 : vector<16x16x4xf32> to vector<256x4xf32>
    %23 = tpu.concatenate %6, %8, %10, %12, %14, %16, %18, %20, %22 in 1 : vector<256x4xf32>, vector<256x4xf32>, vector<256x4xf32>, vector<256x4xf32>, vector<256x4xf32>, vector<256x4xf32>, vector<256x4xf32>, vector<256x4xf32>, vector<256x4xf32> -> vector<256x36xf32>
    %c0_34 = arith.constant 0 : index
    %c0_35 = arith.constant 0 : index
    %24 = vector.load %arg2[%c0_34, %c0_35] : memref<36x16xf32, #tpu.memory_space<vmem>>, vector<36x16xf32>
    %cst_36 = arith.constant dense<0.000000e+00> : vector<256x16xf32>
    %25 = tpu.matmul %23, %24, %cst_36 {dimension_numbers = #tpu.dot_dimension_numbers<[1], [0], [0], [1], [0, 0, 1, 1], [], []>} : vector<256x36xf32>, vector<36x16xf32>, vector<256x16xf32> -> vector<256x16xf32>
    %c0_37 = arith.constant 0 : index
    %c0_38 = arith.constant 0 : index
    %26 = vector.load %arg3[%c0_37, %c0_38] : memref<1x16xf32, #tpu.memory_space<vmem>>, vector<1x16xf32>
    %27 = vector.broadcast %26 : vector<1x16xf32> to vector<256x16xf32>
    %28 = arith.addf %25, %27 : vector<256x16xf32>
    %c0_39 = arith.constant 0 : index
    %c0_40 = arith.constant 0 : index
    %29 = vector.load %arg4[%c0_39, %c0_40] : memref<1x16xf32, #tpu.memory_space<vmem>>, vector<1x16xf32>
    %c0_41 = arith.constant 0 : index
    %c0_42 = arith.constant 0 : index
    %30 = vector.load %arg5[%c0_41, %c0_42] : memref<1x16xf32, #tpu.memory_space<vmem>>, vector<1x16xf32>
    %cst_43 = arith.constant dense<0.000000e+00> : vector<16xf32>
    %31 = vector.multi_reduction <add>, %28, %cst_43 [0] : vector<256x16xf32> to vector<16xf32>
    %32 = vector.shape_cast %31 : vector<16xf32> to vector<1x16xf32>
    %cst_44 = arith.constant 3.906250e-03 : f32
    %33 = vector.broadcast %cst_44 : f32 to vector<1x16xf32>
    %34 = arith.mulf %32, %33 : vector<1x16xf32>
    %35 = vector.broadcast %34 : vector<1x16xf32> to vector<256x16xf32>
    %36 = arith.subf %28, %35 : vector<256x16xf32>
    %37 = arith.mulf %36, %36 : vector<256x16xf32>
    %cst_45 = arith.constant dense<0.000000e+00> : vector<16xf32>
    %38 = vector.multi_reduction <add>, %37, %cst_45 [0] : vector<256x16xf32> to vector<16xf32>
    %39 = vector.shape_cast %38 : vector<16xf32> to vector<1x16xf32>
    %cst_46 = arith.constant 3.906250e-03 : f32
    %40 = vector.broadcast %cst_46 : f32 to vector<1x16xf32>
    %41 = arith.mulf %39, %40 : vector<1x16xf32>
    %cst_47 = arith.constant 9.99999974E-6 : f32
    %42 = vector.broadcast %cst_47 : f32 to vector<1x16xf32>
    %43 = arith.addf %41, %42 : vector<1x16xf32>
    %44 = math.rsqrt %43 : vector<1x16xf32>
    %45 = vector.broadcast %44 : vector<1x16xf32> to vector<256x16xf32>
    %46 = arith.mulf %36, %45 : vector<256x16xf32>
    %47 = vector.broadcast %29 : vector<1x16xf32> to vector<256x16xf32>
    %48 = arith.mulf %46, %47 : vector<256x16xf32>
    %49 = vector.broadcast %30 : vector<1x16xf32> to vector<256x16xf32>
    %50 = arith.addf %48, %49 : vector<256x16xf32>
    %cst_48 = arith.constant 0.000000e+00 : f32
    %51 = vector.broadcast %cst_48 : f32 to vector<256x16xf32>
    %52 = arith.maximumf %50, %51 : vector<256x16xf32>
    %cst_49 = arith.constant 0.000000e+00 : f32
    %53 = vector.broadcast %cst_49 : f32 to vector<18x18x16xf32>
    %c0_50 = arith.constant 0 : index
    %c0_51 = arith.constant 0 : index
    %c0_52 = arith.constant 0 : index
    %54 = vector.load %arg11[%c0_50, %c0_51, %c0_52] : memref<18x18x16xf32, #tpu.memory_space<vmem>>, vector<18x18x16xf32>
    tpu.vector_store %arg11[%c0_50, %c0_51, %c0_52], %53 {strides = array<i32>} : memref<18x18x16xf32, #tpu.memory_space<vmem>>, vector<18x18x16xf32>,
    %55 = vector.shape_cast %52 : vector<256x16xf32> to vector<16x16x16xf32>
    %c1_53 = arith.constant 1 : index
    %c1_54 = arith.constant 1 : index
    %c0_55 = arith.constant 0 : index
    %56 = vector.load %arg11[%c1_53, %c1_54, %c0_55] : memref<18x18x16xf32, #tpu.memory_space<vmem>>, vector<16x16x16xf32>
    tpu.vector_store %arg11[%c1_53, %c1_54, %c0_55], %55 {strides = array<i32>} : memref<18x18x16xf32, #tpu.memory_space<vmem>>, vector<16x16x16xf32>,
    %c0_56 = arith.constant 0 : index
    %c0_57 = arith.constant 0 : index
    %c0_58 = arith.constant 0 : index
    %57 = vector.load %arg11[%c0_56, %c0_57, %c0_58] : memref<18x18x16xf32, #tpu.memory_space<vmem>>, vector<16x16x16xf32>
    %58 = vector.shape_cast %57 : vector<16x16x16xf32> to vector<256x16xf32>
    %c0_59 = arith.constant 0 : index
    %c1_60 = arith.constant 1 : index
    %c0_61 = arith.constant 0 : index
    %59 = vector.load %arg11[%c0_59, %c1_60, %c0_61] : memref<18x18x16xf32, #tpu.memory_space<vmem>>, vector<16x16x16xf32>
    %60 = vector.shape_cast %59 : vector<16x16x16xf32> to vector<256x16xf32>
    %c0_62 = arith.constant 0 : index
    %c2_63 = arith.constant 2 : index
    %c0_64 = arith.constant 0 : index
    %61 = vector.load %arg11[%c0_62, %c2_63, %c0_64] : memref<18x18x16xf32, #tpu.memory_space<vmem>>, vector<16x16x16xf32>
    %62 = vector.shape_cast %61 : vector<16x16x16xf32> to vector<256x16xf32>
    %c1_65 = arith.constant 1 : index
    %c0_66 = arith.constant 0 : index
    %c0_67 = arith.constant 0 : index
    %63 = vector.load %arg11[%c1_65, %c0_66, %c0_67] : memref<18x18x16xf32, #tpu.memory_space<vmem>>, vector<16x16x16xf32>
    %64 = vector.shape_cast %63 : vector<16x16x16xf32> to vector<256x16xf32>
    %c1_68 = arith.constant 1 : index
    %c1_69 = arith.constant 1 : index
    %c0_70 = arith.constant 0 : index
    %65 = vector.load %arg11[%c1_68, %c1_69, %c0_70] : memref<18x18x16xf32, #tpu.memory_space<vmem>>, vector<16x16x16xf32>
    %66 = vector.shape_cast %65 : vector<16x16x16xf32> to vector<256x16xf32>
    %c1_71 = arith.constant 1 : index
    %c2_72 = arith.constant 2 : index
    %c0_73 = arith.constant 0 : index
    %67 = vector.load %arg11[%c1_71, %c2_72, %c0_73] : memref<18x18x16xf32, #tpu.memory_space<vmem>>, vector<16x16x16xf32>
    %68 = vector.shape_cast %67 : vector<16x16x16xf32> to vector<256x16xf32>
    %c2_74 = arith.constant 2 : index
    %c0_75 = arith.constant 0 : index
    %c0_76 = arith.constant 0 : index
    %69 = vector.load %arg11[%c2_74, %c0_75, %c0_76] : memref<18x18x16xf32, #tpu.memory_space<vmem>>, vector<16x16x16xf32>
    %70 = vector.shape_cast %69 : vector<16x16x16xf32> to vector<256x16xf32>
    %c2_77 = arith.constant 2 : index
    %c1_78 = arith.constant 1 : index
    %c0_79 = arith.constant 0 : index
    %71 = vector.load %arg11[%c2_77, %c1_78, %c0_79] : memref<18x18x16xf32, #tpu.memory_space<vmem>>, vector<16x16x16xf32>
    %72 = vector.shape_cast %71 : vector<16x16x16xf32> to vector<256x16xf32>
    %c2_80 = arith.constant 2 : index
    %c2_81 = arith.constant 2 : index
    %c0_82 = arith.constant 0 : index
    %73 = vector.load %arg11[%c2_80, %c2_81, %c0_82] : memref<18x18x16xf32, #tpu.memory_space<vmem>>, vector<16x16x16xf32>
    %74 = vector.shape_cast %73 : vector<16x16x16xf32> to vector<256x16xf32>
    %75 = tpu.concatenate %58, %60, %62, %64, %66, %68, %70, %72, %74 in 1 : vector<256x16xf32>, vector<256x16xf32>, vector<256x16xf32>, vector<256x16xf32>, vector<256x16xf32>, vector<256x16xf32>, vector<256x16xf32>, vector<256x16xf32>, vector<256x16xf32> -> vector<256x144xf32>
    %c0_83 = arith.constant 0 : index
    %c0_84 = arith.constant 0 : index
    %76 = vector.load %arg6[%c0_83, %c0_84] : memref<144x16xf32, #tpu.memory_space<vmem>>, vector<144x16xf32>
    %cst_85 = arith.constant dense<0.000000e+00> : vector<256x16xf32>
    %77 = tpu.matmul %75, %76, %cst_85 {dimension_numbers = #tpu.dot_dimension_numbers<[1], [0], [0], [1], [0, 0, 1, 1], [], []>} : vector<256x144xf32>, vector<144x16xf32>, vector<256x16xf32> -> vector<256x16xf32>
    %c0_86 = arith.constant 0 : index
    %c0_87 = arith.constant 0 : index
    %78 = vector.load %arg7[%c0_86, %c0_87] : memref<1x16xf32, #tpu.memory_space<vmem>>, vector<1x16xf32>
    %79 = vector.broadcast %78 : vector<1x16xf32> to vector<256x16xf32>
    %80 = arith.addf %77, %79 : vector<256x16xf32>
    %c0_88 = arith.constant 0 : index
    %c0_89 = arith.constant 0 : index
    %81 = vector.load %arg8[%c0_88, %c0_89] : memref<1x16xf32, #tpu.memory_space<vmem>>, vector<1x16xf32>
    %c0_90 = arith.constant 0 : index
    %c0_91 = arith.constant 0 : index
    %82 = vector.load %arg9[%c0_90, %c0_91] : memref<1x16xf32, #tpu.memory_space<vmem>>, vector<1x16xf32>
    %cst_92 = arith.constant dense<0.000000e+00> : vector<16xf32>
    %83 = vector.multi_reduction <add>, %80, %cst_92 [0] : vector<256x16xf32> to vector<16xf32>
    %84 = vector.shape_cast %83 : vector<16xf32> to vector<1x16xf32>
    %cst_93 = arith.constant 3.906250e-03 : f32
    %85 = vector.broadcast %cst_93 : f32 to vector<1x16xf32>
    %86 = arith.mulf %84, %85 : vector<1x16xf32>
    %87 = vector.broadcast %86 : vector<1x16xf32> to vector<256x16xf32>
    %88 = arith.subf %80, %87 : vector<256x16xf32>
    %89 = arith.mulf %88, %88 : vector<256x16xf32>
    %cst_94 = arith.constant dense<0.000000e+00> : vector<16xf32>
    %90 = vector.multi_reduction <add>, %89, %cst_94 [0] : vector<256x16xf32> to vector<16xf32>
    %91 = vector.shape_cast %90 : vector<16xf32> to vector<1x16xf32>
    %cst_95 = arith.constant 3.906250e-03 : f32
    %92 = vector.broadcast %cst_95 : f32 to vector<1x16xf32>
    %93 = arith.mulf %91, %92 : vector<1x16xf32>
    %cst_96 = arith.constant 9.99999974E-6 : f32
    %94 = vector.broadcast %cst_96 : f32 to vector<1x16xf32>
    %95 = arith.addf %93, %94 : vector<1x16xf32>
    %96 = math.rsqrt %95 : vector<1x16xf32>
    %97 = vector.broadcast %96 : vector<1x16xf32> to vector<256x16xf32>
    %98 = arith.mulf %88, %97 : vector<256x16xf32>
    %99 = vector.broadcast %81 : vector<1x16xf32> to vector<256x16xf32>
    %100 = arith.mulf %98, %99 : vector<256x16xf32>
    %101 = vector.broadcast %82 : vector<1x16xf32> to vector<256x16xf32>
    %102 = arith.addf %100, %101 : vector<256x16xf32>
    %cst_97 = arith.constant 0.000000e+00 : f32
    %103 = vector.broadcast %cst_97 : f32 to vector<256x16xf32>
    %104 = arith.maximumf %102, %103 : vector<256x16xf32>
    %c0_98 = arith.constant 0 : index
    %c0_99 = arith.constant 0 : index
    %c0_100 = arith.constant 0 : index
    %105 = vector.load %arg10[%c0_98, %c0_99, %c0_100] : memref<1x256x16xf32, #tpu.memory_space<vmem>>, vector<1x256x16xf32>
    %106 = vector.shape_cast %105 : vector<1x256x16xf32> to vector<256x16xf32>
    %107 = vector.shape_cast %104 : vector<256x16xf32> to vector<1x256x16xf32>
    tpu.vector_store %arg10[%c0_98, %c0_99, %c0_100], %107 {strides = array<i32>} : memref<1x256x16xf32, #tpu.memory_space<vmem>>, vector<1x256x16xf32>,
    return
  }
  func.func @transform_0(%arg0: i32) -> (i32, i32, i32, i32) {
    %c0_i32 = arith.constant 0 : i32
    %c0_i32_0 = arith.constant 0 : i32
    %c0_i32_1 = arith.constant 0 : i32
    %c0_i32_2 = arith.constant 0 : i32
    return %arg0, %c0_i32, %c0_i32_0, %c0_i32_1 : i32, i32, i32, i32
  }
  func.func @transform_1(%arg0: i32) -> (i32, i32) {
    %c0_i32 = arith.constant 0 : i32
    %c0_i32_0 = arith.constant 0 : i32
    %c0_i32_1 = arith.constant 0 : i32
    return %c0_i32, %c0_i32_0 : i32, i32
  }
  func.func @transform_2(%arg0: i32) -> (i32, i32) {
    %c0_i32 = arith.constant 0 : i32
    %c0_i32_0 = arith.constant 0 : i32
    %c0_i32_1 = arith.constant 0 : i32
    return %c0_i32, %c0_i32_0 : i32, i32
  }
  func.func @transform_3(%arg0: i32) -> (i32, i32) {
    %c0_i32 = arith.constant 0 : i32
    %c0_i32_0 = arith.constant 0 : i32
    %c0_i32_1 = arith.constant 0 : i32
    return %c0_i32, %c0_i32_0 : i32, i32
  }
  func.func @transform_4(%arg0: i32) -> (i32, i32) {
    %c0_i32 = arith.constant 0 : i32
    %c0_i32_0 = arith.constant 0 : i32
    %c0_i32_1 = arith.constant 0 : i32
    return %c0_i32, %c0_i32_0 : i32, i32
  }
  func.func @transform_5(%arg0: i32) -> (i32, i32) {
    %c0_i32 = arith.constant 0 : i32
    %c0_i32_0 = arith.constant 0 : i32
    %c0_i32_1 = arith.constant 0 : i32
    return %c0_i32, %c0_i32_0 : i32, i32
  }
  func.func @transform_6(%arg0: i32) -> (i32, i32) {
    %c0_i32 = arith.constant 0 : i32
    %c0_i32_0 = arith.constant 0 : i32
    %c0_i32_1 = arith.constant 0 : i32
    return %c0_i32, %c0_i32_0 : i32, i32
  }
  func.func @transform_7(%arg0: i32) -> (i32, i32) {
    %c0_i32 = arith.constant 0 : i32
    %c0_i32_0 = arith.constant 0 : i32
    %c0_i32_1 = arith.constant 0 : i32
    return %c0_i32, %c0_i32_0 : i32, i32
  }
  func.func @transform_8(%arg0: i32) -> (i32, i32) {
    %c0_i32 = arith.constant 0 : i32
    %c0_i32_0 = arith.constant 0 : i32
    %c0_i32_1 = arith.constant 0 : i32
    return %c0_i32, %c0_i32_0 : i32, i32
  }
  func.func @transform_9(%arg0: i32) -> (i32, i32, i32) {
    %c0_i32 = arith.constant 0 : i32
    %c0_i32_0 = arith.constant 0 : i32
    %c0_i32_1 = arith.constant 0 : i32
    return %arg0, %c0_i32, %c0_i32_0 : i32, i32, i32
  }
}

</mosaic_0001>

<bundles_post_ra>
// kernel: tpu_custom_call.1
= control target key start
LH: loop header
LB: loop body
LE: loop exit
PB: predicated region body
PF: predicated region fallthrough
CT: control target
= control target key end

     0   :  { %s5637_s30 = smov 0   ;;  %s9652_s0 = inlined_call_operand.vmem [shape: f32[2,16,16,4], index: 0, kind: input, shape index: {}]   ;;  %s9653_s1 = inlined_call_operand.vmem [shape: f32[36,16], index: 1, kind: input, shape index: {}]   ;;  %s9654_s2 = inlined_call_operand.vmem [shape: f32[1,16], index: 2, kind: input, shape index: {}]   ;;  %s9655_s3 = inlined_call_operand.vmem [shape: f32[1,16], index: 3, kind: input, shape index: {}]   ;;  %s9656_s4 = inlined_call_operand.vmem [shape: f32[1,16], index: 4, kind: input, shape index: {}]   ;;  %s9657_s5 = inlined_call_operand.vmem [shape: f32[144,16], index: 5, kind: input, shape index: {}]   ;;  %s9658_s6 = inlined_call_operand.vmem [shape: f32[1,16], index: 6, kind: input, shape index: {}]   ;;  %s9659_s7 = inlined_call_operand.vmem [shape: f32[1,16], index: 7, kind: input, shape index: {}]   ;;  %s9660_s8 = inlined_call_operand.vmem [shape: f32[1,16], index: 8, kind: input, shape index: {}]   ;;  %s9661_s9 = inlined_call_operand.vmem [shape: f32[2,256,16], index: 9, kind: output, shape index: {}]  }
   0x1 LB: > { %s4885_s10 = sadd.s32 4294967295, %s5571_s30   ;;  %p4889_p0 = scmp.ge.s32.totalorder %s5571_s30, 1  ;;  %s5571_s30 = sphi %s5637_s30, %s19_s30  }
   0x2   : > { %p287_p1 = scmp.lt.s32.totalorder %s5571_s30, 3 }
   0x4   : > { %p288_p2 = pnand %p4889_p0, %p287_p1 }
   0x6   : > { %291 = sbr.rel (%p288_p2) target bundleno = 1865 (0x749), region = 56 }
   0xb   : > { %vm333_vm0 = vcmask 130048   ;;  %v9662_v0 = vmov 0.0   ;;  %s5574_s11 = smov 4   ;;  %p323_p3 = scmp.lt.s32.totalorder %s4885_s10, 1  ;;  %vm422_vm1 = vcmask 31744   ;;  %vm336_vm2 = vcmask 123904  }
   0xc   : > { %334 = vst.msk [vmem:[#allocation2] sm:$0xff] %vm333_vm0, %v9662_v0  ;;  %s5575_s16 = smov 8   ;;  %s5576_s17 = smov 12   ;;  %vm2136_vm3 = vcmask 1043456   ;;  %vm1800_vm4 = vcmask 64512   ;;  %vm1833_vm5 = vcmask 97280  }
   0xd   : > { %335 = vst.msk [vmem:[#allocation2 + $0x8] sm:$0xff] %vm333_vm0, %v9662_v0  ;;  %s9992_s10 = smov (!%p323_p3, %s4885_s10), 1  ;;  %s5577_s18 = smov 16   ;;  %vm1898_vm6 = vcmask 162816   ;;  %vm1931_vm7 = vcmask 195584   ;;  %vm1964_vm8 = vcmask 228352  }
   0xe   : > { %338 = vst.msk [vmem:[#allocation2 + $0x18] sm:$0xff] %vm333_vm0, %v9662_v0  ;;  %s4961_s12 = sshll.u32 %s9992_s10, 8  ;;  %s5578_s19 = smov 20   ;;  %vm1997_vm9 = vcmask 261120   ;;  %vm2039_vm10 = vcmask 293888   ;;  %vm3938_vm14 = vcmask 392192  }
   0xf   : > { %339 = vst.msk [vmem:[#allocation2 + $0x20] sm:$0xff] %vm333_vm0, %v9662_v0  ;;  %s5720_s15 = scalar_lea.vmem %s9652_s0, %s4961_s12  ;;  %s5579_s20 = smov 28   ;;  %vm3971_vm15 = vcmask 523264  }
  0x10   : > { %341 = vst.msk [vmem:[#allocation2 + $0x30] sm:$0xff] %vm333_vm0, %v9662_v0  ;;  %v391_v2 = vld [vmem:[%s5720_s15 + $0x10] sm:$0xff]  ;;  %v389_v3 = vld [vmem:[%s5720_s15] sm:$0xff]  ;;  %v392_v7 = vld [vmem:[%s5720_s15 + $0x18] sm:$0xff]  ;;  %s5580_s21 = smov 24   ;;  %s5581_s22 = smov 32  }
  0x11   : > { %342 = vst.msk [vmem:[#allocation2 + $0x38] sm:$0xff] %vm333_vm0, %v9662_v0  ;;  %v390_v8 = vld [vmem:[%s5720_s15 + $0x8] sm:$0xff]  ;;  %v393_v9 = vld [vmem:[%s5720_s15 + $0x20] sm:$0xff]  ;;  %v395_v10 = vld [vmem:[%s5720_s15 + $0x30] sm:$0xff]  ;;  %s5583_s27 = smov 48   ;;  %s5584_s28 = smov 80  }
  0x12   : > { %344 = vst.msk [vmem:[#allocation2 + $0x48] sm:$0xff] %vm333_vm0, %v9662_v0  ;;  %v394_v11 = vld [vmem:[%s5720_s15 + $0x28] sm:$0xff]  ;;  %v396_v12 = vld [vmem:[%s5720_s15 + $0x38] sm:$0xff]  ;;  %v397_v14 = vld [vmem:[%s5720_s15 + $0x40] sm:$0xff]  ;;  %s5585_s29 = smov 112  }
  0x13   : > { %345 = vst.msk [vmem:[#allocation2 + $0x50] sm:$0xff] %vm333_vm0, %v9662_v0  ;;  %v398_v13 = vld [vmem:[%s5720_s15 + $0x48] sm:$0xff]  ;;  %v399_v15 = vld [vmem:[%s5720_s15 + $0x50] sm:$0xff]  ;;  %v401_v16 = vld [vmem:[%s5720_s15 + $0x60] sm:$0xff] }
  0x14   : > { %v487_v1 = vld [vmem:[#allocation2 + $0x1] sm:$0xff]  ;;  %347 = vst.msk [vmem:[#allocation2 + $0x60] sm:$0xff] %vm333_vm0, %v9662_v0  ;;  %v400_v18 = vld [vmem:[%s5720_s15 + $0x58] sm:$0xff]  ;;  %v403_v23 = vld [vmem:[%s5720_s15 + $0x70] sm:$0xff] }
  0x15   : > { %776 = vrot.lane.b32.xlu0 %v487_v1, %s5574_s11  ;;  %348 = vst.msk [vmem:[#allocation2 + $0x68] sm:$0xff] %vm333_vm0, %v9662_v0  ;;  %v402_v20 = vld [vmem:[%s5720_s15 + $0x68] sm:$0xff]  ;;  %v404_v22 = vld [vmem:[%s5720_s15 + $0x78] sm:$0xff]  ;;  %v405_v24 = vld [vmem:[%s5720_s15 + $0x80] sm:$0xff] }
  0x16   : > { %350 = vst.msk [vmem:[#allocation2 + $0x78] sm:$0xff] %vm333_vm0, %v9662_v0  ;;  %v407_v25 = vld [vmem:[%s5720_s15 + $0x90] sm:$0xff]  ;;  %v406_v27 = vld [vmem:[%s5720_s15 + $0x88] sm:$0xff]  ;;  %v408_v29 = vld [vmem:[%s5720_s15 + $0x98] sm:$0xff] }
  0x17   : > { %351 = vst.msk [vmem:[#allocation2 + $0x80] sm:$0xff] %vm333_vm0, %v9662_v0  ;;  %v410_v31 = vld [vmem:[%s5720_s15 + $0xa8] sm:$0xff]  ;;  %v409_v32 = vld [vmem:[%s5720_s15 + $0xa0] sm:$0xff]  ;;  %v411_v33 = vld [vmem:[%s5720_s15 + $0xb0] sm:$0xff] }
  0x18   : > { %353 = vst.msk [vmem:[#allocation2 + $0x90] sm:$0xff] %vm333_vm0, %v9662_v0  ;;  %v413_v37 = vld [vmem:[%s5720_s15 + $0xc0] sm:$0xff]  ;;  %v412_v38 = vld [vmem:[%s5720_s15 + $0xb8] sm:$0xff]  ;;  %v414_v39 = vld [vmem:[%s5720_s15 + $0xc8] sm:$0xff] }
  0x19   : > { %354 = vst.msk [vmem:[#allocation2 + $0x98] sm:$0xff] %vm333_vm0, %v9662_v0  ;;  %v416_v43 = vld [vmem:[%s5720_s15 + $0xd8] sm:$0xff]  ;;  %v415_v44 = vld [vmem:[%s5720_s15 + $0xd0] sm:$0xff]  ;;  %v417_v45 = vld [vmem:[%s5720_s15 + $0xe0] sm:$0xff] }
  0x1a   : > { %356 = vst.msk [vmem:[#allocation2 + $0xa8] sm:$0xff] %vm333_vm0, %v9662_v0  ;;  %v418_v49 = vld [vmem:[%s5720_s15 + $0xe8] sm:$0xff] }
  0x1b   : > { %357 = vst.msk [vmem:[#allocation2 + $0xb0] sm:$0xff] %vm333_vm0, %v9662_v0  ;;  %v519_v1 = vld [vmem:[#allocation2 + $0x2] sm:$0xff] }
  0x1c   : > { %359 = vst.msk [vmem:[#allocation2 + $0xc0] sm:$0xff] %vm333_vm0, %v9662_v0 }
  0x1d   : > { %360 = vst.msk [vmem:[#allocation2 + $0xc8] sm:$0xff] %vm333_vm0, %v9662_v0 }
  0x1e   : > { %362 = vst.msk [vmem:[#allocation2 + $0xd8] sm:$0xff] %vm333_vm0, %v9662_v0 }
  0x1f   : > { %363 = vst.msk [vmem:[#allocation2 + $0xe0] sm:$0xff] %vm333_vm0, %v9662_v0 }
  0x20   : > { %365 = vst.msk [vmem:[#allocation2 + $0xf0] sm:$0xff] %vm333_vm0, %v9662_v0 }
  0x21   : > { %366 = vst.msk [vmem:[#allocation2 + $0xf8] sm:$0xff] %vm333_vm0, %v9662_v0 }
  0x22   : > { %368 = vst.msk [vmem:[#allocation2 + $0x108] sm:$0xff] %vm333_vm0, %v9662_v0 }
  0x23   : > { %369 = vst.msk [vmem:[#allocation2 + $0x110] sm:$0xff] %vm333_vm0, %v9662_v0 }
  0x24   : > { %371 = vst.msk [vmem:[#allocation2 + $0x120] sm:$0xff] %vm333_vm0, %v9662_v0 }
  0x25   : > { %372 = vst.msk [vmem:[#allocation2 + $0x128] sm:$0xff] %vm333_vm0, %v9662_v0 }
  0x26   : > { %374 = vst.msk [vmem:[#allocation2 + $0x138] sm:$0xff] %vm333_vm0, %v9662_v0 }
  0x27   : > { %375 = vst.msk [vmem:[#allocation2 + $0x140] sm:$0xff] %vm333_vm0, %v9662_v0 }
  0x28   : > { %377 = vst.msk [vmem:[#allocation2 + $0x150] sm:$0xff] %vm333_vm0, %v9662_v0 }
  0x29   : > { %378 = vst.msk [vmem:[#allocation2 + $0x158] sm:$0xff] %vm333_vm0, %v9662_v0 }
  0x2a   : > { %380 = vst.msk [vmem:[#allocation2 + $0x168] sm:$0xff] %vm333_vm0, %v9662_v0 }
  0x2b   : > { %381 = vst.msk [vmem:[#allocation2 + $0x170] sm:$0xff] %vm333_vm0, %v9662_v0 }
  0x2c   : > { %383 = vst.msk [vmem:[#allocation2 + $0x180] sm:$0xff] %vm333_vm0, %v9662_v0 }
  0x2d   : > { %384 = vst.msk [vmem:[#allocation2 + $0x188] sm:$0xff] %vm333_vm0, %v9662_v0 }
  0x2e   : > { %386 = vst.msk [vmem:[#allocation2 + $0x198] sm:$0xff] %vm333_vm0, %v9662_v0 }
  0x2f   : > { %387 = vst.msk [vmem:[#allocation2 + $0x1a0] sm:$0xff] %vm333_vm0, %v9662_v0 }
  0x30   : > { %425 = vst.msk [vmem:[#allocation2 + $0x31] sm:$0xff] %vm422_vm1, %v391_v2  ;;  %v5951_v2 = vld [vmem:[#allocation2] sm:$0xff] }
  0x31   : > { %423 = vst.msk [vmem:[#allocation2 + $0x19] sm:$0xff] %vm422_vm1, %v389_v3 }
  0x32   : > { %337 = vst.msk [vmem:[#allocation2 + $0x10] sm:$0x3] %vm336_vm2, %v9662_v0 }
  0x33   : > { %340 = vst.msk [vmem:[#allocation2 + $0x28] sm:$0x3] %vm336_vm2, %v9662_v0 }
  0x34   : > { %343 = vst.msk [vmem:[#allocation2 + $0x40] sm:$0x3] %vm336_vm2, %v9662_v0 }
  0x35   : > { %346 = vst.msk [vmem:[#allocation2 + $0x58] sm:$0x3] %vm336_vm2, %v9662_v0 }
  0x36   : > { %349 = vst.msk [vmem:[#allocation2 + $0x70] sm:$0x3] %vm336_vm2, %v9662_v0 }
  0x37   : > { %v5746_v4 = vld [vmem:[#allocation2 + $0x31] sm:$0xff]  ;;  %352 = vst.msk [vmem:[#allocation2 + $0x88] sm:$0x3] %vm336_vm2, %v9662_v0 }
  0x38   : > { %784 = vrot.lane.b32.xlu2 %v5746_v4, %s5574_s11  ;;  %v5752_v5 = vld [vmem:[#allocation2 + $0x19] sm:$0xff]  ;;  %355 = vst.msk [vmem:[#allocation2 + $0xa0] sm:$0x3] %vm336_vm2, %v9662_v0 }
  0x39   : > { %780 = vrot.lane.b32.xlu1 %v5752_v5, %s5574_s11  ;;  %v488_v6 = vld [vmem:[#allocation2 + $0x9] sm:$0xff]  ;;  %358 = vst.msk [vmem:[#allocation2 + $0xb8] sm:$0x3] %vm336_vm2, %v9662_v0 }
  0x3a   : > { %778 = vrot.lane.b32.xlu0 %v488_v6, %s5574_s11  ;;  %361 = vst.msk [vmem:[#allocation2 + $0xd0] sm:$0x3] %vm336_vm2, %v9662_v0  ;;  %v520_v53 = vld [vmem:[#allocation2 + $0xa] sm:$0xff] }
  0x3b   : > { %364 = vst.msk [vmem:[#allocation2 + $0xe8] sm:$0x3] %vm336_vm2, %v9662_v0  ;;  %v5961_v6 = vld [vmem:[#allocation2 + $0x8] sm:$0xff] }
  0x3c   : > { %367 = vst.msk [vmem:[#allocation2 + $0x100] sm:$0x3] %vm336_vm2, %v9662_v0 }
  0x3d   : > { %370 = vst.msk [vmem:[#allocation2 + $0x118] sm:$0x3] %vm336_vm2, %v9662_v0 }
  0x3e   : > { %373 = vst.msk [vmem:[#allocation2 + $0x130] sm:$0x3] %vm336_vm2, %v9662_v0 }
  0x3f   : > { %376 = vst.msk [vmem:[#allocation2 + $0x148] sm:$0x3] %vm336_vm2, %v9662_v0 }
  0x40   : > { %379 = vst.msk [vmem:[#allocation2 + $0x160] sm:$0x3] %vm336_vm2, %v9662_v0 }
  0x41   : > { %382 = vst.msk [vmem:[#allocation2 + $0x178] sm:$0x3] %vm336_vm2, %v9662_v0 }
  0x42   : > { %385 = vst.msk [vmem:[#allocation2 + $0x190] sm:$0x3] %vm336_vm2, %v9662_v0 }
  0x43   : > { %388 = vst.msk [vmem:[#allocation2 + $0x1a8] sm:$0x3] %vm336_vm2, %v9662_v0 }
  0x44   : > { %426 = vst.msk [vmem:[#allocation2 + $0x39] sm:$0xff] %vm422_vm1, %v392_v7 }
  0x45   : > { %424 = vst.msk [vmem:[#allocation2 + $0x21] sm:$0xff] %vm422_vm1, %v390_v8  ;;  %v5965_v8 = vld [vmem:[#allocation2 + $0x18] sm:$0xff] }
  0x46   : > { %427 = vst.msk [vmem:[#allocation2 + $0x49] sm:$0xff] %vm422_vm1, %v393_v9 }
  0x47   : > { %429 = vst.msk [vmem:[#allocation2 + $0x61] sm:$0xff] %vm422_vm1, %v395_v10 }
  0x48   : > { %428 = vst.msk [vmem:[#allocation2 + $0x51] sm:$0xff] %vm422_vm1, %v394_v11 }
  0x49   : > { %430 = vst.msk [vmem:[#allocation2 + $0x69] sm:$0xff] %vm422_vm1, %v396_v12 }
  0x4a   : > { %432 = vst.msk [vmem:[#allocation2 + $0x81] sm:$0xff] %vm422_vm1, %v398_v13 }
  0x4b   : > { %v5798_v17 = vld [vmem:[#allocation2 + $0x39] sm:$0xff]  ;;  %431 = vst.msk [vmem:[#allocation2 + $0x79] sm:$0xff] %vm422_vm1, %v397_v14 }
  0x4c   : > { %786 = vrot.lane.b32.xlu2 %v5798_v17, %s5574_s11  ;;  %v5804_v19 = vld [vmem:[#allocation2 + $0x21] sm:$0xff]  ;;  %433 = vst.msk [vmem:[#allocation2 + $0x91] sm:$0xff] %vm422_vm1, %v399_v15  ;;  %v5971_v9 = vld [vmem:[#allocation2 + $0x32] sm:$0xff] }
  0x4d   : > { %782 = vrot.lane.b32.xlu1 %v5804_v19, %s5574_s11  ;;  %v5810_v21 = vld [vmem:[#allocation2 + $0x49] sm:$0xff]  ;;  %435 = vst.msk [vmem:[#allocation2 + $0xa9] sm:$0xff] %vm422_vm1, %v401_v16  ;;  %v5963_v7 = vld [vmem:[#allocation2 + $0x1a] sm:$0xff] }
  0x4e   : > { %788 = vrot.lane.b32.xlu0 %v5810_v21, %s5574_s11  ;;  %434 = vst.msk [vmem:[#allocation2 + $0x99] sm:$0xff] %vm422_vm1, %v400_v18  ;;  %v5822_v26 = vld [vmem:[#allocation2 + $0x61] sm:$0xff] }
  0x4f   : > { %436 = vst.msk [vmem:[#allocation2 + $0xb1] sm:$0xff] %vm422_vm1, %v402_v20  ;;  %v5826_v28 = vld [vmem:[#allocation2 + $0x51] sm:$0xff]  ;;  %v5911_v54 = vld [vmem:[#allocation2 + $0x22] sm:$0xff]  ;;  %v5987_v13 = vld [vmem:[#allocation2 + $0x3a] sm:$0xff] }
  0x50   : > { %438 = vst.msk [vmem:[#allocation2 + $0xc9] sm:$0xff] %vm422_vm1, %v404_v22  ;;  %v5830_v30 = vld [vmem:[#allocation2 + $0x69] sm:$0xff]  ;;  %v5981_v11 = vld [vmem:[#allocation2 + $0x20] sm:$0xff]  ;;  %v5989_v14 = vld [vmem:[#allocation2 + $0x52] sm:$0xff] }
  0x51   : > { %437 = vst.msk [vmem:[#allocation2 + $0xc1] sm:$0xff] %vm422_vm1, %v403_v23  ;;  %v5847_v34 = vld [vmem:[#allocation2 + $0x81] sm:$0xff]  ;;  %v5985_v12 = vld [vmem:[#allocation2 + $0x4a] sm:$0xff] }
  0x52   : > { %439 = vst.msk [vmem:[#allocation2 + $0xd9] sm:$0xff] %vm422_vm1, %v405_v24  ;;  %v5849_v35 = vld [vmem:[#allocation2 + $0x79] sm:$0xff]  ;;  %v5999_v16 = vld [vmem:[#allocation2 + $0x6a] sm:$0xff]  ;;  %v6001_v18 = vld [vmem:[#allocation2 + $0x62] sm:$0xff] }
  0x53   : > { %441 = vst.msk [vmem:[#allocation2 + $0xf1] sm:$0xff] %vm422_vm1, %v407_v25  ;;  %v5851_v36 = vld [vmem:[#allocation2 + $0x91] sm:$0xff]  ;;  %v6003_v20 = vld [vmem:[#allocation2 + $0x7a] sm:$0xff]  ;;  %v6017_v25 = vld [vmem:[#allocation2 + $0x82] sm:$0xff] }
  0x54   : > { %792 = vrot.lane.b32.xlu2 %v5822_v26, %s5574_s11  ;;  %440 = vst.msk [vmem:[#allocation2 + $0xe1] sm:$0xff] %vm422_vm1, %v406_v27  ;;  %v5865_v40 = vld [vmem:[#allocation2 + $0xa9] sm:$0xff] }
  0x55   : > { %790 = vrot.lane.b32.xlu1 %v5826_v28, %s5574_s11  ;;  %442 = vst.msk [vmem:[#allocation2 + $0xf9] sm:$0xff] %vm422_vm1, %v408_v29  ;;  %v5867_v41 = vld [vmem:[#allocation2 + $0x99] sm:$0xff] }
  0x56   : > { %794 = vrot.lane.b32.xlu0 %v5830_v30, %s5574_s11  ;;  %444 = vst.msk [vmem:[#allocation2 + $0x111] sm:$0xff] %vm422_vm1, %v410_v31  ;;  %v5869_v42 = vld [vmem:[#allocation2 + $0xb1] sm:$0xff]  ;;  %v6019_v27 = vld [vmem:[#allocation2 + $0x9a] sm:$0xff] }
  0x57   : > { %443 = vst.msk [vmem:[#allocation2 + $0x109] sm:$0xff] %vm422_vm1, %v409_v32  ;;  %v5883_v46 = vld [vmem:[#allocation2 + $0xc9] sm:$0xff]  ;;  %v6015_v24 = vld [vmem:[#allocation2 + $0x92] sm:$0xff] }
  0x58   : > { %445 = vst.msk [vmem:[#allocation2 + $0x121] sm:$0xff] %vm422_vm1, %v411_v33  ;;  %v5885_v47 = vld [vmem:[#allocation2 + $0xc1] sm:$0xff]  ;;  %v6033_v33 = vld [vmem:[#allocation2 + $0xb2] sm:$0xff] }
  0x59   : > { %447 = vst.msk [vmem:[#allocation2 + $0x139] sm:$0xff] %vm422_vm1, %v413_v37  ;;  %v5887_v48 = vld [vmem:[#allocation2 + $0xd9] sm:$0xff]  ;;  %v6035_v37 = vld [vmem:[#allocation2 + $0xaa] sm:$0xff] }
  0x5a   : > { %446 = vst.msk [vmem:[#allocation2 + $0x129] sm:$0xff] %vm422_vm1, %v412_v38  ;;  %v5897_v50 = vld [vmem:[#allocation2 + $0xf1] sm:$0xff]  ;;  %v6037_v38 = vld [vmem:[#allocation2 + $0xc2] sm:$0xff] }
  0x5b   : > { %448 = vst.msk [vmem:[#allocation2 + $0x141] sm:$0xff] %vm422_vm1, %v414_v39  ;;  %v5899_v51 = vld [vmem:[#allocation2 + $0xe1] sm:$0xff] }
  0x5c   : > { %798 = vrot.lane.b32.xlu2 %v5847_v34, %s5574_s11  ;;  %450 = vst.msk [vmem:[#allocation2 + $0x159] sm:$0xff] %vm422_vm1, %v416_v43  ;;  %v5901_v52 = vld [vmem:[#allocation2 + $0xf9] sm:$0xff] }
  0x5d   : > { %796 = vrot.lane.b32.xlu1 %v5849_v35, %s5574_s11  ;;  %449 = vst.msk [vmem:[#allocation2 + $0x151] sm:$0xff] %vm422_vm1, %v415_v44  ;;  %v5915_v55 = vld [vmem:[#allocation2 + $0x111] sm:$0xff] }
  0x5e   : > { %800 = vrot.lane.b32.xlu0 %v5851_v36, %s5574_s11  ;;  %451 = vst.msk [vmem:[#allocation2 + $0x169] sm:$0xff] %vm422_vm1, %v417_v45  ;;  %v5917_v56 = vld [vmem:[#allocation2 + $0x109] sm:$0xff]  ;;  %v6051_v45 = vld [vmem:[#allocation2 + $0xda] sm:$0xff] }
  0x5f   : > { %452 = vst.msk [vmem:[#allocation2 + $0x171] sm:$0xff] %vm422_vm1, %v418_v49  ;;  %v5919_v57 = vld [vmem:[#allocation2 + $0x121] sm:$0xff]  ;;  %v6053_v49 = vld [vmem:[#allocation2 + $0xca] sm:$0xff] }
  0x60   : > { %2606 = vst.msk [vmem:[#allocation2 + $0x10] sm:$0x3] %vm336_vm2, %v9662_v0  ;;  %v5927_v58 = vld [vmem:[#allocation2 + $0x139] sm:$0xff] }
  0x61   : > { %2609 = vst.msk [vmem:[#allocation2 + $0x28] sm:$0x3] %vm336_vm2, %v9662_v0  ;;  %v5929_v59 = vld [vmem:[#allocation2 + $0x129] sm:$0xff] }
  0x62   : > { %v5931_v60 = vld [vmem:[#allocation2 + $0x141] sm:$0xff]  ;;  %9694 = vst [vmem:[#allocation3_spill] sm:$0xff] %v5951_v2  ;;  %v6167_v2 = vld [vmem:[#allocation2 + $0x98] sm:$0xff] }
  0x63   : > { %v5939_v61 = vld [vmem:[#allocation2 + $0x159] sm:$0xff]  ;;  %2604 = vst.msk [vmem:[#allocation2] sm:$0xff] %vm333_vm0, %v9662_v0 }
  0x64   : > { %804 = vrot.lane.b32.xlu2 %v5865_v40, %s5574_s11  ;;  %v5941_v62 = vld [vmem:[#allocation2 + $0x151] sm:$0xff]  ;;  %9695 = vst [vmem:[#allocation4_spill] sm:$0xff] %v5961_v6 }
  0x65   : > { %802 = vrot.lane.b32.xlu1 %v5867_v41, %s5574_s11  ;;  %v5943_v63 = vld [vmem:[#allocation2 + $0x169] sm:$0xff]  ;;  %9696 = vst [vmem:[#allocation5_spill] sm:$0xff] %v5965_v8 }
  0x66   : > { %806 = vrot.lane.b32.xlu0 %v5869_v42, %s5574_s11  ;;  %v5955_v3 = vld [vmem:[#allocation2 + $0x171] sm:$0xff]  ;;  %2605 = vst.msk [vmem:[#allocation2 + $0x8] sm:$0xff] %vm333_vm0, %v9662_v0 }
  0x67   : > { %2607 = vst.msk [vmem:[#allocation2 + $0x18] sm:$0xff] %vm333_vm0, %v9662_v0 }
  0x68   : > { %9698 = vst [vmem:[#allocation7_spill] sm:$0xff] %v5981_v11 }
  0x69   : > { %2608 = vst.msk [vmem:[#allocation2 + $0x20] sm:$0xff] %vm333_vm0, %v9662_v0 }
  0x6a   : > { %9737 = vst [vmem:[#allocation46_spill] sm:$0xff] %v6167_v2 }
  0x6c   : > { %810 = vrot.lane.b32.xlu2 %v5883_v46, %s5574_s11 }
  0x6d   : > { %808 = vrot.lane.b32.xlu1 %v5885_v47, %s5574_s11 }
  0x6e   : > { %812 = vrot.lane.b32.xlu0 %v5887_v48, %s5574_s11 }
  0x74   : > { %816 = vrot.lane.b32.xlu2 %v5897_v50, %s5574_s11 }
  0x75   : > { %814 = vrot.lane.b32.xlu1 %v5899_v51, %s5574_s11 }
  0x76   : > { %818 = vrot.lane.b32.xlu0 %v5901_v52, %s5574_s11 }
  0x7c   : > { %822 = vrot.lane.b32.xlu2 %v5915_v55, %s5574_s11 }
  0x7d   : > { %820 = vrot.lane.b32.xlu1 %v5917_v56, %s5574_s11 }
  0x7e   : > { %824 = vrot.lane.b32.xlu0 %v5919_v57, %s5574_s11 }
  0x84   : > { %828 = vrot.lane.b32.xlu2 %v5927_v58, %s5574_s11 }
  0x85   : > { %826 = vrot.lane.b32.xlu1 %v5929_v59, %s5574_s11 }
  0x86   : > { %830 = vrot.lane.b32.xlu0 %v5931_v60, %s5574_s11 }
  0x87   : > { %v6007_v22 = vpop.permute.xlu0 %776 }
  0x88   : > { %9700 = vst [vmem:[#allocation9_spill] sm:$0xff] %v6007_v22  ;;  %v6181_v22 = vld [vmem:[#allocation2 + $0xa8] sm:$0xff] }
  0x89   : > { %9742 = vst [vmem:[#allocation51_spill] sm:$0xff] %v6181_v22 }
  0x8c   : > { %834 = vrot.lane.b32.xlu2 %v5939_v61, %s5574_s11 }
  0x8d   : > { %832 = vrot.lane.b32.xlu1 %v5941_v62, %s5574_s11 }
  0x8e   : > { %836 = vrot.lane.b32.xlu0 %v5943_v63, %s5574_s11 }
  0x92   : > { %v5975_v10 = vpop.permute.xlu2 %784 }
  0x93   : > { %9697 = vst [vmem:[#allocation6_spill] sm:$0xff] %v5975_v10  ;;  %v542_v10 = vld [vmem:[#allocation2 + $0x112] sm:$0xff] }
  0x94   : > { %904 = vrot.lane.b32.xlu2 %v519_v1, %s5575_s16 }
  0x95   : > { %838 = vrot.lane.b32.xlu1 %v5955_v3, %s5574_s11  ;;  %s5586_s11 = smov 96  }
  0x96   : > { %906 = vrot.lane.b32.xlu0 %v520_v53, %s5575_s16  ;;  %v6055_v53 = vld [vmem:[#allocation2 + $0xe2] sm:$0xff] }
  0x9c   : > { %910 = vrot.lane.b32.xlu2 %v5911_v54, %s5575_s16 }
  0x9d   : > { %908 = vrot.lane.b32.xlu1 %v5963_v7, %s5575_s16 }
  0x9e   : > { %912 = vrot.lane.b32.xlu0 %v5971_v9, %s5575_s16 }
  0xa4   : > { %916 = vrot.lane.b32.xlu2 %v5985_v12, %s5575_s16 }
  0xa5   : > { %914 = vrot.lane.b32.xlu1 %v5987_v13, %s5575_s16 }
  0xa6   : > { %918 = vrot.lane.b32.xlu0 %v5989_v14, %s5575_s16  ;;  %v5997_v15 = vpop.permute.xlu2 %786 }
  0xa7   : > { %9699 = vst [vmem:[#allocation8_spill] sm:$0xff] %v5997_v15 }
  0xab   : > { %v6025_v29 = vpop.permute.xlu1 %780 }
  0xac   : > { %922 = vrot.lane.b32.xlu2 %v5999_v16, %s5575_s16  ;;  %9702 = vst [vmem:[#allocation11_spill] sm:$0xff] %v6025_v29  ;;  %v6031_v32 = vpop.permute.xlu0 %778 }
  0xad   : > { %920 = vrot.lane.b32.xlu1 %v6001_v18, %s5575_s16  ;;  %9704 = vst [vmem:[#allocation13_spill] sm:$0xff] %v6031_v32  ;;  %v545_v32 = vld [vmem:[#allocation2 + $0x13a] sm:$0xff] }
  0xae   : > { %924 = vrot.lane.b32.xlu0 %v6003_v20, %s5575_s16  ;;  %v6013_v23 = vpop.permute.xlu2 %792 }
  0xaf   : > { %9701 = vst [vmem:[#allocation10_spill] sm:$0xff] %v6013_v23  ;;  %v6071_v23 = vld [vmem:[#allocation2 + $0xf2] sm:$0xff] }
  0xb4   : > { %928 = vrot.lane.b32.xlu2 %v6015_v24, %s5575_s16 }
  0xb5   : > { %926 = vrot.lane.b32.xlu1 %v6017_v25, %s5575_s16 }
  0xb6   : > { %930 = vrot.lane.b32.xlu0 %v6019_v27, %s5575_s16  ;;  %v6029_v31 = vpop.permute.xlu2 %798 }
  0xb7   : > { %9703 = vst [vmem:[#allocation12_spill] sm:$0xff] %v6029_v31  ;;  %v6069_v31 = vld [vmem:[#allocation2 + $0xfa] sm:$0xff] }
  0xbc   : > { %934 = vrot.lane.b32.xlu2 %v6033_v33, %s5575_s16 }
  0xbd   : > { %932 = vrot.lane.b32.xlu1 %v6035_v37, %s5575_s16 }
  0xbe   : > { %936 = vrot.lane.b32.xlu0 %v6037_v38, %s5575_s16  ;;  %v6045_v39 = vpop.permute.xlu2 %804 }
  0xbf   : > { %9705 = vst [vmem:[#allocation14_spill] sm:$0xff] %v6045_v39  ;;  %v6047_v43 = vpop.permute.xlu1 %782 }
  0xc0   : > { %9706 = vst [vmem:[#allocation15_spill] sm:$0xff] %v6047_v43  ;;  %v6049_v44 = vpop.permute.xlu0 %788  ;;  %v544_v43 = vld [vmem:[#allocation2 + $0x12a] sm:$0xff] }
  0xc1   : > { %9707 = vst [vmem:[#allocation16_spill] sm:$0xff] %v6049_v44  ;;  %v541_v44 = vld [vmem:[#allocation2 + $0x10a] sm:$0xff] }
  0xc4   : > { %940 = vrot.lane.b32.xlu2 %v6051_v45, %s5575_s16 }
  0xc5   : > { %938 = vrot.lane.b32.xlu1 %v6053_v49, %s5575_s16 }
  0xc6   : > { %942 = vrot.lane.b32.xlu0 %v6055_v53, %s5575_s16  ;;  %v6063_v1 = vpop.permute.xlu2 %810 }
  0xc7   : > { %9708 = vst [vmem:[#allocation17_spill] sm:$0xff] %v6063_v1  ;;  %v6065_v0 = vpop.permute.xlu1 %790 }
  0xc8   : > { %9709 = vst [vmem:[#allocation18_spill] sm:$0xff] %v6065_v0  ;;  %v6067_v39 = vpop.permute.xlu0 %794 }
  0xc9   : > { %9710 = vst [vmem:[#allocation19_spill] sm:$0xff] %v6067_v39  ;;  %v543_v39 = vld [vmem:[#allocation2 + $0x122] sm:$0xff] }
  0xcc   : > { %946 = vrot.lane.b32.xlu2 %v6069_v31, %s5575_s16 }
  0xcd   : > { %944 = vrot.lane.b32.xlu1 %v6071_v23, %s5575_s16 }
  0xce   : > { %948 = vrot.lane.b32.xlu0 %v541_v44, %s5575_s16  ;;  %v6078_v15 = vpop.permute.xlu2 %816 }
  0xcf   : > { %9711 = vst [vmem:[#allocation20_spill] sm:$0xff] %v6078_v15  ;;  %v6080_v1 = vpop.permute.xlu1 %796  ;;  %v546_v15 = vld [vmem:[#allocation2 + $0x142] sm:$0xff] }
  0xd0   : > { %9712 = vst [vmem:[#allocation21_spill] sm:$0xff] %v6080_v1  ;;  %v6082_v0 = vpop.permute.xlu0 %800  ;;  %v547_v1 = vld [vmem:[#allocation2 + $0x152] sm:$0xff] }
  0xd1   : > { %9713 = vst [vmem:[#allocation22_spill] sm:$0xff] %v6082_v0  ;;  %v548_v0 = vld [vmem:[#allocation2 + $0x15a] sm:$0xff] }
  0xd4   : > { %952 = vrot.lane.b32.xlu2 %v543_v39, %s5575_s16 }
  0xd5   : > { %950 = vrot.lane.b32.xlu1 %v542_v10, %s5575_s16 }
  0xd6   : > { %954 = vrot.lane.b32.xlu0 %v544_v43, %s5575_s16  ;;  %v6087_v29 = vpop.permute.xlu2 %822 }
  0xd7   : > { %9714 = vst [vmem:[#allocation23_spill] sm:$0xff] %v6087_v29  ;;  %v6089_v6 = vpop.permute.xlu1 %802  ;;  %v549_v29 = vld [vmem:[#allocation2 + $0x16a] sm:$0xff] }
  0xd8   : > { %9715 = vst [vmem:[#allocation24_spill] sm:$0xff] %v6089_v6  ;;  %v6091_v44 = vpop.permute.xlu0 %806  ;;  %v550_v6 = vld [vmem:[#allocation2 + $0x172] sm:$0xff] }
  0xd9   : > { %9716 = vst [vmem:[#allocation25_spill] sm:$0xff] %v6091_v44  ;;  %v6145_v44 = vld [vmem:[#allocation2 + $0x60] sm:$0xff] }
  0xda   : > { %9730 = vst [vmem:[#allocation39_spill] sm:$0xff] %v6145_v44 }
  0xdc   : > { %958 = vrot.lane.b32.xlu2 %v546_v15, %s5575_s16 }
  0xdd   : > { %956 = vrot.lane.b32.xlu1 %v545_v32, %s5575_s16 }
  0xde   : > { %960 = vrot.lane.b32.xlu0 %v547_v1, %s5575_s16  ;;  %v6096_v39 = vpop.permute.xlu2 %828 }
  0xdf   : > { %9717 = vst [vmem:[#allocation26_spill] sm:$0xff] %v6096_v39  ;;  %v6098_v10 = vpop.permute.xlu1 %808  ;;  %v6113_v39 = vld [vmem:[#allocation2 + $0x30] sm:$0xff] }
  0xe0   : > { %9718 = vst [vmem:[#allocation27_spill] sm:$0xff] %v6098_v10  ;;  %v6100_v43 = vpop.permute.xlu0 %812  ;;  %v6143_v10 = vld [vmem:[#allocation2 + $0x68] sm:$0xff] }
  0xe1   : > { %9719 = vst [vmem:[#allocation28_spill] sm:$0xff] %v6100_v43 }
  0xe2   : > { %9729 = vst [vmem:[#allocation38_spill] sm:$0xff] %v6143_v10 }
  0xe4   : > { %964 = vrot.lane.b32.xlu2 %v549_v29, %s5575_s16 }
  0xe5   : > { %962 = vrot.lane.b32.xlu1 %v548_v0, %s5575_s16 }
  0xe6   : > { %966 = vrot.lane.b32.xlu0 %v550_v6, %s5575_s16  ;;  %v6105_v15 = vpop.permute.xlu2 %834 }
  0xe7   : > { %9720 = vst [vmem:[#allocation29_spill] sm:$0xff] %v6105_v15  ;;  %v6107_v32 = vpop.permute.xlu1 %814  ;;  %v6125_v15 = vld [vmem:[#allocation2 + $0x48] sm:$0xff] }
  0xe8   : > { %9721 = vst [vmem:[#allocation30_spill] sm:$0xff] %v6107_v32  ;;  %v6109_v1 = vpop.permute.xlu0 %818  ;;  %v6131_v32 = vld [vmem:[#allocation2 + $0x50] sm:$0xff] }
  0xe9   : > { %9722 = vst [vmem:[#allocation31_spill] sm:$0xff] %v6109_v1  ;;  %v6127_v1 = vld [vmem:[#allocation2 + $0x38] sm:$0xff] }
  0xec   : > { %1034 = vrot.lane.b32.xlu2 %v5981_v11, %s5576_s17  ;;  %v6149_v11 = vld [vmem:[#allocation2 + $0x78] sm:$0xff] }
  0xed   : > { %1032 = vrot.lane.b32.xlu1 %v5965_v8, %s5576_s17  ;;  %9731 = vst [vmem:[#allocation40_spill] sm:$0xff] %v6149_v11  ;;  %v6161_v8 = vld [vmem:[#allocation2 + $0x90] sm:$0xff] }
  0xee   : > { %1036 = vrot.lane.b32.xlu0 %v6113_v39, %s5576_s17  ;;  %v6119_v0 = vpop.permute.xlu2 %904  ;;  %9735 = vst [vmem:[#allocation44_spill] sm:$0xff] %v6161_v8 }
  0xef   : > { %9723 = vst [vmem:[#allocation32_spill] sm:$0xff] %v6119_v0  ;;  %v6121_v6 = vpop.permute.xlu1 %820  ;;  %v6163_v0 = vld [vmem:[#allocation2 + $0x80] sm:$0xff] }
  0xf0   : > { %9724 = vst [vmem:[#allocation33_spill] sm:$0xff] %v6121_v6  ;;  %v6123_v29 = vpop.permute.xlu0 %824 }
  0xf1   : > { %9725 = vst [vmem:[#allocation34_spill] sm:$0xff] %v6123_v29 }
  0xf2   : > { %9736 = vst [vmem:[#allocation45_spill] sm:$0xff] %v6163_v0 }
  0xf4   : > { %1040 = vrot.lane.b32.xlu2 %v6125_v15, %s5576_s17 }
  0xf5   : > { %1038 = vrot.lane.b32.xlu1 %v6127_v1, %s5576_s17 }
  0xf6   : > { %1042 = vrot.lane.b32.xlu0 %v6131_v32, %s5576_s17  ;;  %v6137_v43 = vpop.permute.xlu2 %910 }
  0xf7   : > { %9726 = vst [vmem:[#allocation35_spill] sm:$0xff] %v6137_v43  ;;  %v6139_v6 = vpop.permute.xlu1 %826 }
  0xf8   : > { %9727 = vst [vmem:[#allocation36_spill] sm:$0xff] %v6139_v6  ;;  %v6141_v29 = vpop.permute.xlu0 %830 }
  0xf9   : > { %9728 = vst [vmem:[#allocation37_spill] sm:$0xff] %v6141_v29 }
  0xfc   : > { %1046 = vrot.lane.b32.xlu2 %v6143_v10, %s5576_s17  ;;  %v6205_v10 = vld [vmem:[#allocation2 + $0xe0] sm:$0xff] }
  0xfd   : > { %1044 = vrot.lane.b32.xlu1 %v6145_v44, %s5576_s17  ;;  %9748 = vst [vmem:[#allocation57_spill] sm:$0xff] %v6205_v10 }
  0xfe   : > { %1048 = vrot.lane.b32.xlu0 %v6149_v11, %s5576_s17  ;;  %v6155_v43 = vpop.permute.xlu2 %916  ;;  %v420_v11 = vld [vmem:[%s5720_s15 + $0xf8] sm:$0xff] }
  0xff   : > { %9732 = vst [vmem:[#allocation41_spill] sm:$0xff] %v6155_v43  ;;  %v6157_v6 = vpop.permute.xlu1 %832  ;;  %v6179_v43 = vld [vmem:[#allocation2 + $0xb0] sm:$0xff] }
 0x100   : > { %9733 = vst [vmem:[#allocation42_spill] sm:$0xff] %v6157_v6  ;;  %v6159_v29 = vpop.permute.xlu0 %836 }
 0x101   : > { %9734 = vst [vmem:[#allocation43_spill] sm:$0xff] %v6159_v29 }
 0x102   : > { %9741 = vst [vmem:[#allocation50_spill] sm:$0xff] %v6179_v43 }
 0x103   : > { %454 = vst.msk [vmem:[#allocation2 + $0x189] sm:$0xff] %vm422_vm1, %v420_v11 }
 0x104   : > { %1052 = vrot.lane.b32.xlu2 %v6161_v8, %s5576_s17  ;;  %v6185_v8 = vld [vmem:[#allocation2 + $0xc0] sm:$0xff] }
 0x105   : > { %1050 = vrot.lane.b32.xlu1 %v6163_v0, %s5576_s17  ;;  %9743 = vst [vmem:[#allocation52_spill] sm:$0xff] %v6185_v8 }
 0x106   : > { %1054 = vrot.lane.b32.xlu0 %v6167_v2, %s5576_s17  ;;  %v6173_v44 = vpop.permute.xlu2 %922 }
 0x107   : > { %9738 = vst [vmem:[#allocation47_spill] sm:$0xff] %v6173_v44  ;;  %v6175_v29 = vpop.permute.xlu1 %838  ;;  %v6197_v44 = vld [vmem:[#allocation2 + $0xd8] sm:$0xff] }
 0x108   : > { %9739 = vst [vmem:[#allocation48_spill] sm:$0xff] %v6175_v29  ;;  %v6177_v6 = vpop.permute.xlu0 %906 }
 0x109   : > { %9740 = vst [vmem:[#allocation49_spill] sm:$0xff] %v6177_v6  ;;  %v6199_v6 = vld [vmem:[#allocation2 + $0xc8] sm:$0xff] }
 0x10a   : > { %9746 = vst [vmem:[#allocation55_spill] sm:$0xff] %v6197_v44 }
 0x10b   : > { %9747 = vst [vmem:[#allocation56_spill] sm:$0xff] %v6199_v6 }
 0x10c   : > { %1058 = vrot.lane.b32.xlu2 %v6179_v43, %s5576_s17  ;;  %v419_v43 = vld [vmem:[%s5720_s15 + $0xf0] sm:$0xff]  ;;  %s9497_s15 = scalar_lea.vmem %s9661_s9, %s4961_s12 }
 0x10d   : > { %1056 = vrot.lane.b32.xlu1 %v6181_v22, %s5576_s17  ;;  %453 = vst.msk [vmem:[#allocation2 + $0x181] sm:$0xff] %vm422_vm1, %v419_v43 }
 0x10e   : > { %1060 = vrot.lane.b32.xlu0 %v6185_v8, %s5576_s17  ;;  %v6191_v2 = vpop.permute.xlu2 %928 }
 0x10f   : > { %9744 = vst [vmem:[#allocation53_spill] sm:$0xff] %v6191_v2  ;;  %v6193_v29 = vpop.permute.xlu1 %908 }
 0x110   : > { %v6195_v0 = vpop.permute.xlu0 %912 }
 0x111   : > { %9745 = vst [vmem:[#allocation54_spill] sm:$0xff] %v6195_v0  ;;  %v6221_v0 = vld [vmem:[#allocation2 + $0xf0] sm:$0xff] }
 0x112   : > { %9752 = vst [vmem:[#allocation61_spill] sm:$0xff] %v6221_v0 }
 0x114   : > { %1064 = vrot.lane.b32.xlu2 %v6197_v44, %s5576_s17  ;;  %v6219_v44 = vld [vmem:[#allocation2 + $0xf8] sm:$0xff] }
 0x115   : > { %1062 = vrot.lane.b32.xlu1 %v6199_v6, %s5576_s17  ;;  %9751 = vst [vmem:[#allocation60_spill] sm:$0xff] %v6219_v44  ;;  %v6225_v6 = vld [vmem:[#allocation2 + $0x108] sm:$0xff] }
 0x116   : > { %1066 = vrot.lane.b32.xlu0 %v6205_v10, %s5576_s17  ;;  %v6212_v8 = vpop.permute.xlu2 %934  ;;  %9753 = vst [vmem:[#allocation62_spill] sm:$0xff] %v6225_v6 }
 0x117   : > { %9749 = vst [vmem:[#allocation58_spill] sm:$0xff] %v6212_v8  ;;  %v6215_v22 = vpop.permute.xlu1 %914  ;;  %v6237_v8 = vld [vmem:[#allocation2 + $0x120] sm:$0xff] }
 0x118   : > { %v6217_v2 = vpop.permute.xlu0 %918  ;;  %9757 = vst [vmem:[#allocation66_spill] sm:$0xff] %v6237_v8 }
 0x119   : > { %9750 = vst [vmem:[#allocation59_spill] sm:$0xff] %v6217_v2  ;;  %v6239_v2 = vld [vmem:[#allocation2 + $0x110] sm:$0xff] }
 0x11a   : > { %9758 = vst [vmem:[#allocation67_spill] sm:$0xff] %v6239_v2 }
 0x11c   : > { %1070 = vrot.lane.b32.xlu2 %v6219_v44, %s5576_s17  ;;  %v6243_v44 = vld [vmem:[#allocation2 + $0x128] sm:$0xff] }
 0x11d   : > { %1068 = vrot.lane.b32.xlu1 %v6221_v0, %s5576_s17  ;;  %9759 = vst [vmem:[#allocation68_spill] sm:$0xff] %v6243_v44 }
 0x11e   : > { %1072 = vrot.lane.b32.xlu0 %v6225_v6, %s5576_s17  ;;  %v6231_v11 = vpop.permute.xlu2 %940 }
 0x11f   : > { %9754 = vst [vmem:[#allocation63_spill] sm:$0xff] %v6231_v11  ;;  %v6233_v43 = vpop.permute.xlu1 %920 }
 0x120   : > { %9755 = vst [vmem:[#allocation64_spill] sm:$0xff] %v6233_v43  ;;  %v6235_v10 = vpop.permute.xlu0 %924  ;;  %v6257_v43 = vld [vmem:[#allocation2 + $0x138] sm:$0xff] }
 0x121   : > { %9756 = vst [vmem:[#allocation65_spill] sm:$0xff] %v6235_v10  ;;  %v6255_v10 = vld [vmem:[#allocation2 + $0x140] sm:$0xff] }
 0x122   : > { %9763 = vst [vmem:[#allocation72_spill] sm:$0xff] %v6255_v10 }
 0x123   : > { %9764 = vst [vmem:[#allocation73_spill] sm:$0xff] %v6257_v43 }
 0x124   : > { %1076 = vrot.lane.b32.xlu2 %v6237_v8, %s5576_s17  ;;  %v6261_v8 = vld [vmem:[#allocation2 + $0x150] sm:$0xff] }
 0x125   : > { %1074 = vrot.lane.b32.xlu1 %v6239_v2, %s5576_s17  ;;  %9765 = vst [vmem:[#allocation74_spill] sm:$0xff] %v6261_v8 }
 0x126   : > { %1078 = vrot.lane.b32.xlu0 %v6243_v44, %s5576_s17  ;;  %v6249_v6 = vpop.permute.xlu2 %946 }
 0x127   : > { %9760 = vst [vmem:[#allocation69_spill] sm:$0xff] %v6249_v6  ;;  %v6251_v0 = vpop.permute.xlu1 %926 }
 0x128   : > { %9761 = vst [vmem:[#allocation70_spill] sm:$0xff] %v6251_v0  ;;  %v6253_v11 = vpop.permute.xlu0 %930  ;;  %v6275_v0 = vld [vmem:[#allocation2 + $0x158] sm:$0xff] }
 0x129   : > { %9762 = vst [vmem:[#allocation71_spill] sm:$0xff] %v6253_v11  ;;  %v6273_v11 = vld [vmem:[#allocation2 + $0x168] sm:$0xff] }
 0x12a   : > { %9769 = vst [vmem:[#allocation78_spill] sm:$0xff] %v6273_v11 }
 0x12b   : > { %9770 = vst [vmem:[#allocation79_spill] sm:$0xff] %v6275_v0 }
 0x12c   : > { %1082 = vrot.lane.b32.xlu2 %v6255_v10, %s5576_s17  ;;  %v6279_v10 = vld [vmem:[#allocation2 + $0x170] sm:$0xff] }
 0x12d   : > { %1080 = vrot.lane.b32.xlu1 %v6257_v43, %s5576_s17  ;;  %9771 = vst [vmem:[#allocation80_spill] sm:$0xff] %v6279_v10 }
 0x12e   : > { %1084 = vrot.lane.b32.xlu0 %v6261_v8, %s5576_s17  ;;  %v6267_v2 = vpop.permute.xlu2 %952 }
 0x12f   : > { %9766 = vst [vmem:[#allocation75_spill] sm:$0xff] %v6267_v2  ;;  %v6269_v6 = vpop.permute.xlu1 %932 }
 0x130   : > { %9767 = vst [vmem:[#allocation76_spill] sm:$0xff] %v6269_v6  ;;  %v6271_v44 = vpop.permute.xlu0 %936  ;;  %v581_v6 = vld [vmem:[#allocation2 + $0x180] sm:$0xff] }
 0x131   : > { %9768 = vst [vmem:[#allocation77_spill] sm:$0xff] %v6271_v44  ;;  %v582_v44 = vld [vmem:[#allocation2 + $0x188] sm:$0xff] }
 0x134   : > { %1088 = vrot.lane.b32.xlu2 %v6273_v11, %s5576_s17 }
 0x135   : > { %1086 = vrot.lane.b32.xlu1 %v6275_v0, %s5576_s17 }
 0x136   : > { %1090 = vrot.lane.b32.xlu0 %v6279_v10, %s5576_s17  ;;  %v6285_v2 = vpop.permute.xlu2 %958 }
 0x137   : > { %9772 = vst [vmem:[#allocation81_spill] sm:$0xff] %v6285_v2  ;;  %v6287_v8 = vpop.permute.xlu1 %938  ;;  %v717_v2 = vld [vmem:[#allocation2 + $0x6a] sm:$0xff] }
 0x138   : > { %9773 = vst [vmem:[#allocation82_spill] sm:$0xff] %v6287_v8  ;;  %v6289_v43 = vpop.permute.xlu0 %942 }
 0x139   : > { %9774 = vst [vmem:[#allocation83_spill] sm:$0xff] %v6289_v43 }
 0x13c   : > { %1094 = vrot.lane.b32.xlu2 %v582_v44, %s5576_s17 }
 0x13d   : > { %1092 = vrot.lane.b32.xlu1 %v581_v6, %s5576_s17 }
 0x13e   : > { %v6293_v11 = vpop.permute.xlu2 %964  ;;  %1160 = vrot.lane.b32.xlu0 %v5752_v5, %s5577_s18 }
 0x13f   : > { %9775 = vst [vmem:[#allocation84_spill] sm:$0xff] %v6293_v11  ;;  %v6297_v0 = vpop.permute.xlu1 %944 }
 0x140   : > { %9776 = vst [vmem:[#allocation85_spill] sm:$0xff] %v6297_v0  ;;  %v6299_v10 = vpop.permute.xlu0 %948  ;;  %v719_v0 = vld [vmem:[#allocation2 + $0x82] sm:$0xff] }
 0x141   : > { %9777 = vst [vmem:[#allocation86_spill] sm:$0xff] %v6299_v10 }
 0x144   : > { %1164 = vrot.lane.b32.xlu2 %v5746_v4, %s5577_s18 }
 0x145   : > { %1162 = vrot.lane.b32.xlu1 %v5804_v19, %s5577_s18 }
 0x146   : > { %1166 = vrot.lane.b32.xlu0 %v5798_v17, %s5577_s18  ;;  %v6307_v44 = vpop.permute.xlu2 %1034 }
 0x147   : > { %v6309_v6 = vpop.permute.xlu1 %950 }
 0x148   : > { %9778 = vst [vmem:[#allocation87_spill] sm:$0xff] %v6309_v6  ;;  %v6311_v11 = vpop.permute.xlu0 %954  ;;  %v680_v6 = vld [vmem:[#allocation2 + $0x31] sm:$0xff] }
 0x149   : > { %9779 = vst [vmem:[#allocation88_spill] sm:$0xff] %v6311_v11 }
 0x14c   : > { %1170 = vrot.lane.b32.xlu2 %v5826_v28, %s5577_s18 }
 0x14d   : > { %1168 = vrot.lane.b32.xlu1 %v5810_v21, %s5577_s18 }
 0x14e   : > { %1172 = vrot.lane.b32.xlu0 %v5822_v26, %s5577_s18  ;;  %v6319_v4 = vpop.permute.xlu2 %1040 }
 0x14f   : > { %v6321_v5 = vpop.permute.xlu1 %956 }
 0x150   : > { %9780 = vst [vmem:[#allocation89_spill] sm:$0xff] %v6321_v5  ;;  %v6323_v17 = vpop.permute.xlu0 %960 }
 0x151   : > { %9781 = vst [vmem:[#allocation90_spill] sm:$0xff] %v6323_v17 }
 0x154   : > { %1176 = vrot.lane.b32.xlu2 %v5849_v35, %s5577_s18 }
 0x155   : > { %1174 = vrot.lane.b32.xlu1 %v5830_v30, %s5577_s18 }
 0x156   : > { %1178 = vrot.lane.b32.xlu0 %v5847_v34, %s5577_s18  ;;  %v6331_v19 = vpop.permute.xlu2 %1046 }
 0x157   : > { %v6333_v21 = vpop.permute.xlu1 %962 }
 0x158   : > { %9782 = vst [vmem:[#allocation91_spill] sm:$0xff] %v6333_v21  ;;  %v6335_v26 = vpop.permute.xlu0 %966 }
 0x159   : > { %9783 = vst [vmem:[#allocation92_spill] sm:$0xff] %v6335_v26  ;;  %v614_v26 = vld [vmem:[#allocation2 + $0x189] sm:$0xff] }
 0x15c   : > { %1182 = vrot.lane.b32.xlu2 %v5867_v41, %s5577_s18 }
 0x15d   : > { %1180 = vrot.lane.b32.xlu1 %v5851_v36, %s5577_s18 }
 0x15e   : > { %1184 = vrot.lane.b32.xlu0 %v5865_v40, %s5577_s18  ;;  %v6343_v28 = vpop.permute.xlu2 %1052 }
 0x15f   : > { %9784 = vst [vmem:[#allocation93_spill] sm:$0xff] %v6343_v28  ;;  %v6345_v30 = vpop.permute.xlu1 %1032  ;;  %v9847_v28 = vld [vmem:[#allocation49_spill] sm:$0xff] }
 0x160   : > { %v6347_v34 = vpop.permute.xlu0 %1036 }
 0x164   : > { %1188 = vrot.lane.b32.xlu2 %v5885_v47, %s5577_s18 }
 0x165   : > { %1186 = vrot.lane.b32.xlu1 %v5869_v42, %s5577_s18 }
 0x166   : > { %1190 = vrot.lane.b32.xlu0 %v5883_v46, %s5577_s18  ;;  %v6355_v35 = vpop.permute.xlu2 %1058 }
 0x167   : > { %9785 = vst [vmem:[#allocation94_spill] sm:$0xff] %v6355_v35  ;;  %v6357_v36 = vpop.permute.xlu1 %1038 }
 0x168   : > { %v6359_v40 = vpop.permute.xlu0 %1042 }
 0x16c   : > { %1194 = vrot.lane.b32.xlu2 %v5899_v51, %s5577_s18 }
 0x16d   : > { %1192 = vrot.lane.b32.xlu1 %v5887_v48, %s5577_s18 }
 0x16e   : > { %1196 = vrot.lane.b32.xlu0 %v5897_v50, %s5577_s18  ;;  %v6367_v41 = vpop.permute.xlu2 %1064 }
 0x16f   : > { %9786 = vst [vmem:[#allocation95_spill] sm:$0xff] %v6367_v41  ;;  %v6369_v42 = vpop.permute.xlu1 %1044 }
 0x170   : > { %v6371_v46 = vpop.permute.xlu0 %1048 }
 0x174   : > { %1200 = vrot.lane.b32.xlu2 %v5917_v56, %s5577_s18 }
 0x175   : > { %1198 = vrot.lane.b32.xlu1 %v5901_v52, %s5577_s18 }
 0x176   : > { %1202 = vrot.lane.b32.xlu0 %v5915_v55, %s5577_s18  ;;  %v6379_v47 = vpop.permute.xlu2 %1070 }
 0x177   : > { %9787 = vst [vmem:[#allocation96_spill] sm:$0xff] %v6379_v47  ;;  %v6381_v48 = vpop.permute.xlu1 %1050  ;;  %v656_v47 = vld [vmem:[#allocation2 + $0x90] sm:$0xff] }
 0x178   : > { %v6383_v50 = vpop.permute.xlu0 %1054 }
 0x179   : > { %9788 = vst [vmem:[#allocation97_spill] sm:$0xff] %v6383_v50 }
 0x17c   : > { %1206 = vrot.lane.b32.xlu2 %v5929_v59, %s5577_s18  ;;  %v6409_v59 = vld [vmem:[#allocation2 + $0x181] sm:$0xff] }
 0x17d   : > { %1204 = vrot.lane.b32.xlu1 %v5919_v57, %s5577_s18  ;;  %9795 = vst [vmem:[#allocation104_spill] sm:$0xff] %v6409_v59 }
 0x17e   : > { %1208 = vrot.lane.b32.xlu0 %v5927_v58, %s5577_s18  ;;  %v6391_v51 = vpop.permute.xlu2 %1076 }
 0x17f   : > { %9789 = vst [vmem:[#allocation98_spill] sm:$0xff] %v6391_v51  ;;  %v6393_v52 = vpop.permute.xlu1 %1056 }
 0x180   : > { %9790 = vst [vmem:[#allocation99_spill] sm:$0xff] %v6393_v52  ;;  %v6395_v55 = vpop.permute.xlu0 %1060 }
 0x181   : > { %9791 = vst [vmem:[#allocation100_spill] sm:$0xff] %v6395_v55 }
 0x184   : > { %1212 = vrot.lane.b32.xlu2 %v5941_v62, %s5577_s18 }
 0x185   : > { %1210 = vrot.lane.b32.xlu1 %v5931_v60, %s5577_s18 }
 0x186   : > { %1214 = vrot.lane.b32.xlu0 %v5939_v61, %s5577_s18  ;;  %v6403_v56 = vpop.permute.xlu2 %1082 }
 0x187   : > { %9792 = vst [vmem:[#allocation101_spill] sm:$0xff] %v6403_v56  ;;  %v6405_v57 = vpop.permute.xlu1 %1062 }
 0x188   : > { %9793 = vst [vmem:[#allocation102_spill] sm:$0xff] %v6405_v57  ;;  %v6407_v58 = vpop.permute.xlu0 %1066 }
 0x189   : > { %9794 = vst [vmem:[#allocation103_spill] sm:$0xff] %v6407_v58 }
 0x18c   : > { %1218 = vrot.lane.b32.xlu2 %v5955_v3, %s5577_s18 }
 0x18d   : > { %1216 = vrot.lane.b32.xlu1 %v5943_v63, %s5577_s18 }
 0x18e   : > { %1220 = vrot.lane.b32.xlu0 %v6409_v59, %s5577_s18  ;;  %v6417_v60 = vpop.permute.xlu2 %1088  ;;  %v2032_v59 = vld [vmem:[%s9653_s1 + $0x10] sm:$0xff] }
 0x18f   : > { %9796 = vst [vmem:[#allocation105_spill] sm:$0xff] %v6417_v60  ;;  %v6419_v61 = vpop.permute.xlu1 %1068  ;;  %v9806_v60 = vmov 0.0  }
 0x190   : > { %9797 = vst [vmem:[#allocation106_spill] sm:$0xff] %v6419_v61  ;;  %v6421_v62 = vpop.permute.xlu0 %1072 }
 0x191   : > { %9798 = vst [vmem:[#allocation107_spill] sm:$0xff] %v6421_v62 }
 0x192   : > { %2610 = vst.msk [vmem:[#allocation2 + $0x30] sm:$0xff] %vm333_vm0, %v9806_v60 }
 0x194   : > { %1288 = vrot.lane.b32.xlu2 %v5963_v7, %s5578_s19 }
 0x195   : > { %1222 = vrot.lane.b32.xlu1 %v614_v26, %s5577_s18 }
 0x196   : > { %1290 = vrot.lane.b32.xlu0 %v5911_v54, %s5578_s19  ;;  %v6428_v63 = vpop.permute.xlu2 %1094 }
 0x197   : > { %9799 = vst [vmem:[#allocation108_spill] sm:$0xff] %v6428_v63  ;;  %v6430_v3 = vpop.permute.xlu1 %1074 }
 0x198   : > { %9800 = vst [vmem:[#allocation109_spill] sm:$0xff] %v6430_v3  ;;  %v6432_v21 = vpop.permute.xlu0 %1078 }
 0x199   : > { %9801 = vst [vmem:[#allocation110_spill] sm:$0xff] %v6432_v21 }
 0x19c   : > { %1294 = vrot.lane.b32.xlu2 %v5987_v13, %s5578_s19 }
 0x19d   : > { %1292 = vrot.lane.b32.xlu1 %v5971_v9, %s5578_s19 }
 0x19e   : > { %1296 = vrot.lane.b32.xlu0 %v5985_v12, %s5578_s19  ;;  %v6440_v7 = vpop.permute.xlu2 %1164 }
 0x19f   : > { %v6442_v26 = vpop.permute.xlu1 %1080 }
 0x1a0   : > { %9802 = vst [vmem:[#allocation111_spill] sm:$0xff] %v6442_v26  ;;  %v6444_v54 = vpop.permute.xlu0 %1084  ;;  %v681_v26 = vld [vmem:[#allocation2 + $0x39] sm:$0xff] }
 0x1a1   : > { %9803 = vst [vmem:[#allocation112_spill] sm:$0xff] %v6444_v54 }
 0x1a2   : > { %2612 = vst.msk [vmem:[#allocation2 + $0x40] sm:$0x3] %vm336_vm2, %v9806_v60 }
 0x1a3   : > { %2611 = vst.msk [vmem:[#allocation2 + $0x38] sm:$0xff] %vm333_vm0, %v9806_v60 }
 0x1a4   : > { %1300 = vrot.lane.b32.xlu2 %v6001_v18, %s5578_s19 }
 0x1a5   : > { %1298 = vrot.lane.b32.xlu1 %v5989_v14, %s5578_s19 }
 0x1a6   : > { %1302 = vrot.lane.b32.xlu0 %v5999_v16, %s5578_s19  ;;  %v6452_v63 = vpop.permute.xlu2 %1170 }
 0x1a7   : > { %v6454_v21 = vpop.permute.xlu1 %1086 }
 0x1a8   : > { %9804 = vst [vmem:[#allocation113_spill] sm:$0xff] %v6454_v21  ;;  %v6456_v12 = vpop.permute.xlu0 %1090 }
 0x1a9   : > { %9805 = vst [vmem:[#allocation114_spill] sm:$0xff] %v6456_v12 }
 0x1ac   : > { %1306 = vrot.lane.b32.xlu2 %v6017_v25, %s5578_s19 }
 0x1ad   : > { %1304 = vrot.lane.b32.xlu1 %v6003_v20, %s5578_s19 }
 0x1ae   : > { %1308 = vrot.lane.b32.xlu0 %v6015_v24, %s5578_s19  ;;  %v6466_v14 = vpop.permute.xlu2 %1176 }
 0x1af   : > { %v6468_v16 = vpop.permute.xlu1 %1092 }
 0x1b0   : > { %9807 = vst [vmem:[#allocation115_spill] sm:$0xff] %v6468_v16  ;;  %v6470_v18 = vpop.permute.xlu0 %1160  ;;  %v682_v16 = vld [vmem:[#allocation2 + $0x49] sm:$0xff] }
 0x1b4   : > { %1312 = vrot.lane.b32.xlu2 %v6035_v37, %s5578_s19  ;;  %v714_v37 = vld [vmem:[#allocation2 + $0x4a] sm:$0xff] }
 0x1b5   : > { %1310 = vrot.lane.b32.xlu1 %v6019_v27, %s5578_s19  ;;  %2613 = vst.msk [vmem:[#allocation2 + $0x48] sm:$0xff] %vm333_vm0, %v9806_v60 }
 0x1b6   : > { %1314 = vrot.lane.b32.xlu0 %v6033_v33, %s5578_s19  ;;  %v6482_v20 = vpop.permute.xlu2 %1182 }
 0x1b7   : > { %9808 = vst [vmem:[#allocation116_spill] sm:$0xff] %v6482_v20  ;;  %v6484_v24 = vpop.permute.xlu1 %1162 }
 0x1b8   : > { %v6486_v25 = vpop.permute.xlu0 %1166 }
 0x1bc   : > { %1318 = vrot.lane.b32.xlu2 %v6053_v49, %s5578_s19  ;;  %v715_v49 = vld [vmem:[#allocation2 + $0x52] sm:$0xff] }
 0x1bd   : > { %1316 = vrot.lane.b32.xlu1 %v6037_v38, %s5578_s19  ;;  %v683_v38 = vld [vmem:[#allocation2 + $0x51] sm:$0xff] }
 0x1be   : > { %1320 = vrot.lane.b32.xlu0 %v6051_v45, %s5578_s19  ;;  %v6494_v27 = vpop.permute.xlu2 %1188  ;;  %2615 = vst.msk [vmem:[#allocation2 + $0x58] sm:$0x3] %vm336_vm2, %v9806_v60 }
 0x1bf   : > { %9809 = vst [vmem:[#allocation117_spill] sm:$0xff] %v6494_v27  ;;  %v6498_v33 = vpop.permute.xlu1 %1168 }
 0x1c0   : > { %v6500_v12 = vpop.permute.xlu0 %1172  ;;  %2614 = vst.msk [vmem:[#allocation2 + $0x50] sm:$0xff] %vm333_vm0, %v9806_v60 }
 0x1c4   : > { %1324 = vrot.lane.b32.xlu2 %v6071_v23, %s5578_s19  ;;  %v684_v23 = vld [vmem:[#allocation2 + $0x61] sm:$0xff] }
 0x1c5   : > { %1322 = vrot.lane.b32.xlu1 %v6055_v53, %s5578_s19  ;;  %v716_v53 = vld [vmem:[#allocation2 + $0x62] sm:$0xff] }
 0x1c6   : > { %1326 = vrot.lane.b32.xlu0 %v6069_v31, %s5578_s19  ;;  %v6508_v45 = vpop.permute.xlu2 %1194  ;;  %v652_v31 = vld [vmem:[#allocation2 + $0x60] sm:$0xff] }
 0x1c7   : > { %9810 = vst [vmem:[#allocation118_spill] sm:$0xff] %v6508_v45  ;;  %v6512_v17 = vpop.permute.xlu1 %1174  ;;  %v722_v45 = vld [vmem:[#allocation2 + $0xaa] sm:$0xff] }
 0x1c8   : > { %v6516_v51 = vpop.permute.xlu0 %1178  ;;  %2616 = vst.msk [vmem:[#allocation2 + $0x60] sm:$0xff] %vm333_vm0, %v9806_v60 }
 0x1cc   : > { %1544 = vrot.lane.b32.xlu2 %v680_v6, %s5579_s20  ;;  %v685_v6 = vld [vmem:[#allocation2 + $0x69] sm:$0xff] }
 0x1cd   : > { %1416 = vrot.lane.b32.xlu1 %v6113_v39, %s5580_s21  ;;  %2618 = vst.msk [vmem:[#allocation2 + $0x70] sm:$0x3] %vm336_vm2, %v9806_v60 }
 0x1ce   : > { %1672 = vrot.lane.b32.xlu0 %v5971_v9, %s5581_s22  ;;  %v6523_v10 = vpop.permute.xlu2 %1200  ;;  %2617 = vst.msk [vmem:[#allocation2 + $0x68] sm:$0xff] %vm333_vm0, %v9806_v60 }
 0x1cf   : > { %9811 = vst [vmem:[#allocation119_spill] sm:$0xff] %v6523_v10  ;;  %v6527_v3 = vpop.permute.xlu1 %1180  ;;  %v718_v10 = vld [vmem:[#allocation2 + $0x7a] sm:$0xff] }
 0x1d0   : > { %9812 = vst [vmem:[#allocation120_spill] sm:$0xff] %v6527_v3  ;;  %v6529_v21 = vpop.permute.xlu0 %1184  ;;  %v6730_v3 = vld [vmem:[#allocation2 + $0x10a] sm:$0xff] }
 0x1d1   : > { %9813 = vst [vmem:[#allocation121_spill] sm:$0xff] %v6529_v21 }
 0x1d4   : > { %1546 = vrot.lane.b32.xlu2 %v681_v26, %s5579_s20  ;;  %v686_v26 = vld [vmem:[#allocation2 + $0x79] sm:$0xff] }
 0x1d5   : > { %1418 = vrot.lane.b32.xlu1 %v6127_v1, %s5580_s21  ;;  %2619 = vst.msk [vmem:[#allocation2 + $0x78] sm:$0xff] %vm333_vm0, %v9806_v60 }
 0x1d6   : > { %1674 = vrot.lane.b32.xlu0 %v5987_v13, %s5581_s22  ;;  %v6536_v9 = vpop.permute.xlu2 %1206 }
 0x1d7   : > { %9814 = vst [vmem:[#allocation122_spill] sm:$0xff] %v6536_v9  ;;  %v6540_v54 = vpop.permute.xlu1 %1186 }
 0x1d8   : > { %9815 = vst [vmem:[#allocation123_spill] sm:$0xff] %v6540_v54  ;;  %v6544_v5 = vpop.permute.xlu0 %1190  ;;  %v726_v54 = vld [vmem:[#allocation2 + $0xda] sm:$0xff] }
 0x1d9   : > { %9816 = vst [vmem:[#allocation124_spill] sm:$0xff] %v6544_v5 }
 0x1dc   : > { %1548 = vrot.lane.b32.xlu2 %v682_v16, %s5579_s20  ;;  %v687_v16 = vld [vmem:[#allocation2 + $0x81] sm:$0xff] }
 0x1dd   : > { %1420 = vrot.lane.b32.xlu1 %v6125_v15, %s5580_s21  ;;  %2621 = vst.msk [vmem:[#allocation2 + $0x88] sm:$0x3] %vm336_vm2, %v9806_v60 }
 0x1de   : > { %1676 = vrot.lane.b32.xlu0 %v714_v37, %s5581_s22  ;;  %v6550_v13 = vpop.permute.xlu2 %1212  ;;  %v655_v37 = vld [vmem:[#allocation2 + $0x80] sm:$0xff] }
 0x1df   : > { %9817 = vst [vmem:[#allocation125_spill] sm:$0xff] %v6550_v13  ;;  %v6554_v9 = vpop.permute.xlu1 %1192 }
 0x1e0   : > { %9818 = vst [vmem:[#allocation126_spill] sm:$0xff] %v6554_v9  ;;  %v6556_v62 = vpop.permute.xlu0 %1196 }
 0x1e1   : > { %9819 = vst [vmem:[#allocation127_spill] sm:$0xff] %v6556_v62 }
 0x1e2   : > { %2620 = vst.msk [vmem:[#allocation2 + $0x80] sm:$0xff] %vm333_vm0, %v9806_v60 }
 0x1e4   : > { %1550 = vrot.lane.b32.xlu2 %v683_v38, %s5579_s20  ;;  %v688_v38 = vld [vmem:[#allocation2 + $0x91] sm:$0xff] }
 0x1e5   : > { %1422 = vrot.lane.b32.xlu1 %v6131_v32, %s5580_s21 }
 0x1e6   : > { %1678 = vrot.lane.b32.xlu0 %v715_v49, %s5581_s22  ;;  %v6562_v56 = vpop.permute.xlu2 %1218  ;;  %v720_v49 = vld [vmem:[#allocation2 + $0x92] sm:$0xff] }
 0x1e7   : > { %9820 = vst [vmem:[#allocation128_spill] sm:$0xff] %v6562_v56  ;;  %v6566_v13 = vpop.permute.xlu1 %1198 }
 0x1e8   : > { %9821 = vst [vmem:[#allocation129_spill] sm:$0xff] %v6566_v13  ;;  %v6570_v11 = vpop.permute.xlu0 %1202 }
 0x1e9   : > { %9822 = vst [vmem:[#allocation130_spill] sm:$0xff] %v6570_v11  ;;  %v721_v11 = vld [vmem:[#allocation2 + $0x9a] sm:$0xff] }
 0x1ea   : > { %2622 = vst.msk [vmem:[#allocation2 + $0x90] sm:$0xff] %vm333_vm0, %v9806_v60 }
 0x1ec   : > { %1552 = vrot.lane.b32.xlu2 %v684_v23, %s5579_s20  ;;  %v9825_v23 = vld [vmem:[#allocation38_spill] sm:$0xff] }
 0x1ed   : > { %1424 = vrot.lane.b32.xlu1 %v652_v31, %s5580_s21  ;;  %v689_v31 = vld [vmem:[#allocation2 + $0x99] sm:$0xff] }
 0x1ee   : > { %1680 = vrot.lane.b32.xlu0 %v716_v53, %s5581_s22  ;;  %v6575_v56 = vpop.permute.xlu2 %1288  ;;  %v657_v53 = vld [vmem:[#allocation2 + $0x98] sm:$0xff]  ;;  %2624 = vst.msk [vmem:[#allocation2 + $0xa0] sm:$0x3] %vm336_vm2, %v9806_v60 }
 0x1ef   : > { %v6579_v13 = vpop.permute.xlu1 %1204  ;;  %2623 = vst.msk [vmem:[#allocation2 + $0x98] sm:$0xff] %vm333_vm0, %v9806_v60 }
 0x1f0   : > { %9823 = vst [vmem:[#allocation131_spill] sm:$0xff] %v6579_v13  ;;  %v6581_v43 = vpop.permute.xlu0 %1208  ;;  %v690_v13 = vld [vmem:[#allocation2 + $0xa9] sm:$0xff] }
 0x1f1   : > { %9824 = vst [vmem:[#allocation132_spill] sm:$0xff] %v6581_v43 }
 0x1f4   : > { %1554 = vrot.lane.b32.xlu2 %v685_v6, %s5579_s20  ;;  %v9828_v6 = vld [vmem:[#allocation40_spill] sm:$0xff] }
 0x1f5   : > { %1426 = vrot.lane.b32.xlu1 %v9825_v23, %s5580_s21 }
 0x1f6   : > { %1682 = vrot.lane.b32.xlu0 %v717_v2, %s5581_s22  ;;  %v6587_v62 = vpop.permute.xlu2 %1294  ;;  %v658_v2 = vld [vmem:[#allocation2 + $0xa8] sm:$0xff] }
 0x1f7   : > { %v6591_v61 = vpop.permute.xlu1 %1210  ;;  %2625 = vst.msk [vmem:[#allocation2 + $0xa8] sm:$0xff] %vm333_vm0, %v9806_v60 }
 0x1f8   : > { %9826 = vst [vmem:[#allocation38_spill] sm:$0xff] %v6591_v61  ;;  %v6595_v43 = vpop.permute.xlu0 %1214 }
 0x1f9   : > { %9827 = vst [vmem:[#allocation133_spill] sm:$0xff] %v6595_v43  ;;  %v723_v43 = vld [vmem:[#allocation2 + $0xb2] sm:$0xff] }
 0x1fc   : > { %1556 = vrot.lane.b32.xlu2 %v686_v26, %s5579_s20  ;;  %v691_v26 = vld [vmem:[#allocation2 + $0xb1] sm:$0xff] }
 0x1fd   : > { %1428 = vrot.lane.b32.xlu1 %v9828_v6, %s5580_s21  ;;  %2627 = vst.msk [vmem:[#allocation2 + $0xb8] sm:$0x3] %vm336_vm2, %v9806_v60 }
 0x1fe   : > { %1684 = vrot.lane.b32.xlu0 %v718_v10, %s5581_s22  ;;  %v6601_v58 = vpop.permute.xlu2 %1300  ;;  %v659_v10 = vld [vmem:[#allocation2 + $0xb0] sm:$0xff] }
 0x1ff   : > { %v6605_v61 = vpop.permute.xlu1 %1216  ;;  %2626 = vst.msk [vmem:[#allocation2 + $0xb0] sm:$0xff] %vm333_vm0, %v9806_v60 }
 0x200   : > { %9829 = vst [vmem:[#allocation134_spill] sm:$0xff] %v6605_v61  ;;  %v6607_v8 = vpop.permute.xlu0 %1220 }
 0x201   : > { %9830 = vst [vmem:[#allocation135_spill] sm:$0xff] %v6607_v8 }
 0x204   : > { %1558 = vrot.lane.b32.xlu2 %v687_v16, %s5579_s20  ;;  %v692_v16 = vld [vmem:[#allocation2 + $0xc1] sm:$0xff] }
 0x205   : > { %1430 = vrot.lane.b32.xlu1 %v655_v37, %s5580_s21  ;;  %v660_v37 = vld [vmem:[#allocation2 + $0xc0] sm:$0xff] }
 0x206   : > { %1686 = vrot.lane.b32.xlu0 %v719_v0, %s5581_s22  ;;  %v6612_v9 = vpop.permute.xlu2 %1306  ;;  %v724_v0 = vld [vmem:[#allocation2 + $0xc2] sm:$0xff] }
 0x207   : > { %v6616_v41 = vpop.permute.xlu1 %1222  ;;  %2628 = vst.msk [vmem:[#allocation2 + $0xc0] sm:$0xff] %vm333_vm0, %v9806_v60 }
 0x208   : > { %9831 = vst [vmem:[#allocation136_spill] sm:$0xff] %v6616_v41  ;;  %v6620_v8 = vpop.permute.xlu0 %1290 }
 0x20c   : > { %1560 = vrot.lane.b32.xlu2 %v688_v38, %s5579_s20  ;;  %v693_v38 = vld [vmem:[#allocation2 + $0xc9] sm:$0xff] }
 0x20d   : > { %1432 = vrot.lane.b32.xlu1 %v656_v47, %s5580_s21  ;;  %v725_v47 = vld [vmem:[#allocation2 + $0xca] sm:$0xff] }
 0x20e   : > { %1688 = vrot.lane.b32.xlu0 %v720_v49, %s5581_s22  ;;  %v6625_v61 = vpop.permute.xlu2 %1312  ;;  %v661_v49 = vld [vmem:[#allocation2 + $0xc8] sm:$0xff]  ;;  %2630 = vst.msk [vmem:[#allocation2 + $0xd0] sm:$0x3] %vm336_vm2, %v9806_v60 }
 0x20f   : > { %9832 = vst [vmem:[#allocation137_spill] sm:$0xff] %v6625_v61  ;;  %v6629_v41 = vpop.permute.xlu1 %1292 }
 0x210   : > { %v6631_v5 = vpop.permute.xlu0 %1296  ;;  %2629 = vst.msk [vmem:[#allocation2 + $0xc8] sm:$0xff] %vm333_vm0, %v9806_v60 }
 0x214   : > { %1562 = vrot.lane.b32.xlu2 %v689_v31, %s5579_s20  ;;  %v2034_v31 = vld [vmem:[%s9653_s1 + $0x20] sm:$0xf] }
 0x215   : > { %1434 = vrot.lane.b32.xlu1 %v657_v53, %s5580_s21  ;;  %4894 = vmatpush.msk.msra.mxu0 %vm2136_vm3, %v2034_v31  ;;  %v694_v53 = vld [vmem:[#allocation2 + $0xd9] sm:$0xff] }
 0x216   : > { %1690 = vrot.lane.b32.xlu0 %v721_v11, %s5581_s22  ;;  %v6636_v57 = vpop.permute.xlu2 %1318  ;;  %v2033_v11 = vld [vmem:[%s9653_s1 + $0x18] sm:$0xff]  ;;  %4963 = vmatpush.msk.msra.mxu3 %vm2136_vm3, %v2034_v31  ;;  %vm4070_vm3 = vcmask 916480  }
 0x217   : > { %9833 = vst [vmem:[#allocation138_spill] sm:$0xff] %v6636_v57  ;;  %v6640_v27 = vpop.permute.xlu1 %1298  ;;  %2152 = vmatpush.msra.mxu0 %v2033_v11  ;;  %v662_v57 = vld [vmem:[#allocation2 + $0xd8] sm:$0xff] }
 0x218   : > { %v6644_v55 = vpop.permute.xlu0 %1302  ;;  %4964 = vmatpush.msra.mxu3 %v2033_v11  ;;  %2631 = vst.msk [vmem:[#allocation2 + $0xd8] sm:$0xff] %vm333_vm0, %v9806_v60  ;;  %v695_v11 = vld [vmem:[#allocation2 + $0xe1] sm:$0xff] }
 0x219   : > { %2153 = vmatpush.msra.mxu0 %v2032_v59 }
 0x21a   : > { %4965 = vmatpush.msra.mxu3 %v2032_v59  ;;  %v663_v59 = vld [vmem:[#allocation2 + $0xe0] sm:$0xff] }
 0x21c   : > { %1564 = vrot.lane.b32.xlu2 %v690_v13, %s5579_s20 }
 0x21d   : > { %1436 = vrot.lane.b32.xlu1 %v658_v2, %s5580_s21  ;;  %v2031_v2 = vld [vmem:[%s9653_s1 + $0x8] sm:$0xff] }
 0x21e   : > { %1692 = vrot.lane.b32.xlu0 %v722_v45, %s5581_s22  ;;  %v6658_v35 = vpop.permute.xlu2 %1324  ;;  %2154 = vmatpush.msra.mxu0 %v2031_v2  ;;  %v2030_v45 = vld [vmem:[%s9653_s1] sm:$0xff] }
 0x21f   : > { %9834 = vst [vmem:[#allocation139_spill] sm:$0xff] %v6658_v35  ;;  %v6662_v13 = vpop.permute.xlu1 %1304  ;;  %4966 = vmatpush.msra.mxu3 %v2031_v2  ;;  %v727_v35 = vld [vmem:[#allocation2 + $0xe2] sm:$0xff] }
 0x220   : > { %v6667_v31 = vpop.permute.xlu0 %1308  ;;  %2155 = vmatpush.msra.mxu0 %v2030_v45  ;;  %2633 = vst.msk [vmem:[#allocation2 + $0xe8] sm:$0x3] %vm336_vm2, %v9806_v60 }
 0x221   : > { %9835 = vst [vmem:[#allocation140_spill] sm:$0xff] %v6667_v31  ;;  %4967 = vmatpush.msra.mxu3 %v2030_v45  ;;  %v6726_v31 = vld [vmem:[#allocation2 + $0x109] sm:$0xff] }
 0x222   : > { %2632 = vst.msk [vmem:[#allocation2 + $0xe0] sm:$0xff] %vm333_vm0, %v9806_v60 }
 0x224   : > { %1566 = vrot.lane.b32.xlu2 %v691_v26, %s5579_s20  ;;  %v6685_v26 = vld [vmem:[#allocation2 + $0xf1] sm:$0xff] }
 0x225   : > { %1438 = vrot.lane.b32.xlu1 %v659_v10, %s5580_s21  ;;  %v6687_v10 = vld [vmem:[#allocation2 + $0xf0] sm:$0xff] }
 0x226   : > { %1694 = vrot.lane.b32.xlu0 %v723_v43, %s5581_s22  ;;  %v1545_v61 = vpop.permute.xlu2 %1544  ;;  %v6689_v43 = vld [vmem:[#allocation2 + $0xf2] sm:$0xff] }
 0x227   : > { %v6677_v21 = vpop.permute.xlu1 %1310  ;;  %2634 = vst.msk [vmem:[#allocation2 + $0xf0] sm:$0xff] %vm333_vm0, %v9806_v60 }
 0x228   : > { %9836 = vst [vmem:[#allocation141_spill] sm:$0xff] %v6677_v21  ;;  %v6681_v2 = vpop.permute.xlu0 %1314 }
 0x229   : > { %9837 = vst [vmem:[#allocation142_spill] sm:$0xff] %v6681_v2 }
 0x22c   : > { %1568 = vrot.lane.b32.xlu2 %v692_v16, %s5579_s20  ;;  %v6700_v16 = vld [vmem:[#allocation2 + $0xf9] sm:$0xff] }
 0x22d   : > { %1440 = vrot.lane.b32.xlu1 %v660_v37, %s5580_s21  ;;  %v6702_v37 = vld [vmem:[#allocation2 + $0xfa] sm:$0xff] }
 0x22e   : > { %1696 = vrot.lane.b32.xlu0 %v724_v0, %s5581_s22  ;;  %v1547_v45 = vpop.permute.xlu2 %1546  ;;  %v6707_v0 = vld [vmem:[#allocation2 + $0xf8] sm:$0xff]  ;;  %2636 = vst.msk [vmem:[#allocation2 + $0x100] sm:$0x3] %vm336_vm2, %v9806_v60 }
 0x22f   : > { %v6694_v52 = vpop.permute.xlu1 %1316  ;;  %2635 = vst.msk [vmem:[#allocation2 + $0xf8] sm:$0xff] %vm333_vm0, %v9806_v60 }
 0x230   : > { %9838 = vst [vmem:[#allocation143_spill] sm:$0xff] %v6694_v52  ;;  %v6696_v21 = vpop.permute.xlu0 %1320 }
 0x231   : > { %9839 = vst [vmem:[#allocation144_spill] sm:$0xff] %v6696_v21  ;;  %v9843_v21 = vld [vmem:[#allocation3_spill] sm:$0xff] }
 0x234   : > { %1570 = vrot.lane.b32.xlu2 %v693_v38, %s5579_s20 }
 0x235   : > { %1442 = vrot.lane.b32.xlu1 %v661_v49, %s5580_s21  ;;  %v9842_v49 = vld [vmem:[#allocation9_spill] sm:$0xff] }
 0x236   : > { %1698 = vrot.lane.b32.xlu0 %v725_v47, %s5581_s22  ;;  %v6705_v2 = vpop.permute.xlu2 %1548  ;;  %v1768_v20 = vsel %vm422_vm1, %v9843_v21, %v9842_v49  ;;  %v9844_v47 = vld [vmem:[#allocation32_spill] sm:$0xff] }
 0x237   : > { %v6711_v52 = vpop.permute.xlu1 %1322  ;;  %v1801_v50 = vsel %vm1800_vm4, %v1768_v20, %v9844_v47 }
 0x238   : > { %9840 = vst [vmem:[#allocation145_spill] sm:$0xff] %v6711_v52  ;;  %v6715_v38 = vpop.permute.xlu0 %1326  ;;  %v1834_v52 = vsel %vm1833_vm5, %v1801_v50, %v6345_v30 }
 0x239   : > { %9841 = vst [vmem:[#allocation146_spill] sm:$0xff] %v6715_v38  ;;  %v6728_v38 = vld [vmem:[#allocation2 + $0x108] sm:$0xff]  ;;  %v1866_v21 = vsel %vm333_vm0, %v1834_v52, %v6470_v18  ;;  %v9846_v18 = vld [vmem:[#allocation4_spill] sm:$0xff] }
 0x23a   : > { %2637 = vst.msk [vmem:[#allocation2 + $0x108] sm:$0xff] %vm333_vm0, %v9806_v60  ;;  %v1899_v30 = vsel %vm1898_vm6, %v1866_v21, %v6575_v56 }
 0x23c   : > { %1572 = vrot.lane.b32.xlu2 %v694_v53, %s5579_s20 }
 0x23d   : > { %1444 = vrot.lane.b32.xlu1 %v662_v57, %s5580_s21 }
 0x23e   : > { %1700 = vrot.lane.b32.xlu0 %v726_v54, %s5581_s22  ;;  %v6735_v20 = vpop.permute.xlu2 %1550  ;;  %v9845_v54 = vld [vmem:[#allocation13_spill] sm:$0xff] }
 0x23f   : > { %v1417_v50 = vpop.permute.xlu1 %1416  ;;  %v1769_v47 = vsel %vm422_vm1, %v9846_v18, %v9845_v54  ;;  %v9850_v18 = vld [vmem:[#allocation15_spill] sm:$0xff] }
 0x240   : > { %v1932_v57 = vsel %vm1931_vm7, %v1899_v30, %v1417_v50  ;;  %v1673_v53 = vpop.permute.xlu0 %1672  ;;  %v1802_v6 = vsel %vm1800_vm4, %v1769_v47, %v9847_v28  ;;  %v9851_v47 = vld [vmem:[#allocation7_spill] sm:$0xff] }
 0x241   : > { %v1965_v49 = vsel %vm1964_vm8, %v1932_v57, %v1545_v61  ;;  %v1835_v56 = vsel %vm1833_vm5, %v1802_v6, %v6307_v44  ;;  %v9848_v44 = vld [vmem:[#allocation11_spill] sm:$0xff]  ;;  %v9849_v6 = vld [vmem:[#allocation5_spill] sm:$0xff] }
 0x242   : > { %v1998_v52 = vsel %vm1997_vm9, %v1965_v49, %v1673_v53  ;;  %v1867_v61 = vsel %vm333_vm0, %v1835_v56, %v6484_v24  ;;  %v6774_v24 = vld [vmem:[#allocation2 + $0x111] sm:$0xff]  ;;  %v1771_v56 = vsel %vm422_vm1, %v9851_v47, %v9850_v18  ;;  %v6862_v18 = vld [vmem:[#allocation2 + $0x169] sm:$0xff] }
 0x243   : > { %4895 = vmatmul.msk.f32.vlgmr.msra.gmra.mxu0 %vm2039_vm10, %v1998_v52  ;;  %v1900_v30 = vsel %vm1898_vm6, %v1867_v61, %v6620_v8  ;;  %v667_v52 = vld [vmem:[#allocation2 + $0x110] sm:$0xff] }
 0x244   : > { %1574 = vrot.lane.b32.xlu2 %v695_v11, %s5579_s20  ;;  %v9852_v61 = vld [vmem:[#allocation35_spill] sm:$0xff] }
 0x245   : > { %1446 = vrot.lane.b32.xlu1 %v663_v59, %s5580_s21  ;;  %v1770_v59 = vsel %vm422_vm1, %v9849_v6, %v9848_v44  ;;  %v9853_v6 = vld [vmem:[#allocation6_spill] sm:$0xff] }
 0x246   : > { %1702 = vrot.lane.b32.xlu0 %v727_v35, %s5581_s22  ;;  %v1553_v21 = vpop.permute.xlu2 %1552  ;;  %v1803_v35 = vsel %vm1800_vm4, %v1770_v59, %v6193_v29  ;;  %v6864_v47 = vld [vmem:[#allocation2 + $0x16a] sm:$0xff] }
 0x247   : > { %v1419_v50 = vpop.permute.xlu1 %1418  ;;  %v1836_v8 = vsel %vm1833_vm5, %v1803_v35, %v6347_v34 }
 0x248   : > { %v1933_v57 = vsel %vm1931_vm7, %v1900_v30, %v1419_v50  ;;  %v1675_v28 = vpop.permute.xlu0 %1674  ;;  %v1868_v49 = vsel %vm333_vm0, %v1836_v8, %v6440_v7  ;;  %v705_v30 = vld [vmem:[#allocation2 + $0x159] sm:$0xff] }
 0x249   : > { %v1966_v11 = vsel %vm1964_vm8, %v1933_v57, %v1547_v45  ;;  %v6776_v45 = vld [vmem:[#allocation2 + $0x112] sm:$0xff]  ;;  %v1901_v34 = vsel %vm1898_vm6, %v1868_v49, %v6629_v41  ;;  %v1804_v41 = vsel %vm1800_vm4, %v1771_v56, %v9852_v61  ;;  %v6802_v50 = vld [vmem:[#allocation2 + $0x15a] sm:$0xff] }
 0x24a   : > { %v1999_v53 = vsel %vm1997_vm9, %v1966_v11, %v1675_v28  ;;  %2639 = vst.msk [vmem:[#allocation2 + $0x118] sm:$0x3] %vm336_vm2, %v9806_v60 }
 0x24b   : > { %4896 = vmatmul.msk.f32.gmra.mxu0 %vm2039_vm10, %v1999_v53  ;;  %2638 = vst.msk [vmem:[#allocation2 + $0x110] sm:$0xff] %vm333_vm0, %v9806_v60 }
 0x24c   : > { %1576 = vrot.lane.b32.xlu2 %v6685_v26, %s5579_s20  ;;  %2648 = vst.msk [vmem:[#allocation2 + $0x160] sm:$0x3] %vm336_vm2, %v9806_v60 }
 0x24d   : > { %1448 = vrot.lane.b32.xlu1 %v6687_v10, %s5580_s21 }
 0x24e   : > { %1704 = vrot.lane.b32.xlu0 %v6689_v43, %s5581_s22  ;;  %v6782_v29 = vpop.permute.xlu2 %1554 }
 0x24f   : > { %v1421_v26 = vpop.permute.xlu1 %1420 }
 0x250   : > { %v1934_v10 = vsel %vm1931_vm7, %v1901_v34, %v1421_v26  ;;  %v1677_v54 = vpop.permute.xlu0 %1676  ;;  %v6841_v26 = vld [vmem:[#allocation2 + $0x142] sm:$0xff] }
 0x251   : > { %v1967_v7 = vsel %vm1964_vm8, %v1934_v10, %v6705_v2  ;;  %v1837_v2 = vsel %vm1833_vm5, %v1804_v41, %v6357_v36  ;;  %v9855_v10 = vld [vmem:[#allocation8_spill] sm:$0xff] }
 0x252   : > { %v2000_v43 = vsel %vm1997_vm9, %v1967_v7, %v1677_v54  ;;  %v1869_v57 = vsel %vm333_vm0, %v1837_v2, %v6486_v25  ;;  %v1772_v25 = vsel %vm422_vm1, %v6113_v39, %v9853_v6  ;;  %v6847_v54 = vld [vmem:[#allocation2 + $0x120] sm:$0xff] }
 0x253   : > { %4897 = vmatmul.msk.f32.gmra.mxu0 %vm2039_vm10, %v2000_v43  ;;  %v6851_v7 = vld [vmem:[#allocation2 + $0x122] sm:$0xff] }
 0x254   : > { %1578 = vrot.lane.b32.xlu2 %v6700_v16, %s5579_s20  ;;  %v1902_v16 = vsel %vm1898_vm6, %v1869_v57, %v6587_v62 }
 0x255   : > { %1450 = vrot.lane.b32.xlu1 %v6707_v0, %s5580_s21 }
 0x256   : > { %1706 = vrot.lane.b32.xlu0 %v6702_v37, %s5581_s22  ;;  %v1557_v28 = vpop.permute.xlu2 %1556  ;;  %v9854_v37 = vld [vmem:[#allocation54_spill] sm:$0xff] }
 0x257   : > { %v1423_v11 = vpop.permute.xlu1 %1422  ;;  %v1805_v59 = vsel %vm1800_vm4, %v1772_v25, %v9854_v37  ;;  %v9858_v25 = vld [vmem:[#allocation18_spill] sm:$0xff]  ;;  %v9859_v37 = vld [vmem:[#allocation59_spill] sm:$0xff] }
 0x258   : > { %v1935_v53 = vsel %vm1931_vm7, %v1902_v16, %v1423_v11  ;;  %v1679_v36 = vpop.permute.xlu0 %1678  ;;  %v1838_v62 = vsel %vm1833_vm5, %v1805_v59, %v6319_v4  ;;  %v9857_v11 = vld [vmem:[#allocation41_spill] sm:$0xff] }
 0x259   : > { %v1968_v0 = vsel %vm1964_vm8, %v1935_v53, %v6735_v20  ;;  %v1870_v20 = vsel %vm333_vm0, %v1838_v62, %v6498_v33  ;;  %v1773_v33 = vsel %vm422_vm1, %v6127_v1, %v9855_v10  ;;  %v674_v1 = vld [vmem:[#allocation2 + $0x168] sm:$0xff] }
 0x25a   : > { %v2001_v44 = vsel %vm1997_vm9, %v1968_v0, %v1679_v36  ;;  %v1903_v35 = vsel %vm1898_vm6, %v1870_v20, %v6631_v5  ;;  %v6849_v5 = vld [vmem:[#allocation2 + $0x121] sm:$0xff]  ;;  %2649 = vst.msk [vmem:[#allocation2 + $0x168] sm:$0xff] %vm333_vm0, %v9806_v60  ;;  %v701_v10 = vld [vmem:[#allocation2 + $0x129] sm:$0xff] }
 0x25b   : > { %4898 = vmatmul.msk.f32.gmra.mxu0 %vm2039_vm10, %v2001_v44  ;;  %2640 = vst.msk [vmem:[#allocation2 + $0x120] sm:$0xff] %vm333_vm0, %v9806_v60 }
 0x25c   : > { %1580 = vrot.lane.b32.xlu2 %v6726_v31, %s5579_s20 }
 0x25d   : > { %1452 = vrot.lane.b32.xlu1 %v6728_v38, %s5580_s21  ;;  %v673_v38 = vld [vmem:[#allocation2 + $0x158] sm:$0xff] }
 0x25e   : > { %1708 = vrot.lane.b32.xlu0 %v6730_v3, %s5581_s22  ;;  %v1559_v39 = vpop.permute.xlu2 %1558 }
 0x25f   : > { %v1425_v8 = vpop.permute.xlu1 %1424 }
 0x260   : > { %v1936_v49 = vsel %vm1931_vm7, %v1903_v35, %v1425_v8  ;;  %v1681_v31 = vpop.permute.xlu0 %1680 }
 0x261   : > { %v1969_v34 = vsel %vm1964_vm8, %v1936_v49, %v1553_v21  ;;  %v1806_v21 = vsel %vm1800_vm4, %v1773_v33, %v6215_v22  ;;  %v9860_v49 = vld [vmem:[#allocation10_spill] sm:$0xff] }
 0x262   : > { %v2002_v4 = vsel %vm1997_vm9, %v1969_v34, %v1681_v31  ;;  %v1839_v43 = vsel %vm1833_vm5, %v1806_v21, %v6359_v40  ;;  %v9861_v31 = vld [vmem:[#allocation39_spill] sm:$0xff]  ;;  %v669_v21 = vld [vmem:[#allocation2 + $0x128] sm:$0xff] }
 0x263   : > { %4899 = vmatmul.msk.f32.gmra.mxu0 %vm2039_vm10, %v2002_v4  ;;  %v1871_v56 = vsel %vm333_vm0, %v1839_v43, %v6452_v63  ;;  %v9856_v63 = vld [vmem:[#allocation16_spill] sm:$0xff]  ;;  %v6935_v33 = vld [vmem:[#allocation2 + $0x12a] sm:$0xff] }
 0x264   : > { %1454 = vrot.lane.b32.xlu2 %v667_v52, %s5580_s21  ;;  %v1904_v40 = vsel %vm1898_vm6, %v1871_v56, %v6640_v27  ;;  %v1774_v16 = vsel %vm422_vm1, %v6125_v15, %v9856_v63  ;;  %v6928_v34 = vld [vmem:[#allocation2 + $0x171] sm:$0xff]  ;;  %2642 = vst.msk [vmem:[#allocation2 + $0x130] sm:$0x3] %vm336_vm2, %v9806_v60 }
 0x265   : > { %1338 = vrot.lane.b32.xlu1 %v6841_v26, %s5578_s19  ;;  %v1807_v53 = vsel %vm1800_vm4, %v1774_v16, %v9857_v11  ;;  %v6930_v4 = vld [vmem:[#allocation2 + $0x172] sm:$0xff]  ;;  %2641 = vst.msk [vmem:[#allocation2 + $0x128] sm:$0xff] %vm333_vm0, %v9806_v60 }
 0x266   : > { %1466 = vrot.lane.b32.xlu0 %v673_v38, %s5580_s21  ;;  %v6869_v22 = vpop.permute.xlu2 %1560  ;;  %v1840_v27 = vsel %vm1833_vm5, %v1807_v53, %v6369_v42  ;;  %v9862_v38 = vld [vmem:[#allocation64_spill] sm:$0xff]  ;;  %2651 = vst.msk [vmem:[#allocation2 + $0x178] sm:$0x3] %vm336_vm2, %v9806_v60  ;;  %v675_v56 = vld [vmem:[#allocation2 + $0x170] sm:$0xff] }
 0x267   : > { %v1427_v52 = vpop.permute.xlu1 %1426  ;;  %2650 = vst.msk [vmem:[#allocation2 + $0x170] sm:$0xff] %vm333_vm0, %v9806_v60 }
 0x268   : > { %v1937_v61 = vsel %vm1931_vm7, %v1904_v40, %v1427_v52  ;;  %v1683_v41 = vpop.permute.xlu0 %1682 }
 0x269   : > { %v1970_v2 = vsel %vm1964_vm8, %v1937_v61, %v6782_v29  ;;  %v1872_v29 = vsel %vm333_vm0, %v1840_v27, %v6500_v12  ;;  %v6903_v12 = vld [vmem:[#allocation2 + $0x152] sm:$0xff] }
 0x26a   : > { %v2003_v57 = vsel %vm1997_vm9, %v1970_v2, %v1683_v41  ;;  %v1905_v36 = vsel %vm1898_vm6, %v1872_v29, %v6601_v58  ;;  %v9863_v61 = vld [vmem:[#allocation19_spill] sm:$0xff]  ;;  %v9865_v29 = vld [vmem:[#allocation21_spill] sm:$0xff] }
 0x26b   : > { %4900 = vmatmul.msk.f32.gmra.mxu0 %vm2039_vm10, %v2003_v57  ;;  %v1777_v41 = vsel %vm422_vm1, %v9825_v23, %v9863_v61  ;;  %v9864_v2 = vld [vmem:[#allocation47_spill] sm:$0xff]  ;;  %v9879_v61 = vld [vmem:[#allocation53_spill] sm:$0xff] }
 0x26c   : > { %1594 = vrot.lane.b32.xlu2 %v705_v30, %s5579_s20 }
 0x26d   : > { %1582 = vrot.lane.b32.xlu1 %v6774_v24, %s5579_s20  ;;  %v1775_v24 = vsel %vm422_vm1, %v6131_v32, %v9858_v25 }
 0x26e   : > { %1710 = vrot.lane.b32.xlu0 %v6776_v45, %s5581_s22  ;;  %v1563_v15 = vpop.permute.xlu2 %1562  ;;  %v1808_v59 = vsel %vm1800_vm4, %v1775_v24, %v9859_v37 }
 0x26f   : > { %v1429_v0 = vpop.permute.xlu1 %1428  ;;  %v1841_v58 = vsel %vm1833_vm5, %v1808_v59, %v6331_v19 }
 0x270   : > { %v1938_v44 = vsel %vm1931_vm7, %v1905_v36, %v1429_v0  ;;  %v1685_v30 = vpop.permute.xlu0 %1684 }
 0x271   : > { %v1971_v6 = vsel %vm1964_vm8, %v1938_v44, %v1557_v28  ;;  %v1873_v28 = vsel %vm333_vm0, %v1841_v58, %v6512_v17  ;;  %v1776_v17 = vsel %vm422_vm1, %v9861_v31, %v9860_v49  ;;  %v676_v49 = vld [vmem:[#allocation2 + $0x180] sm:$0xff] }
 0x272   : > { %v2004_v42 = vsel %vm1997_vm9, %v1971_v6, %v1685_v30  ;;  %v1906_v62 = vsel %vm1898_vm6, %v1873_v28, %v6644_v55  ;;  %v1809_v55 = vsel %vm1800_vm4, %v1776_v17, %v9862_v38  ;;  %v6992_v30 = vld [vmem:[#allocation2 + $0x139] sm:$0xff]  ;;  %v7016_v31 = vld [vmem:[#allocation2 + $0x182] sm:$0xff] }
 0x273   : > { %4901 = vmatmul.msk.f32.gmra.mxu0 %vm2039_vm10, %v2004_v42  ;;  %v6994_v6 = vld [vmem:[#allocation2 + $0x13a] sm:$0xff]  ;;  %2652 = vst.msk [vmem:[#allocation2 + $0x180] sm:$0xff] %vm333_vm0, %v9806_v60 }
 0x274   : > { %1328 = vrot.lane.b32.xlu2 %v6730_v3, %s5578_s19  ;;  %v9869_v42 = vld [vmem:[#allocation120_spill] sm:$0xff]  ;;  %v9874_v17 = vld [vmem:[#allocation97_spill] sm:$0xff] }
 0x275   : > { %1722 = vrot.lane.b32.xlu1 %v6802_v50, %s5581_s22 }
 0x276   : > { %1340 = vrot.lane.b32.xlu0 %v6903_v12, %s5578_s19  ;;  %v6917_v32 = vpop.permute.xlu2 %1564 }
 0x277   : > { %v1431_v20 = vpop.permute.xlu1 %1430 }
 0x278   : > { %v1939_v3 = vsel %vm1931_vm7, %v1906_v62, %v1431_v20  ;;  %v1687_v35 = vpop.permute.xlu0 %1686  ;;  %v9871_v20 = vld [vmem:[#allocation12_spill] sm:$0xff] }
 0x279   : > { %v1972_v19 = vsel %vm1964_vm8, %v1939_v3, %v1559_v39  ;;  %v1842_v39 = vsel %vm1833_vm5, %v1809_v55, %v6371_v46  ;;  %v9872_v3 = vld [vmem:[#allocation45_spill] sm:$0xff] }
 0x27a   : > { %v2005_v8 = vsel %vm1997_vm9, %v1972_v19, %v1687_v35  ;;  %v1874_v43 = vsel %vm333_vm0, %v1842_v39, %v6466_v14  ;;  %v1779_v35 = vsel %vm422_vm1, %v9872_v3, %v9871_v20  ;;  %v9873_v19 = vld [vmem:[#allocation70_spill] sm:$0xff] }
 0x27b   : > { %4902 = vmatmul.msk.f32.gmra.mxu0 %vm2039_vm10, %v2005_v8  ;;  %v1907_v46 = vsel %vm1898_vm6, %v1874_v43, %v6662_v13  ;;  %v1810_v13 = vsel %vm1800_vm4, %v1777_v41, %v9864_v2  ;;  %v1812_v8 = vsel %vm1800_vm4, %v1779_v35, %v9873_v19  ;;  %v9880_v41 = vld [vmem:[#allocation99_spill] sm:$0xff]  ;;  %v9889_v35 = vld [vmem:[#allocation14_spill] sm:$0xff] }
 0x27c   : > { %1468 = vrot.lane.b32.xlu2 %v674_v1, %s5580_s21  ;;  %v1843_v57 = vsel %vm1833_vm5, %v1810_v13, %v6381_v48  ;;  %v1845_v38 = vsel %vm1833_vm5, %v1812_v8, %v9874_v17  ;;  %v9881_v13 = vld [vmem:[#allocation121_spill] sm:$0xff]  ;;  %v9890_v19 = vld [vmem:[#allocation51_spill] sm:$0xff] }
 0x27d   : > { %1456 = vrot.lane.b32.xlu1 %v6847_v54, %s5580_s21  ;;  %v1782_v8 = vsel %vm422_vm1, %v9890_v19, %v9889_v35  ;;  %v9911_v19 = vld [vmem:[#allocation103_spill] sm:$0xff] }
 0x27e   : > { %1584 = vrot.lane.b32.xlu0 %v6849_v5, %s5579_s20  ;;  %v1567_v1 = vpop.permute.xlu2 %1566 }
 0x27f   : > { %v1433_v40 = vpop.permute.xlu1 %1432 }
 0x280   : > { %v1940_v54 = vsel %vm1931_vm7, %v1907_v46, %v1433_v40  ;;  %v1689_v52 = vpop.permute.xlu0 %1688 }
 0x281   : > { %v1973_v14 = vsel %vm1964_vm8, %v1940_v54, %v6869_v22  ;;  %v1875_v22 = vsel %vm333_vm0, %v1843_v57, %v6516_v51  ;;  %v9867_v51 = vld [vmem:[#allocation65_spill] sm:$0xff] }
 0x282   : > { %v2006_v5 = vsel %vm1997_vm9, %v1973_v14, %v1689_v52  ;;  %v1908_v63 = vsel %vm1898_vm6, %v1875_v22, %v6612_v9  ;;  %v9868_v9 = vld [vmem:[#allocation93_spill] sm:$0xff]  ;;  %v9877_v52 = vld [vmem:[#allocation22_spill] sm:$0xff]  ;;  %v9878_v14 = vld [vmem:[#allocation44_spill] sm:$0xff] }
 0x283   : > { %4903 = vmatmul.msk.f32.gmra.mxu0 %vm2039_vm10, %v2006_v5  ;;  %v1780_v5 = vsel %vm422_vm1, %v9878_v14, %v9877_v52 }
 0x284   : > { %1712 = vrot.lane.b32.xlu2 %v6851_v7, %s5581_s22 }
 0x285   : > { %1596 = vrot.lane.b32.xlu1 %v6862_v18, %s5579_s20  ;;  %v9866_v18 = vld [vmem:[#allocation40_spill] sm:$0xff] }
 0x286   : > { %1724 = vrot.lane.b32.xlu0 %v6864_v47, %s5581_s22  ;;  %v1569_v23 = vpop.permute.xlu2 %1568  ;;  %v1778_v36 = vsel %vm422_vm1, %v9866_v18, %v9865_v29  ;;  %v9883_v18 = vld [vmem:[#allocation24_spill] sm:$0xff] }
 0x287   : > { %v1435_v16 = vpop.permute.xlu1 %1434  ;;  %v1811_v0 = vsel %vm1800_vm4, %v1778_v36, %v9867_v51  ;;  %v9884_v36 = vld [vmem:[#allocation46_spill] sm:$0xff] }
 0x288   : > { %v1941_v11 = vsel %vm1931_vm7, %v1908_v63, %v1435_v16  ;;  %v1691_v53 = vpop.permute.xlu0 %1690  ;;  %v1844_v44 = vsel %vm1833_vm5, %v1811_v0, %v9868_v9  ;;  %v7050_v63 = vld [vmem:[#allocation2 + $0x140] sm:$0xff]  ;;  %v1781_v51 = vsel %vm422_vm1, %v9884_v36, %v9883_v18  ;;  %v9885_v0 = vld [vmem:[#allocation71_spill] sm:$0xff]  ;;  %v9903_v36 = vld [vmem:[#allocation52_spill] sm:$0xff] }
 0x289   : > { %v1974_v27 = vsel %vm1964_vm8, %v1941_v11, %v1563_v15  ;;  %v670_v15 = vld [vmem:[#allocation2 + $0x138] sm:$0xff]  ;;  %v1876_v25 = vsel %vm333_vm0, %v1844_v44, %v9869_v42  ;;  %v9882_v16 = vld [vmem:[#allocation137_spill] sm:$0xff]  ;;  %v1814_v9 = vsel %vm1800_vm4, %v1781_v51, %v9885_v0  ;;  %v9886_v44 = vld [vmem:[#allocation94_spill] sm:$0xff] }
 0x28a   : > { %v2007_v48 = vsel %vm1997_vm9, %v1974_v27, %v1691_v53  ;;  %2643 = vst.msk [vmem:[#allocation2 + $0x138] sm:$0xff] %vm333_vm0, %v9806_v60  ;;  %v1847_v42 = vsel %vm1833_vm5, %v1814_v9, %v9886_v44  ;;  %v9902_v18 = vld [vmem:[#allocation27_spill] sm:$0xff]  ;;  %v9904_v0 = vld [vmem:[#allocation77_spill] sm:$0xff] }
 0x28b   : > { %4904 = vmatmul.msk.f32.gmra.mxu0 %vm2039_vm10, %v2007_v48  ;;  %v1784_v51 = vsel %vm422_vm1, %v9903_v36, %v9902_v18  ;;  %v9905_v9 = vld [vmem:[#allocation95_spill] sm:$0xff]  ;;  %v9921_v18 = vld [vmem:[#allocation57_spill] sm:$0xff] }
 0x28c   : > { %1342 = vrot.lane.b32.xlu2 %v6802_v50, %s5578_s19  ;;  %v9870_v50 = vld [vmem:[#allocation140_spill] sm:$0xff] }
 0x28d   : > { %1330 = vrot.lane.b32.xlu1 %v6776_v45, %s5578_s19  ;;  %v1909_v37 = vsel %vm1898_vm6, %v1876_v25, %v9870_v50  ;;  %v7072_v25 = vld [vmem:[#allocation2 + $0x189] sm:$0xff] }
 0x28e   : > { %1458 = vrot.lane.b32.xlu0 %v669_v21, %s5580_s21  ;;  %v6999_v24 = vpop.permute.xlu2 %1570  ;;  %v9876_v21 = vld [vmem:[#allocation141_spill] sm:$0xff]  ;;  %v7074_v50 = vld [vmem:[#allocation2 + $0x18a] sm:$0xff] }
 0x28f   : > { %v1437_v59 = vpop.permute.xlu1 %1436  ;;  %2654 = vst.msk [vmem:[#allocation2 + $0x190] sm:$0x3] %vm336_vm2, %v9806_v60 }
 0x290   : > { %v1942_v45 = vsel %vm1931_vm7, %v1909_v37, %v1437_v59  ;;  %v1693_v58 = vpop.permute.xlu0 %1692  ;;  %v9887_v37 = vld [vmem:[#allocation123_spill] sm:$0xff] }
 0x291   : > { %v1975_v28 = vsel %vm1964_vm8, %v1942_v45, %v6917_v32  ;;  %v9875_v32 = vld [vmem:[#allocation116_spill] sm:$0xff]  ;;  %v1879_v59 = vsel %vm333_vm0, %v1847_v42, %v9887_v37 }
 0x292   : > { %v2008_v62 = vsel %vm1997_vm9, %v1975_v28, %v1693_v58  ;;  %v1877_v55 = vsel %vm333_vm0, %v1845_v38, %v9875_v32  ;;  %v9892_v38 = vld [vmem:[#allocation104_spill] sm:$0xff] }
 0x293   : > { %4905 = vmatmul.msk.f32.gmra.mxu0 %vm2039_vm10, %v2008_v62  ;;  %v9893_v32 = vld [vmem:[#allocation100_spill] sm:$0xff] }
 0x294   : > { %1586 = vrot.lane.b32.xlu2 %v701_v10, %s5579_s20  ;;  %v1910_v10 = vsel %vm1898_vm6, %v1877_v55, %v9876_v21 }
 0x295   : > { %1470 = vrot.lane.b32.xlu1 %v675_v56, %s5580_s21 }
 0x296   : > { %1598 = vrot.lane.b32.xlu0 %v6928_v34, %s5579_s20  ;;  %v1573_v39 = vpop.permute.xlu2 %1572  ;;  %v1813_v34 = vsel %vm1800_vm4, %v1780_v5, %v9879_v61  ;;  %v9896_v5 = vld [vmem:[#allocation25_spill] sm:$0xff] }
 0x297   : > { %v1439_v43 = vpop.permute.xlu1 %1438  ;;  %v1846_v2 = vsel %vm1833_vm5, %v1813_v34, %v9880_v41  ;;  %v9898_v34 = vld [vmem:[#allocation58_spill] sm:$0xff] }
 0x298   : > { %v1943_v46 = vsel %vm1931_vm7, %v1910_v10, %v1439_v43  ;;  %v1695_v40 = vpop.permute.xlu0 %1694  ;;  %v1878_v57 = vsel %vm333_vm0, %v1846_v2, %v9881_v13  ;;  %v9895_v43 = vld [vmem:[#allocation143_spill] sm:$0xff]  ;;  %v9899_v2 = vld [vmem:[#allocation102_spill] sm:$0xff] }
 0x299   : > { %v1976_v54 = vsel %vm1964_vm8, %v1943_v46, %v1567_v1  ;;  %v7044_v1 = vld [vmem:[#allocation2 + $0x141] sm:$0xff]  ;;  %v1911_v11 = vsel %vm1898_vm6, %v1878_v57, %v9882_v16 }
 0x29a   : > { %v2009_v56 = vsel %vm1997_vm9, %v1976_v54, %v1695_v40  ;;  %2645 = vst.msk [vmem:[#allocation2 + $0x148] sm:$0x3] %vm336_vm2, %v9806_v60 }
 0x29b   : > { %4906 = vmatmul.msk.f32.gmra.mxu0 %vm2039_vm10, %v2009_v56  ;;  %2644 = vst.msk [vmem:[#allocation2 + $0x140] sm:$0xff] %vm333_vm0, %v9806_v60 }
 0x29c   : > { %1726 = vrot.lane.b32.xlu2 %v6930_v4, %s5581_s22 }
 0x29d   : > { %1714 = vrot.lane.b32.xlu1 %v6935_v33, %s5581_s22 }
 0x29e   : > { %1332 = vrot.lane.b32.xlu0 %v6851_v7, %s5578_s19  ;;  %v1575_v22 = vpop.permute.xlu2 %1574 }
 0x29f   : > { %v1441_v53 = vpop.permute.xlu1 %1440 }
 0x2a0   : > { %v1944_v27 = vsel %vm1931_vm7, %v1911_v11, %v1441_v53  ;;  %v1697_v48 = vpop.permute.xlu0 %1696  ;;  %v9901_v11 = vld [vmem:[#allocation138_spill] sm:$0xff] }
 0x2a1   : > { %v1977_v29 = vsel %vm1964_vm8, %v1944_v27, %v1569_v23  ;;  %v677_v23 = vld [vmem:[#allocation2 + $0x188] sm:$0xff] }
 0x2a2   : > { %v2010_v7 = vsel %vm1997_vm9, %v1977_v29, %v1697_v48  ;;  %2653 = vst.msk [vmem:[#allocation2 + $0x188] sm:$0xff] %vm333_vm0, %v9806_v60 }
 0x2a3   : > { %4907 = vmatmul.msk.f32.gmra.mxu0 %vm2039_vm10, %v2010_v7 }
 0x2a4   : > { %1460 = vrot.lane.b32.xlu2 %v670_v15, %s5580_s21  ;;  %v9888_v15 = vld [vmem:[#allocation142_spill] sm:$0xff] }
 0x2a5   : > { %1344 = vrot.lane.b32.xlu1 %v6864_v47, %s5578_s19  ;;  %v1912_v58 = vsel %vm1898_vm6, %v1879_v59, %v9888_v15  ;;  %v9907_v59 = vld [vmem:[#allocation144_spill] sm:$0xff] }
 0x2a6   : > { %1472 = vrot.lane.b32.xlu0 %v676_v49, %s5580_s21  ;;  %v1577_v45 = vpop.permute.xlu2 %1576  ;;  %v9891_v49 = vld [vmem:[#allocation76_spill] sm:$0xff] }
 0x2a7   : > { %v1443_v28 = vpop.permute.xlu1 %1442  ;;  %v1815_v17 = vsel %vm1800_vm4, %v1782_v8, %v9891_v49 }
 0x2a8   : > { %v1945_v47 = vsel %vm1931_vm7, %v1912_v58, %v1443_v28  ;;  %v1699_v62 = vpop.permute.xlu0 %1698  ;;  %v1848_v55 = vsel %vm1833_vm5, %v1815_v17, %v9893_v32 }
 0x2a9   : > { %v1978_v20 = vsel %vm1964_vm8, %v1945_v47, %v6999_v24  ;;  %v9894_v24 = vld [vmem:[#allocation117_spill] sm:$0xff] }
 0x2aa   : > { %v2011_v3 = vsel %vm1997_vm9, %v1978_v20, %v1699_v62  ;;  %v1880_v21 = vsel %vm333_vm0, %v1848_v55, %v9894_v24  ;;  %v9909_v20 = vld [vmem:[#allocation56_spill] sm:$0xff]  ;;  %v672_v24 = vld [vmem:[#allocation2 + $0x150] sm:$0xff] }
 0x2ab   : > { %4908 = vmatmul.msk.f32.gmra.mxu0 %vm2039_vm10, %v2011_v3  ;;  %v1913_v46 = vsel %vm1898_vm6, %v1880_v21, %v9895_v43 }
 0x2ac   : > { %1600 = vrot.lane.b32.xlu2 %v9892_v38, %s5579_s20  ;;  %v9913_v38 = vld [vmem:[#allocation145_spill] sm:$0xff] }
 0x2ad   : > { %1588 = vrot.lane.b32.xlu1 %v6992_v30, %s5579_s20  ;;  %v9897_v30 = vld [vmem:[#allocation50_spill] sm:$0xff] }
 0x2ae   : > { %1716 = vrot.lane.b32.xlu0 %v6994_v6, %s5581_s22  ;;  %v1579_v10 = vpop.permute.xlu2 %1578  ;;  %v1783_v61 = vsel %vm422_vm1, %v9897_v30, %v9896_v5  ;;  %v9917_v5 = vld [vmem:[#allocation106_spill] sm:$0xff]  ;;  %v9918_v30 = vld [vmem:[#allocation127_spill] sm:$0xff] }
 0x2af   : > { %v1445_v40 = vpop.permute.xlu1 %1444  ;;  %v1816_v41 = vsel %vm1800_vm4, %v1783_v61, %v9898_v34 }
 0x2b0   : > { %v1946_v54 = vsel %vm1931_vm7, %v1913_v46, %v1445_v40  ;;  %v1701_v56 = vpop.permute.xlu0 %1700  ;;  %v1849_v13 = vsel %vm1833_vm5, %v1816_v41, %v9899_v2  ;;  %v9914_v40 = vld [vmem:[#allocation28_spill] sm:$0xff]  ;;  %v9919_v41 = vld [vmem:[#allocation139_spill] sm:$0xff] }
 0x2b1   : > { %v1979_v52 = vsel %vm1964_vm8, %v1946_v54, %v1573_v39  ;;  %v9900_v39 = vld [vmem:[#allocation124_spill] sm:$0xff]  ;;  %v9915_v54 = vld [vmem:[#allocation55_spill] sm:$0xff] }
 0x2b2   : > { %v2012_v14 = vsel %vm1997_vm9, %v1979_v52, %v1701_v56  ;;  %v1881_v57 = vsel %vm333_vm0, %v1849_v13, %v9900_v39  ;;  %v1786_v56 = vsel %vm422_vm1, %v9915_v54, %v9914_v40  ;;  %v9916_v52 = vld [vmem:[#allocation63_spill] sm:$0xff]  ;;  %v678_v39 = vld [vmem:[#allocation2 + $0x198] sm:$0xff]  ;;  %v9933_v40 = vld [vmem:[#allocation85_spill] sm:$0xff] }
 0x2b3   : > { %4909 = vmatmul.msk.f32.gmra.mxu0 %vm2039_vm10, %v2012_v14  ;;  %v1914_v53 = vsel %vm1898_vm6, %v1881_v57, %v9901_v11  ;;  %v1819_v14 = vsel %vm1800_vm4, %v1786_v56, %v9916_v52  ;;  %v710_v57 = vld [vmem:[#allocation2 + $0x199] sm:$0xff]  ;;  %v9934_v56 = vld [vmem:[#allocation107_spill] sm:$0xff] }
 0x2b4   : > { %1334 = vrot.lane.b32.xlu2 %v6935_v33, %s5578_s19  ;;  %v742_v11 = vld [vmem:[#allocation2 + $0x19a] sm:$0xff] }
 0x2b5   : > { %1728 = vrot.lane.b32.xlu1 %v7016_v31, %s5581_s22  ;;  %2655 = vst.msk [vmem:[#allocation2 + $0x198] sm:$0xff] %vm333_vm0, %v9806_v60 }
 0x2b6   : > { %1346 = vrot.lane.b32.xlu0 %v6930_v4, %s5578_s19  ;;  %v1581_v16 = vpop.permute.xlu2 %1580  ;;  %v1817_v4 = vsel %vm1800_vm4, %v1784_v51, %v9904_v0  ;;  %v9922_v51 = vld [vmem:[#allocation83_spill] sm:$0xff]  ;;  %v9923_v0 = vld [vmem:[#allocation96_spill] sm:$0xff] }
 0x2b7   : > { %v1447_v27 = vpop.permute.xlu1 %1446  ;;  %v1850_v44 = vsel %vm1833_vm5, %v1817_v4, %v9905_v9  ;;  %v679_v9 = vld [vmem:[#allocation2 + $0x1a0] sm:$0xff] }
 0x2b8   : > { %v1947_v48 = vsel %vm1931_vm7, %v1914_v53, %v1447_v27  ;;  %v1703_v33 = vpop.permute.xlu0 %1702 }
 0x2b9   : > { %v1980_v29 = vsel %vm1964_vm8, %v1947_v48, %v1575_v22  ;;  %v9906_v22 = vld [vmem:[#allocation126_spill] sm:$0xff] }
 0x2ba   : > { %v2013_v7 = vsel %vm1997_vm9, %v1980_v29, %v1703_v33  ;;  %v1882_v42 = vsel %vm333_vm0, %v1850_v44, %v9906_v22  ;;  %v743_v44 = vld [vmem:[#allocation2 + $0x1a2] sm:$0xff] }
 0x2bb   : > { %4910 = vmatmul.msk.f32.gmra.mxu0 %vm2039_vm10, %v2013_v7  ;;  %v1915_v15 = vsel %vm1898_vm6, %v1882_v42, %v9907_v59  ;;  %v9920_v7 = vld [vmem:[#allocation30_spill] sm:$0xff]  ;;  %v9924_v42 = vld [vmem:[#allocation36_spill] sm:$0xff] }
 0x2bc   : > { %1474 = vrot.lane.b32.xlu2 %v677_v23, %s5580_s21  ;;  %v1787_v36 = vsel %vm422_vm1, %v9921_v18, %v9920_v7  ;;  %v711_v22 = vld [vmem:[#allocation2 + $0x1a1] sm:$0xff]  ;;  %v9925_v59 = vld [vmem:[#allocation68_spill] sm:$0xff] }
 0x2bd   : > { %1462 = vrot.lane.b32.xlu1 %v7050_v63, %s5580_s21  ;;  %v9908_v63 = vld [vmem:[#allocation17_spill] sm:$0xff]  ;;  %2656 = vst.msk [vmem:[#allocation2 + $0x1a0] sm:$0xff] %vm333_vm0, %v9806_v60 }
 0x2be   : > { %1590 = vrot.lane.b32.xlu0 %v7044_v1, %s5579_s20  ;;  %v7146_v37 = vpop.permute.xlu2 %1454  ;;  %v1785_v3 = vsel %vm422_vm1, %v9909_v20, %v9908_v63  ;;  %v9910_v1 = vld [vmem:[#allocation82_spill] sm:$0xff]  ;;  %2657 = vst.msk [vmem:[#allocation2 + $0x1a8] sm:$0x3] %vm336_vm2, %v9806_v60  ;;  %vm4037_vm2 = vcmask 785408  }
 0x2bf   : > { %v1449_v58 = vpop.permute.xlu1 %1448  ;;  %v1818_v35 = vsel %vm1800_vm4, %v1785_v3, %v9910_v1  ;;  %v9929_v3 = vld [vmem:[#allocation101_spill] sm:$0xff] }
 0x2c0   : > { %v1948_v23 = vsel %vm1931_vm7, %v1915_v15, %v1449_v58  ;;  %v1705_v28 = vpop.permute.xlu0 %1704  ;;  %v1851_v8 = vsel %vm1833_vm5, %v1818_v35, %v9911_v19  ;;  %v1793_v15 = vsel %vm422_vm1, %v9925_v59, %v9924_v42  ;;  %v9926_v58 = vld [vmem:[#allocation129_spill] sm:$0xff]  ;;  %v9930_v19 = vld [vmem:[#allocation38_spill] sm:$0xff]  ;;  %v9942_v59 = vld [vmem:[#allocation72_spill] sm:$0xff] }
 0x2c1   : > { %v1981_v47 = vsel %vm1964_vm8, %v1948_v23, %v1577_v45  ;;  %v9912_v45 = vld [vmem:[#allocation118_spill] sm:$0xff]  ;;  %v9941_v42 = vld [vmem:[#allocation37_spill] sm:$0xff] }
 0x2c2   : > { %v2014_v62 = vsel %vm1997_vm9, %v1981_v47, %v1705_v28  ;;  %v1883_v49 = vsel %vm333_vm0, %v1851_v8, %v9912_v45  ;;  %v9927_v28 = vld [vmem:[#allocation88_spill] sm:$0xff] }
 0x2c3   : > { %4911 = vmatmul.msk.f32.gmra.mxu0 %vm2039_vm10, %v2014_v62  ;;  %v1916_v32 = vsel %vm1898_vm6, %v1883_v49, %v9913_v38  ;;  %v1826_v47 = vsel %vm1800_vm4, %v1793_v15, %v9927_v28  ;;  %v9928_v62 = vld [vmem:[#allocation146_spill] sm:$0xff]  ;;  %v1795_v15 = vsel %vm422_vm1, %v9942_v59, %v9941_v42  ;;  %v9944_v28 = vld [vmem:[#allocation31_spill] sm:$0xff] }
 0x2c4   : > { %1718 = vrot.lane.b32.xlu2 %v6841_v26, %s5581_s22  ;;  %v704_v26 = vld [vmem:[#allocation2 + $0x151] sm:$0xff]  ;;  %v1859_v1 = vsel %vm1833_vm5, %v1826_v47, %v9929_v3  ;;  %v9947_v3 = vld [vmem:[#allocation69_spill] sm:$0xff] }
 0x2c5   : > { %1602 = vrot.lane.b32.xlu1 %v7072_v25, %s5579_s20  ;;  %2646 = vst.msk [vmem:[#allocation2 + $0x150] sm:$0xff] %vm333_vm0, %v9806_v60  ;;  %v1891_v8 = vsel %vm333_vm0, %v1859_v1, %v9930_v19  ;;  %v9945_v47 = vld [vmem:[#allocation60_spill] sm:$0xff]  ;;  %v9949_v19 = vld [vmem:[#allocation109_spill] sm:$0xff] }
 0x2c6   : > { %1730 = vrot.lane.b32.xlu0 %v7074_v50, %s5581_s22  ;;  %v7169_v17 = vpop.permute.xlu2 %1594  ;;  %2647 = vst.msk [vmem:[#allocation2 + $0x158] sm:$0xff] %vm333_vm0, %v9806_v60 }
 0x2c7   : > { %v1451_v55 = vpop.permute.xlu1 %1450 }
 0x2c8   : > { %v1949_v21 = vsel %vm1931_vm7, %v1916_v32, %v1451_v55  ;;  %v1707_v43 = vpop.permute.xlu0 %1706 }
 0x2c9   : > { %v1982_v25 = vsel %vm1964_vm8, %v1949_v21, %v1579_v10  ;;  %v1852_v10 = vsel %vm1833_vm5, %v1819_v14, %v9917_v5  ;;  %v7249_v21 = vpop.f32.mrf.mxu0  ;;  %v9935_v14 = vld [vmem:[#allocation119_spill] sm:$0xff] }
 0x2ca   : > { %v2015_v46 = vsel %vm1997_vm9, %v1982_v25, %v1707_v43  ;;  %v1884_v61 = vsel %vm333_vm0, %v1852_v10, %v9918_v30  ;;  %v9931_v43 = vld [vmem:[#allocation20_spill] sm:$0xff]  ;;  %v9932_v25 = vld [vmem:[#allocation61_spill] sm:$0xff] }
 0x2cb   : > { %4912 = vmatmul.msk.f32.gmra.mxu0 %vm2039_vm10, %v2015_v46  ;;  %v1917_v2 = vsel %vm1898_vm6, %v1884_v61, %v9919_v41  ;;  %v1788_v46 = vsel %vm422_vm1, %v9932_v25, %v9931_v43  ;;  %v9936_v61 = vld [vmem:[#allocation26_spill] sm:$0xff]  ;;  %v9937_v41 = vld [vmem:[#allocation73_spill] sm:$0xff] }
 0x2cc   : > { %1348 = vrot.lane.b32.xlu2 %v7016_v31, %s5578_s19  ;;  %v1821_v54 = vsel %vm1800_vm4, %v1788_v46, %v9933_v40 }
 0x2cd   : > { %1336 = vrot.lane.b32.xlu1 %v6994_v6, %s5578_s19  ;;  %v1854_v52 = vsel %vm1833_vm5, %v1821_v54, %v9934_v56 }
 0x2ce   : > { %1464 = vrot.lane.b32.xlu0 %v672_v24, %s5580_s21  ;;  %v1329_v34 = vpop.permute.xlu2 %1328 }
 0x2cf   : > { %v1453_v13 = vpop.permute.xlu1 %1452 }
 0x2d0   : > { %v1950_v31 = vsel %vm1931_vm7, %v1917_v2, %v1453_v13  ;;  %v1709_v53 = vpop.permute.xlu0 %1708  ;;  %v1794_v2 = vsel %vm422_vm1, %v9937_v41, %v9936_v61 }
 0x2d1   : > { %v1983_v6 = vsel %vm1964_vm8, %v1950_v31, %v1581_v16  ;;  %v1820_v16 = vsel %vm1800_vm4, %v1787_v36, %v9922_v51 }
 0x2d2   : > { %v2016_v27 = vsel %vm1997_vm9, %v1983_v6, %v1709_v53  ;;  %v1853_v4 = vsel %vm1833_vm5, %v1820_v16, %v9923_v0  ;;  %v9939_v53 = vld [vmem:[#allocation112_spill] sm:$0xff] }
 0x2d3   : > { %4913 = vmatmul.msk.f32.gmra.mxu0 %vm2039_vm10, %v2016_v27  ;;  %v1885_v23 = vsel %vm333_vm0, %v1853_v4, %v9926_v58 }
 0x2d4   : > { %1592 = vrot.lane.b32.xlu2 %v704_v26, %s5579_s20  ;;  %v1918_v63 = vsel %vm1898_vm6, %v1885_v23, %v9928_v62  ;;  %v9943_v23 = vld [vmem:[#allocation81_spill] sm:$0xff]  ;;  %v1789_v62 = vsel %vm422_vm1, %v9945_v47, %v9944_v28 }
 0x2d5   : > { %1476 = vrot.lane.b32.xlu1 %v678_v39, %s5580_s21  ;;  %v1822_v1 = vsel %vm1800_vm4, %v1789_v62, %v9947_v3 }
 0x2d6   : > { %1604 = vrot.lane.b32.xlu0 %v710_v57, %s5579_s20  ;;  %v1469_v48 = vpop.permute.xlu2 %1468  ;;  %v9938_v57 = vld [vmem:[#allocation89_spill] sm:$0xff] }
 0x2d7   : > { %v1339_v33 = vpop.permute.xlu1 %1338 }
 0x2d8   : > { %v1467_v29 = vpop.permute.xlu0 %1466  ;;  %v1924_v38 = vsel %vm1898_vm6, %v1891_v8, %v1339_v33  ;;  %v1855_v8 = vsel %vm1833_vm5, %v1822_v1, %v9949_v19  ;;  %v9964_v19 = vld [vmem:[#allocation110_spill] sm:$0xff] }
 0x2d9   : > { %v1957_v60 = vsel %vm1931_vm7, %v1924_v38, %v1467_v29  ;;  %v7274_v29 = vpop.f32.mrf.mxu0  ;;  %v9950_v38 = vld [vmem:[#allocation130_spill] sm:$0xff] }
 0x2da   : > { %v1990_v55 = vsel %vm1964_vm8, %v1957_v60, %v7169_v17  ;;  %v1886_v17 = vsel %vm333_vm0, %v1854_v52, %v9935_v14 }
 0x2db   : > { %v1919_v5 = vsel %vm1898_vm6, %v1886_v17, %v1329_v34  ;;  %v9940_v34 = vld [vmem:[#allocation125_spill] sm:$0xff] }
 0x2dc   : > { %1732 = vrot.lane.b32.xlu2 %v742_v11, %s5581_s22  ;;  %v1827_v11 = vsel %vm1800_vm4, %v1794_v2, %v9938_v57  ;;  %v9953_v2 = vld [vmem:[#allocation86_spill] sm:$0xff]  ;;  %v9955_v57 = vld [vmem:[#allocation131_spill] sm:$0xff] }
 0x2dd   : > { %1720 = vrot.lane.b32.xlu1 %v6903_v12, %s5581_s22  ;;  %v1951_v12 = vsel %vm1931_vm7, %v1918_v63, %v7146_v37  ;;  %v1860_v6 = vsel %vm1833_vm5, %v1827_v11, %v9939_v53  ;;  %v9946_v63 = vld [vmem:[#allocation113_spill] sm:$0xff] }
 0x2de   : > { %1350 = vrot.lane.b32.xlu0 %v7074_v50, %s5578_s19  ;;  %v1713_v20 = vpop.permute.xlu2 %1712  ;;  %v1892_v33 = vsel %vm333_vm0, %v1860_v6, %v9940_v34  ;;  %v9956_v6 = vld [vmem:[#allocation42_spill] sm:$0xff] }
 0x2df   : > { %v1583_v35 = vpop.permute.xlu1 %1582 }
 0x2e0   : > { %v1984_v45 = vsel %vm1964_vm8, %v1951_v12, %v1583_v35  ;;  %v1711_v49 = vpop.permute.xlu0 %1710  ;;  %v9948_v12 = vld [vmem:[#allocation133_spill] sm:$0xff] }
 0x2e1   : > { %v2017_v50 = vsel %vm1997_vm9, %v1984_v45, %v1711_v49 }
 0x2e2   : > { %4914 = vmatmul.msk.f32.gmra.mxu0 %vm2039_vm10, %v2017_v50  ;;  %v1887_v50 = vsel %vm333_vm0, %v1855_v8, %v9950_v38 }
 0x2e4   : > { %1606 = vrot.lane.b32.xlu2 %v711_v22, %s5579_s20 }
 0x2e5   : > { %1478 = vrot.lane.b32.xlu1 %v679_v9, %s5580_s21  ;;  %v7281_v9 = vpop.f32.mrf.mxu0 }
 0x2e6   : > { %1734 = vrot.lane.b32.xlu0 %v743_v44, %s5581_s22  ;;  %v1343_v37 = vpop.permute.xlu2 %1342 }
 0x2e7   : > { %v1723_v32 = vpop.permute.xlu1 %1722 }
 0x2e8   : > { %v1341_v24 = vpop.permute.xlu0 %1340  ;;  %v2023_v26 = vsel %vm1997_vm9, %v1990_v55, %v1723_v32 }
 0x2e9   : > { %4920 = vmatmul.msk.f32.vlgmr.msra.gmra.mxu3 %vm2039_vm10, %v2023_v26  ;;  %v1925_v7 = vsel %vm1898_vm6, %v1892_v33, %v1341_v24  ;;  %v9958_v33 = vld [vmem:[#allocation90_spill] sm:$0xff] }
 0x2ea   : > { %v1958_v18 = vsel %vm1931_vm7, %v1925_v7, %v1469_v48  ;;  %v1828_v48 = vsel %vm1800_vm4, %v1795_v15, %v9943_v23 }
 0x2ed   : > { %v7302_v60 = vpop.f32.mrf.mxu0 }
 0x2ee   : > { %v1587_v10 = vpop.permute.xlu2 %1586 }
 0x2ef   : > { %v1457_v30 = vpop.permute.xlu1 %1456 }
 0x2f0   : > { %v1952_v13 = vsel %vm1931_vm7, %v1919_v5, %v1457_v30  ;;  %v1585_v39 = vpop.permute.xlu0 %1584  ;;  %v9951_v5 = vld [vmem:[#allocation33_spill] sm:$0xff]  ;;  %v9952_v30 = vld [vmem:[#allocation62_spill] sm:$0xff] }
 0x2f1   : > { %v1985_v31 = vsel %vm1964_vm8, %v1952_v13, %v1585_v39  ;;  %v1790_v61 = vsel %vm422_vm1, %v9952_v30, %v9951_v5  ;;  %v9954_v39 = vld [vmem:[#allocation98_spill] sm:$0xff] }
 0x2f2   : > { %v2018_v27 = vsel %vm1997_vm9, %v1985_v31, %v1713_v20  ;;  %v1861_v20 = vsel %vm1833_vm5, %v1828_v48, %v9946_v63  ;;  %v1823_v13 = vsel %vm1800_vm4, %v1790_v61, %v9953_v2  ;;  %v9961_v63 = vld [vmem:[#allocation23_spill] sm:$0xff] }
 0x2f3   : > { %4915 = vmatmul.msk.f32.gmra.mxu0 %vm2039_vm10, %v2018_v27  ;;  %v1893_v35 = vsel %vm333_vm0, %v1861_v20, %v9948_v12  ;;  %v9957_v27 = vld [vmem:[#allocation74_spill] sm:$0xff]  ;;  %v9962_v20 = vld [vmem:[#allocation67_spill] sm:$0xff] }
 0x2f4   : > { %v1926_v45 = vsel %vm1898_vm6, %v1893_v35, %v1343_v37  ;;  %v1796_v34 = vsel %vm422_vm1, %v9957_v27, %v9956_v6  ;;  %v1791_v3 = vsel %vm422_vm1, %v9962_v20, %v9961_v63  ;;  %v9963_v12 = vld [vmem:[#allocation87_spill] sm:$0xff]  ;;  %v9980_v63 = vld [vmem:[#allocation132_spill] sm:$0xff] }
 0x2f5   : > { %v7313_v52 = vpop.f32.mrf.mxu0  ;;  %v1829_v7 = vsel %vm1800_vm4, %v1796_v34, %v9958_v33  ;;  %v1824_v35 = vsel %vm1800_vm4, %v1791_v3, %v9963_v12  ;;  %v9971_v27 = vld [vmem:[#allocation43_spill] sm:$0xff]  ;;  %v9972_v34 = vld [vmem:[#allocation78_spill] sm:$0xff] }
 0x2f6   : > { %v1727_v0 = vpop.permute.xlu2 %1726  ;;  %v1857_v8 = vsel %vm1833_vm5, %v1824_v35, %v9964_v19  ;;  %v1798_v33 = vsel %vm422_vm1, %v9972_v34, %v9971_v27  ;;  %v7426_v34 = vld [vmem:[%s9654_s2] ss:$0 sm:$0xff] }
 0x2f7   : > { %v1597_v36 = vpop.permute.xlu1 %1596 }
 0x2f8   : > { %v1991_v51 = vsel %vm1964_vm8, %v1958_v18, %v1597_v36  ;;  %v1725_v16 = vpop.permute.xlu0 %1724  ;;  %v9959_v18 = vld [vmem:[#allocation105_spill] sm:$0xff] }
 0x2f9   : > { %v2024_v4 = vsel %vm1997_vm9, %v1991_v51, %v1725_v16  ;;  %v1862_v36 = vsel %vm1833_vm5, %v1829_v7, %v9959_v18  ;;  %v9973_v7 = vld [vmem:[#allocation84_spill] sm:$0xff] }
 0x2fa   : > { %4921 = vmatmul.msk.f32.gmra.mxu3 %vm2039_vm10, %v2024_v4  ;;  %v1831_v18 = vsel %vm1800_vm4, %v1798_v33, %v9973_v7  ;;  %v7430_v33 = vadd.f32 %v7426_v34, %v7274_v29 }
 0x2fd   : > { %v7324_v31 = vpop.f32.mrf.mxu0 }
 0x2fe   : > { %v1461_v58 = vpop.permute.xlu2 %1460 }
 0x2ff   : > { %v1331_v44 = vpop.permute.xlu1 %1330 }
 0x300   : > { %v1459_v22 = vpop.permute.xlu0 %1458  ;;  %v1920_v24 = vsel %vm1898_vm6, %v1887_v50, %v1331_v44 }
 0x301   : > { %v1953_v25 = vsel %vm1931_vm7, %v1920_v24, %v1459_v22 }
 0x302   : > { %v1986_v40 = vsel %vm1964_vm8, %v1953_v25, %v1587_v10  ;;  %v1856_v10 = vsel %vm1833_vm5, %v1823_v13, %v9954_v39 }
 0x303   : > { %v1888_v11 = vsel %vm333_vm0, %v1856_v10, %v9955_v57 }
 0x305   : > { %v7342_v48 = vpop.f32.mrf.mxu0 }
 0x306   : > { %v1601_v37 = vpop.permute.xlu2 %1600 }
 0x307   : > { %v1471_v49 = vpop.permute.xlu1 %1470 }
 0x308   : > { %v1959_v32 = vsel %vm1931_vm7, %v1926_v45, %v1471_v49  ;;  %v1599_v55 = vpop.permute.xlu0 %1598  ;;  %v9965_v45 = vld [vmem:[#allocation122_spill] sm:$0xff] }
 0x309   : > { %v1992_v26 = vsel %vm1964_vm8, %v1959_v32, %v1599_v55  ;;  %v1889_v49 = vsel %vm333_vm0, %v1857_v8, %v9965_v45  ;;  %v9966_v32 = vld [vmem:[#allocation29_spill] sm:$0xff]  ;;  %v9967_v55 = vld [vmem:[#allocation79_spill] sm:$0xff] }
 0x30a   : > { %v2025_v43 = vsel %vm1997_vm9, %v1992_v26, %v1727_v0  ;;  %v9960_v0 = vld [vmem:[#allocation134_spill] sm:$0xff]  ;;  %v1797_v24 = vsel %vm422_vm1, %v9967_v55, %v9966_v32  ;;  %v9981_v55 = vld [vmem:[#allocation48_spill] sm:$0xff] }
 0x30b   : > { %4922 = vmatmul.msk.f32.gmra.mxu3 %vm2039_vm10, %v2025_v43  ;;  %v1894_v4 = vsel %vm333_vm0, %v1862_v36, %v9960_v0 }
 0x30d   : > { %v7360_v26 = vpop.f32.mrf.mxu0 }
 0x30e   : > { %v1335_v14 = vpop.permute.xlu2 %1334 }
 0x30f   : > { %v1715_v46 = vpop.permute.xlu1 %1714  ;;  %v1922_v38 = vsel %vm1898_vm6, %v1889_v49, %v1335_v14 }
 0x310   : > { %v1333_v54 = vpop.permute.xlu0 %1332  ;;  %v2019_v56 = vsel %vm1997_vm9, %v1986_v40, %v1715_v46 }
 0x311   : > { %4916 = vmatmul.msk.f32.gmra.mxu0 %vm2039_vm10, %v2019_v56  ;;  %v1921_v53 = vsel %vm1898_vm6, %v1888_v11, %v1333_v54  ;;  %v9969_v54 = vld [vmem:[#allocation114_spill] sm:$0xff] }
 0x312   : > { %v1954_v51 = vsel %vm1931_vm7, %v1921_v53, %v1461_v58 }
 0x315   : > { %v7376_v57 = vpop.f32.mrf.mxu0 }
 0x316   : > { %v1475_v42 = vpop.permute.xlu2 %1474 }
 0x317   : > { %v1345_v17 = vpop.permute.xlu1 %1344 }
 0x318   : > { %v1473_v41 = vpop.permute.xlu0 %1472  ;;  %v1927_v59 = vsel %vm1898_vm6, %v1894_v4, %v1345_v17  ;;  %v9970_v17 = vld [vmem:[#allocation128_spill] sm:$0xff]  ;;  %v9976_v4 = vld [vmem:[#allocation115_spill] sm:$0xff] }
 0x319   : > { %v1960_v23 = vsel %vm1931_vm7, %v1927_v59, %v1473_v41  ;;  %v9978_v59 = vld [vmem:[#allocation135_spill] sm:$0xff] }
 0x31a   : > { %v1993_v58 = vsel %vm1964_vm8, %v1960_v23, %v1601_v37  ;;  %v9968_v37 = vld [vmem:[#allocation91_spill] sm:$0xff] }
 0x31b   : > { %v1830_v46 = vsel %vm1800_vm4, %v1797_v24, %v9968_v37  ;;  %v9979_v23 = vld [vmem:[#allocation111_spill] sm:$0xff]  ;;  %v9982_v24 = vld [vmem:[#allocation80_spill] sm:$0xff] }
 0x31c   : > { %v1863_v56 = vsel %vm1833_vm5, %v1830_v46, %v9969_v54  ;;  %v9984_v46 = vld [vmem:[#allocation108_spill] sm:$0xff] }
 0x31d   : > { %v1895_v5 = vsel %vm333_vm0, %v1863_v56, %v9970_v17  ;;  %v7384_v36 = vpop.f32.mrf.mxu0  ;;  %v9985_v54 = vld [vmem:[#allocation136_spill] sm:$0xff] }
 0x31e   : > { %v1719_v1 = vpop.permute.xlu2 %1718 }
 0x31f   : > { %v1589_v16 = vpop.permute.xlu1 %1588 }
 0x320   : > { %v1987_v44 = vsel %vm1964_vm8, %v1954_v51, %v1589_v16  ;;  %v1717_v22 = vpop.permute.xlu0 %1716  ;;  %v9974_v51 = vld [vmem:[#allocation34_spill] sm:$0xff] }
 0x321   : > { %v2020_v15 = vsel %vm1997_vm9, %v1987_v44, %v1717_v22  ;;  %v9975_v16 = vld [vmem:[#allocation66_spill] sm:$0xff]  ;;  %v1864_v44 = vsel %vm1833_vm5, %v1831_v18, %v9976_v4  ;;  %v9977_v22 = vld [vmem:[#allocation75_spill] sm:$0xff]  ;;  %v7434_v18 = vadd.f32 %v7426_v34, %v7249_v21  ;;  %v7452_v21 = vadd.f32 %v7426_v34, %v7313_v52 }
 0x322   : > { %4917 = vmatmul.msk.f32.gmra.mxu0 %vm2039_vm10, %v2020_v15  ;;  %v1792_v0 = vsel %vm422_vm1, %v9975_v16, %v9974_v51  ;;  %v1896_v15 = vsel %vm333_vm0, %v1864_v44, %v9978_v59  ;;  %v7438_v51 = vadd.f32 %v7426_v34, %v7281_v9  ;;  %v2256_v16 = vsel %vm333_vm0, %v7430_v33, 0.0 }
 0x323   : > { %v2255_v29 = vsel %vm333_vm0, %v7434_v18, 0.0  ;;  %v2262_v59 = vsel %vm333_vm0, %v7452_v21, 0.0 }
 0x324   : > { %v2258_v4 = vsel %vm333_vm0, %v7438_v51, 0.0  ;;  %v2257_v44 = vadd.f32 %v2256_v16, %v2255_v29 }
 0x325   : > { %v2187_v45 = vpop.f32.mrf.mxu0 }
 0x326   : > { %v1349_v61 = vpop.permute.xlu2 %1348 }
 0x327   : > { %v1729_v28 = vpop.permute.xlu1 %1728 }
 0x328   : > { %v1347_v47 = vpop.permute.xlu0 %1346  ;;  %v2026_v62 = vsel %vm1997_vm9, %v1993_v58, %v1729_v28  ;;  %v1929_v58 = vsel %vm1898_vm6, %v1896_v15, %v1349_v61  ;;  %v7464_v15 = vadd.f32 %v7426_v34, %v7342_v48 }
 0x329   : > { %4923 = vmatmul.msk.f32.gmra.mxu3 %vm2039_vm10, %v2026_v62  ;;  %v1928_v30 = vsel %vm1898_vm6, %v1895_v5, %v1347_v47 }
 0x32a   : > { %v1961_v41 = vsel %vm1931_vm7, %v1928_v30, %v1475_v42  ;;  %v1825_v42 = vsel %vm1800_vm4, %v1792_v0, %v9977_v22  ;;  %v7444_v0 = vadd.f32 %v7426_v34, %v7302_v60  ;;  %v7458_v22 = vadd.f32 %v7426_v34, %v7324_v31 }
 0x32b   : > { %v1858_v28 = vsel %vm1833_vm5, %v1825_v42, %v9979_v23  ;;  %v2259_v60 = vadd.f32 %v2258_v4, %v2257_v44  ;;  %v2266_v31 = vsel %vm333_vm0, %v7464_v15, 0.0 }
 0x32c   : > { %v1890_v20 = vsel %vm333_vm0, %v1858_v28, %v9980_v63  ;;  %v2260_v9 = vsel %vm333_vm0, %v7444_v0, 0.0  ;;  %v2264_v52 = vsel %vm333_vm0, %v7458_v22, 0.0  ;;  %v7470_v28 = vadd.f32 %v7426_v34, %v7360_v26 }
 0x32d   : > { %v2190_v30 = vpop.f32.mrf.mxu0  ;;  %v2261_v23 = vadd.f32 %v2260_v9, %v2259_v60  ;;  %v7482_v63 = vadd.f32 %v7426_v34, %v7384_v36 }
 0x32e   : > { %v1593_v11 = vpop.permute.xlu2 %1592  ;;  %v2268_v48 = vsel %vm333_vm0, %v7470_v28, 0.0 }
 0x32f   : > { %v1463_v50 = vpop.permute.xlu1 %1462 }
 0x330   : > { %v1955_v43 = vsel %vm1931_vm7, %v1922_v38, %v1463_v50  ;;  %v1591_v25 = vpop.permute.xlu0 %1590 }
 0x331   : > { %v1988_v40 = vsel %vm1964_vm8, %v1955_v43, %v1591_v25  ;;  %v1799_v43 = vsel %vm422_vm1, %v9982_v24, %v9981_v55  ;;  %v9983_v25 = vld [vmem:[#allocation92_spill] sm:$0xff]  ;;  %vm4004_vm1 = vcmask 654336  }
 0x332   : > { %v2021_v14 = vsel %vm1997_vm9, %v1988_v40, %v1719_v1  ;;  %v1832_v37 = vsel %vm1800_vm4, %v1799_v43, %v9983_v25 }
 0x333   : > { %4918 = vmatmul.msk.f32.gmra.mxu0 %vm2039_vm10, %v2021_v14  ;;  %v1865_v40 = vsel %vm1833_vm5, %v1832_v37, %v9984_v46 }
 0x334   : > { %v1897_v56 = vsel %vm333_vm0, %v1865_v40, %v9985_v54 }
 0x336   : > { %v1733_v62 = vpop.permute.xlu2 %1732 }
 0x337   : > { %v1603_v2 = vpop.permute.xlu1 %1602 }
 0x338   : > { %v1994_v13 = vsel %vm1964_vm8, %v1961_v41, %v1603_v2  ;;  %v1731_v39 = vpop.permute.xlu0 %1730 }
 0x339   : > { %v2027_v10 = vsel %vm1997_vm9, %v1994_v13, %v1731_v39  ;;  %v2193_v39 = vpop.f32.mrf.mxu0 }
 0x33a   : > { %4924 = vmatmul.msk.f32.gmra.mxu3 %vm2039_vm10, %v2027_v10 }
 0x33e   : > { %v1607_v14 = vpop.permute.xlu2 %1606 }
 0x33f   : > { %v1337_v53 = vpop.permute.xlu1 %1336 }
 0x340   : > { %v1465_v6 = vpop.permute.xlu0 %1464  ;;  %v1923_v12 = vsel %vm1898_vm6, %v1890_v20, %v1337_v53 }
 0x341   : > { %v1956_v8 = vsel %vm1931_vm7, %v1923_v12, %v1465_v6  ;;  %v2196_v10 = vpop.f32.mrf.mxu0  ;;  %v7487_v12 = vadd.f32 %v7426_v34, %v2187_v45 }
 0x342   : > { %v1989_v49 = vsel %vm1964_vm8, %v1956_v8, %v1593_v11  ;;  %v7502_v45 = vadd.f32 %v7426_v34, %v2196_v10 }
 0x343   : > { %v2274_v36 = vsel %vm333_vm0, %v7487_v12, 0.0 }
 0x344   : > { %v2280_v46 = vsel %vm333_vm0, %v7502_v45, 0.0 }
 0x347   : > { %v1477_v47 = vpop.permute.xlu1 %1476 }
 0x348   : > { %v1962_v3 = vsel %vm1931_vm7, %v1929_v58, %v1477_v47  ;;  %v1605_v1 = vpop.permute.xlu0 %1604  ;;  %v2263_v58 = vadd.f32 %v2262_v59, %v2261_v23  ;;  %v7476_v47 = vadd.f32 %v7426_v34, %v7376_v57  ;;  %v2272_v57 = vsel %vm333_vm0, %v7482_v63, 0.0 }
 0x349   : > { %v1995_v35 = vsel %vm1964_vm8, %v1962_v3, %v1605_v1  ;;  %v2199_v11 = vpop.f32.mrf.mxu0 }
 0x34a   : > { %v2028_v19 = vsel %vm1997_vm9, %v1995_v35, %v1733_v62  ;;  %v2265_v62 = vadd.f32 %v2264_v52, %v2263_v58  ;;  %v2270_v1 = vsel %vm333_vm0, %v7476_v47, 0.0  ;;  %v7507_v25 = vadd.f32 %v7426_v34, %v2199_v11 }
 0x34b   : > { %4925 = vmatmul.msk.f32.gmra.mxu3 %vm2039_vm10, %v2028_v19  ;;  %v7492_v19 = vadd.f32 %v7426_v34, %v2190_v30 }
 0x34c   : > { %v2267_v20 = vadd.f32 %v2266_v31, %v2265_v62 }
 0x34e   : > { %v2269_v35 = vadd.f32 %v2268_v48, %v2267_v20 }
 0x34f   : > { %v1721_v38 = vpop.permute.xlu1 %1720 }
 0x350   : > { %v2022_v50 = vsel %vm1997_vm9, %v1989_v49, %v1721_v38  ;;  %v1351_v32 = vpop.permute.xlu0 %1350  ;;  %v2271_v8 = vadd.f32 %v2270_v1, %v2269_v35  ;;  %v7497_v49 = vadd.f32 %v7426_v34, %v2193_v39 }
 0x351   : > { %4919 = vmatmul.msk.f32.gmra.mxu0 %vm2039_vm10, %v2022_v50  ;;  %v1930_v17 = vsel %vm1898_vm6, %v1897_v56, %v1351_v32  ;;  %v2202_v53 = vpop.f32.mrf.mxu0  ;;  %v2276_v50 = vsel %vm333_vm0, %v7492_v19, 0.0  ;;  %v2282_v56 = vsel %vm333_vm0, %v7507_v25, 0.0 }
 0x352   : > { %v2273_v38 = vadd.f32 %v2272_v57, %v2271_v8  ;;  %v2278_v43 = vsel %vm333_vm0, %v7497_v49, 0.0  ;;  %v7512_v40 = vadd.f32 %v7426_v34, %v2202_v53 }
 0x354   : > { %v2275_v32 = vadd.f32 %v2274_v36, %v2273_v38 }
 0x356   : > { %v2277_v37 = vadd.f32 %v2276_v50, %v2275_v32 }
 0x357   : > { %v1479_v5 = vpop.permute.xlu1 %1478 }
 0x358   : > { %v1963_v61 = vsel %vm1931_vm7, %v1930_v17, %v1479_v5  ;;  %v1735_v41 = vpop.permute.xlu0 %1734  ;;  %v2279_v54 = vadd.f32 %v2278_v43, %v2277_v37  ;;  %v2284_v5 = vsel %vm333_vm0, %v7512_v40, 0.0 }
 0x359   : > { %v1996_v2 = vsel %vm1964_vm8, %v1963_v61, %v1607_v14  ;;  %v2205_v6 = vpop.f32.mrf.mxu0 }
 0x35a   : > { %v2029_v13 = vsel %vm1997_vm9, %v1996_v2, %v1735_v41  ;;  %v7517_v14 = vadd.f32 %v7426_v34, %v2205_v6  ;;  %v2281_v17 = vadd.f32 %v2280_v46, %v2279_v54 }
 0x35b   : > { %4926 = vmatmul.msk.f32.gmra.mxu3 %vm2039_vm10, %v2029_v13 }
 0x35c   : > { %v2283_v61 = vadd.f32 %v2282_v56, %v2281_v17  ;;  %v2286_v13 = vsel %vm333_vm0, %v7517_v14, 0.0 }
 0x35e   : > { %v2285_v10 = vadd.f32 %v2284_v5, %v2283_v61 }
 0x360   : > { %v2287_v6 = vadd.f32 %v2286_v13, %v2285_v10 }
 0x361   : > { %v2208_v27 = vpop.f32.mrf.mxu0 }
 0x362   : > { %v7522_v30 = vadd.f32 %v7426_v34, %v2208_v27 }
 0x364   : > { %v2288_v11 = vsel %vm333_vm0, %v7522_v30, 0.0 }
 0x365   : > { %v2289_v29 = vadd.f32 %v2288_v11, %v2287_v6 }
 0x369   : > { %v2211_v7 = vpop.f32.mrf.mxu0 }
 0x36a   : > { %v7527_v39 = vadd.f32 %v7426_v34, %v2211_v7 }
 0x36c   : > { %v2232_v3 = vpop.f32.mrf.mxu3  ;;  %v2290_v27 = vsel %vm333_vm0, %v7527_v39, 0.0 }
 0x36d   : > { %v2291_v44 = vadd.f32 %v2290_v27, %v2289_v29  ;;  %v7559_v57 = vadd.f32 %v7426_v34, %v2232_v3 }
 0x371   : > { %v2214_v42 = vpop.f32.mrf.mxu0 }
 0x372   : > { %v7532_v53 = vadd.f32 %v7426_v34, %v2214_v42 }
 0x374   : > { %v2292_v4 = vsel %vm333_vm0, %v7532_v53, 0.0 }
 0x375   : > { %v2293_v23 = vadd.f32 %v2292_v4, %v2291_v44 }
 0x379   : > { %v2217_v26 = vpop.f32.mrf.mxu0 }
 0x37a   : > { %v7537_v16 = vadd.f32 %v7426_v34, %v2217_v26 }
 0x37c   : > { %v2294_v42 = vsel %vm333_vm0, %v7537_v16, 0.0 }
 0x37d   : > { %v2235_v55 = vpop.f32.mrf.mxu3  ;;  %v2295_v31 = vadd.f32 %v2294_v42, %v2293_v23 }
 0x37e   : > { %v7565_v38 = vadd.f32 %v7426_v34, %v2235_v55 }
 0x380   : > { %v2306_v3 = vsel %vm333_vm0, %v7565_v38, 0.0 }
 0x38e   : > { %v2220_v24 = vpop.f32.mrf.mxu0  ;;  %v2238_v41 = vpop.f32.mrf.mxu3 }
 0x38f   : > { %v7542_v7 = vadd.f32 %v7426_v34, %v2220_v24  ;;  %v2304_v24 = vsel %vm333_vm0, %v7559_v57, 0.0  ;;  %v7572_v43 = vadd.f32 %v7426_v34, %v2238_v41 }
 0x391   : > { %v2296_v52 = vsel %vm333_vm0, %v7542_v7, 0.0  ;;  %v2308_v56 = vsel %vm333_vm0, %v7572_v43, 0.0 }
 0x392   : > { %v2297_v48 = vadd.f32 %v2296_v52, %v2295_v31 }
 0x39f   : > { %v2223_v2 = vpop.f32.mrf.mxu0 }
 0x3a0   : > { %v7547_v59 = vadd.f32 %v7426_v34, %v2223_v2 }
 0x3a2   : > { %v2298_v62 = vsel %vm333_vm0, %v7547_v59, 0.0 }
 0x3a3   : > { %v2299_v26 = vadd.f32 %v2298_v62, %v2297_v48 }
 0x3ac   : > { %v2241_v9 = vpop.f32.mrf.mxu3 }
 0x3ad   : > { %v7577_v46 = vadd.f32 %v7426_v34, %v2241_v9 }
 0x3af   : > { %v2310_v61 = vsel %vm333_vm0, %v7577_v46, 0.0 }
 0x3b0   : > { %v2226_v60 = vpop.f32.mrf.mxu0 }
 0x3b1   : > { %v7552_v58 = vadd.f32 %v7426_v34, %v2226_v60 }
 0x3b3   : > { %v2300_v20 = vsel %vm333_vm0, %v7552_v58, 0.0 }
 0x3b4   : > { %v2301_v36 = vadd.f32 %v2300_v20, %v2299_v26 }
 0x3bd   : > { %v2244_v1 = vpop.f32.mrf.mxu3 }
 0x3be   : > { %v7582_v17 = vadd.f32 %v7426_v34, %v2244_v1 }
 0x3c0   : > { %v2312_v2 = vsel %vm333_vm0, %v7582_v17, 0.0 }
 0x3ce   : > { %v2229_v35 = vpop.f32.mrf.mxu0  ;;  %v2247_v55 = vpop.f32.mrf.mxu3 }
 0x3cf   : > { %v7562_v8 = vadd.f32 %v7426_v34, %v2229_v35  ;;  %v7589_v13 = vadd.f32 %v7426_v34, %v2247_v55 }
 0x3d1   : > { %v2302_v50 = vsel %vm333_vm0, %v7562_v8, 0.0  ;;  %v2314_v6 = vsel %vm333_vm0, %v7589_v13, 0.0 }
 0x3d2   : > { %v2303_v32 = vadd.f32 %v2302_v50, %v2301_v36 }
 0x3d4   : > { %v2305_v37 = vadd.f32 %v2304_v24, %v2303_v32 }
 0x3d6   : > { %v2307_v54 = vadd.f32 %v2306_v3, %v2305_v37 }
 0x3d8   : > { %v2309_v5 = vadd.f32 %v2308_v56, %v2307_v54 }
 0x3da   : > { %v2311_v41 = vadd.f32 %v2310_v61, %v2309_v5 }
 0x3dc   : > { %v2313_v10 = vadd.f32 %v2312_v2, %v2311_v41 }
 0x3de   : > { %v2250_v11 = vpop.f32.mrf.mxu3  ;;  %v2315_v29 = vadd.f32 %v2314_v6, %v2313_v10 }
 0x3df   : > { %v7594_v27 = vadd.f32 %v7426_v34, %v2250_v11 }
 0x3e1   : > { %v2316_v4 = vsel %vm333_vm0, %v7594_v27, 0.0 }
 0x3e2   : > { %v2317_v44 = vadd.f32 %v2316_v4, %v2315_v29 }
 0x3e4   : > { %v2318_v9 = vrot.slane %v2317_v44, 4 }
 0x3e6   : > { %v2319_v60 = vadd.f32 %v2318_v9, %v2317_v44 }
 0x3e8   : > { %v2320_v42 = vrot.slane %v2319_v60, 2 }
 0x3ea   : > { %v2321_v23 = vadd.f32 %v2320_v42, %v2319_v60 }
 0x3ec   : > { %v2322_v52 = vrot.slane %v2321_v23, 1 }
 0x3ee   : > { %v2323_v31 = vadd.f32 %v2322_v52, %v2321_v23 }
 0x3f0   : > { %v7598_v62 = vmul.f32 0.00390625, %v2323_v31 }
 0x3f2   : > { %v7602_v48 = vsub.f32 %v7434_v18, %v7598_v62  ;;  %v7606_v34 = vsub.f32 %v7430_v33, %v7598_v62  ;;  %v7610_v20 = vsub.f32 %v7438_v51, %v7598_v62  ;;  %v7614_v26 = vsub.f32 %v7444_v0, %v7598_v62 }
 0x3f3   : > { %v7622_v18 = vsub.f32 %v7452_v21, %v7598_v62  ;;  %v7628_v51 = vsub.f32 %v7458_v22, %v7598_v62  ;;  %v7636_v24 = vsub.f32 %v7464_v15, %v7598_v62  ;;  %v7643_v22 = vsub.f32 %v7470_v28, %v7598_v62 }
 0x3f4   : > { %v2357_v1 = vmul.f32 %v7602_v48, %v7602_v48  ;;  %v2358_v35 = vmul.f32 %v7606_v34, %v7606_v34  ;;  %v2359_v33 = vmul.f32 %v7610_v20, %v7610_v20  ;;  %v2360_v0 = vmul.f32 %v7614_v26, %v7614_v26 }
 0x3f5   : > { %v2361_v21 = vmul.f32 %v7622_v18, %v7622_v18  ;;  %v2362_v54 = vmul.f32 %v7628_v51, %v7628_v51  ;;  %v7650_v15 = vsub.f32 %v7476_v47, %v7598_v62  ;;  %v2363_v5 = vmul.f32 %v7636_v24, %v7636_v24 }
 0x3f6   : > { %v2389_v36 = vsel %vm333_vm0, %v2357_v1, 0.0  ;;  %v2390_v50 = vsel %vm333_vm0, %v2358_v35, 0.0  ;;  %v2392_v37 = vsel %vm333_vm0, %v2359_v33, 0.0  ;;  %v2394_v55 = vsel %vm333_vm0, %v2360_v0, 0.0 }
 0x3f7   : > { %v2391_v32 = vadd.f32 %v2390_v50, %v2389_v36  ;;  %v2396_v61 = vsel %vm333_vm0, %v2361_v21, 0.0  ;;  %v7657_v28 = vsub.f32 %v7482_v63, %v7598_v62  ;;  %v2364_v2 = vmul.f32 %v7643_v22, %v7643_v22 }
 0x3f8   : > { %v2398_v10 = vsel %vm333_vm0, %v2362_v54, 0.0  ;;  %v7664_v47 = vsub.f32 %v7487_v12, %v7598_v62  ;;  %v2365_v6 = vmul.f32 %v7650_v15, %v7650_v15  ;;  %v2400_v29 = vsel %vm333_vm0, %v2363_v5, 0.0 }
 0x3f9   : > { %v2393_v3 = vadd.f32 %v2392_v37, %v2391_v32  ;;  %v7671_v63 = vsub.f32 %v7492_v19, %v7598_v62  ;;  %v2366_v44 = vmul.f32 %v7657_v28, %v7657_v28  ;;  %v2402_v9 = vsel %vm333_vm0, %v2364_v2, 0.0 }
 0x3fa   : > { %v7678_v12 = vsub.f32 %v7497_v49, %v7598_v62  ;;  %v2367_v42 = vmul.f32 %v7664_v47, %v7664_v47  ;;  %v2404_v23 = vsel %vm333_vm0, %v2365_v6, 0.0  ;;  %v7685_v19 = vsub.f32 %v7502_v45, %v7598_v62 }
 0x3fb   : > { %v2395_v56 = vadd.f32 %v2394_v55, %v2393_v3  ;;  %v2368_v31 = vmul.f32 %v7671_v63, %v7671_v63  ;;  %v2406_v1 = vsel %vm333_vm0, %v2366_v44, 0.0  ;;  %v7692_v49 = vsub.f32 %v7507_v25, %v7598_v62 }
 0x3fc   : > { %v2369_v33 = vmul.f32 %v7678_v12, %v7678_v12  ;;  %v2408_v0 = vsel %vm333_vm0, %v2367_v42, 0.0  ;;  %v7699_v45 = vsub.f32 %v7512_v40, %v7598_v62  ;;  %v2370_v50 = vmul.f32 %v7685_v19, %v7685_v19 }
 0x3fd   : > { %v2397_v41 = vadd.f32 %v2396_v61, %v2395_v56  ;;  %v2410_v32 = vsel %vm333_vm0, %v2368_v31, 0.0  ;;  %v7706_v25 = vsub.f32 %v7517_v14, %v7598_v62  ;;  %v2371_v37 = vmul.f32 %v7692_v49, %v7692_v49 }
 0x3fe   : > { %v2412_v3 = vsel %vm333_vm0, %v2369_v33, 0.0  ;;  %v7713_v40 = vsub.f32 %v7522_v30, %v7598_v62  ;;  %v2372_v55 = vmul.f32 %v7699_v45, %v7699_v45  ;;  %v2414_v56 = vsel %vm333_vm0, %v2370_v50, 0.0 }
 0x3ff   : > { %v2399_v11 = vadd.f32 %v2398_v10, %v2397_v41  ;;  %v7720_v14 = vsub.f32 %v7527_v39, %v7598_v62  ;;  %v2373_v61 = vmul.f32 %v7706_v25, %v7706_v25  ;;  %v2416_v41 = vsel %vm333_vm0, %v2371_v37, 0.0 }
 0x400   : > { %v7727_v30 = vsub.f32 %v7532_v53, %v7598_v62  ;;  %v2374_v10 = vmul.f32 %v7713_v40, %v7713_v40  ;;  %v7734_v39 = vsub.f32 %v7537_v16, %v7598_v62  ;;  %v7741_v53 = vsub.f32 %v7542_v7, %v7598_v62 }
 0x401   : > { %v2401_v4 = vadd.f32 %v2400_v29, %v2399_v11  ;;  %v2418_v11 = vsel %vm333_vm0, %v2372_v55, 0.0  ;;  %v2375_v29 = vmul.f32 %v7720_v14, %v7720_v14  ;;  %v7748_v16 = vsub.f32 %v7547_v59, %v7598_v62 }
 0x402   : > { %v7755_v7 = vsub.f32 %v7552_v58, %v7598_v62  ;;  %v7762_v59 = vsub.f32 %v7562_v8, %v7598_v62  ;;  %v7769_v58 = vsub.f32 %v7559_v57, %v7598_v62  ;;  %v7776_v8 = vsub.f32 %v7565_v38, %v7598_v62 }
 0x403   : > { %v2403_v60 = vadd.f32 %v2402_v9, %v2401_v4  ;;  %v2420_v4 = vsel %vm333_vm0, %v2373_v61, 0.0  ;;  %v2376_v9 = vmul.f32 %v7727_v30, %v7727_v30  ;;  %v7783_v57 = vsub.f32 %v7572_v43, %v7598_v62 }
 0x404   : > { %v7790_v38 = vsub.f32 %v7577_v46, %v7598_v62  ;;  %v7797_v43 = vsub.f32 %v7582_v17, %v7598_v62  ;;  %v7804_v46 = vsub.f32 %v7589_v13, %v7598_v62  ;;  %v2356_v17 = vsub.f32 %v7594_v27, %v7598_v62 }
 0x405   : > { %v2405_v52 = vadd.f32 %v2404_v23, %v2403_v60  ;;  %v2422_v60 = vsel %vm333_vm0, %v2374_v10, 0.0  ;;  %v2377_v23 = vmul.f32 %v7734_v39, %v7734_v39 }
 0x407   : > { %v2407_v35 = vadd.f32 %v2406_v1, %v2405_v52  ;;  %v2424_v52 = vsel %vm333_vm0, %v2375_v29, 0.0  ;;  %v2378_v1 = vmul.f32 %v7741_v53, %v7741_v53 }
 0x409   : > { %v2409_v36 = vadd.f32 %v2408_v0, %v2407_v35  ;;  %v2426_v35 = vsel %vm333_vm0, %v2376_v9, 0.0  ;;  %v2379_v0 = vmul.f32 %v7748_v16, %v7748_v16 }
 0x40b   : > { %v2411_v21 = vadd.f32 %v2410_v32, %v2409_v36  ;;  %v2428_v36 = vsel %vm333_vm0, %v2377_v23, 0.0  ;;  %v2380_v32 = vmul.f32 %v7755_v7, %v7755_v7 }
 0x40d   : > { %v2413_v54 = vadd.f32 %v2412_v3, %v2411_v21  ;;  %v2430_v21 = vsel %vm333_vm0, %v2378_v1, 0.0  ;;  %v2381_v3 = vmul.f32 %v7762_v59, %v7762_v59  ;;  %v2388_v1 = vmul.f32 %v2356_v17, %v2356_v17 }
 0x40f   : > { %v2415_v5 = vadd.f32 %v2414_v56, %v2413_v54  ;;  %v2432_v54 = vsel %vm333_vm0, %v2379_v0, 0.0  ;;  %v2382_v56 = vmul.f32 %v7769_v58, %v7769_v58  ;;  %v2450_v27 = vsel %vm333_vm0, %v2388_v1, 0.0 }
 0x411   : > { %v2417_v2 = vadd.f32 %v2416_v41, %v2415_v5  ;;  %v2434_v5 = vsel %vm333_vm0, %v2380_v32, 0.0  ;;  %v2383_v41 = vmul.f32 %v7776_v8, %v7776_v8 }
 0x413   : > { %v2419_v6 = vadd.f32 %v2418_v11, %v2417_v2  ;;  %v2436_v2 = vsel %vm333_vm0, %v2381_v3, 0.0  ;;  %v2384_v11 = vmul.f32 %v7783_v57, %v7783_v57 }
 0x415   : > { %v2421_v44 = vadd.f32 %v2420_v4, %v2419_v6  ;;  %v2438_v6 = vsel %vm333_vm0, %v2382_v56, 0.0  ;;  %v2385_v4 = vmul.f32 %v7790_v38, %v7790_v38  ;;  %v2723_v56 = vld [vmem:[#allocation2 + $0x9] sm:$0xff] }
 0x417   : > { %v2423_v42 = vadd.f32 %v2422_v60, %v2421_v44  ;;  %v2440_v44 = vsel %vm333_vm0, %v2383_v41, 0.0  ;;  %v2386_v60 = vmul.f32 %v7797_v43, %v7797_v43  ;;  %v2444_v13 = vsel %vm333_vm0, %v2385_v4, 0.0 }
 0x419   : > { %v2425_v31 = vadd.f32 %v2424_v52, %v2423_v42  ;;  %v2442_v42 = vsel %vm333_vm0, %v2384_v11, 0.0  ;;  %v2387_v52 = vmul.f32 %v7804_v46, %v7804_v46 }
 0x41b   : > { %v2427_v33 = vadd.f32 %v2426_v35, %v2425_v31  ;;  %v2446_v35 = vsel %vm333_vm0, %v2386_v60, 0.0  ;;  %v2448_v0 = vsel %vm333_vm0, %v2387_v52, 0.0  ;;  %v7830_v60 = vld [vmem:[%s9655_s3] ss:$0 sm:$0xff] }
 0x41d   : > { %v2429_v50 = vadd.f32 %v2428_v36, %v2427_v33 }
 0x41f   : > { %v2431_v37 = vadd.f32 %v2430_v21, %v2429_v50 }
 0x421   : > { %v2433_v55 = vadd.f32 %v2432_v54, %v2431_v37 }
 0x423   : > { %v2435_v61 = vadd.f32 %v2434_v5, %v2433_v55  ;;  %v2722_v55 = vld [vmem:[#allocation2 + $0x1] sm:$0xff] }
 0x424   : > { %v5008_v5 = vpack.i.bf16 %v2723_v56, %v2722_v55 }
 0x425   : > { %v2437_v10 = vadd.f32 %v2436_v2, %v2435_v61  ;;  %v4120_v2 = vld [vmem:[%s9657_s5 + $0x88] sm:$0xff] }
 0x426   : > { %5009 = vrot.lane.b32.xlu1 %v5008_v5, %s5577_s18  ;;  %4348 = vmatpush.msra.mxu2 %v4120_v2 }
 0x427   : > { %v2439_v29 = vadd.f32 %v2438_v6, %v2437_v10 }
 0x429   : > { %v2441_v9 = vadd.f32 %v2440_v44, %v2439_v29  ;;  %v4119_v29 = vld [vmem:[%s9657_s5 + $0x80] sm:$0xff] }
 0x42a   : > { %4349 = vmatpush.msra.mxu2 %v4119_v29 }
 0x42b   : > { %v2443_v23 = vadd.f32 %v2442_v42, %v2441_v9 }
 0x42d   : > { %v2445_v31 = vadd.f32 %v2444_v13, %v2443_v23  ;;  %v7837_v23 = vld [vmem:[%s9656_s4] ss:$0 sm:$0xff] }
 0x42f   : > { %v2447_v33 = vadd.f32 %v2446_v35, %v2445_v31 }
 0x431   : > { %v2449_v36 = vadd.f32 %v2448_v0, %v2447_v33 }
 0x433   : > { %v2451_v62 = vadd.f32 %v2450_v27, %v2449_v36 }
 0x435   : > { %v2452_v50 = vrot.slane %v2451_v62, 4 }
 0x437   : > { %v2453_v32 = vadd.f32 %v2452_v50, %v2451_v62 }
 0x439   : > { %v2454_v21 = vrot.slane %v2453_v32, 2 }
 0x43b   : > { %v2455_v37 = vadd.f32 %v2454_v21, %v2453_v32 }
 0x43d   : > { %v2456_v3 = vrot.slane %v2455_v37, 1 }
 0x43f   : > { %v2457_v54 = vadd.f32 %v2456_v3, %v2455_v37 }
 0x441   : > { %v2458_v61 = vmul.f32 0.00390625, %v2457_v54 }
 0x443   : > { %v2459_v41 = vadd.f32 1e-05, %v2458_v61 }
 0x445   : > { %5559 = vrsqrt.f32 %v2459_v41  ;;  %vm2466_vm12 = vweird.f32 %v2459_v41 }
 0x44b   : > { %v5560_v10 = vpop.eup %5559 }
 0x44c   : > { %v2461_v11 = vmul.f32 %v5560_v10, %v2459_v41  ;;  %vm2467_vm11 = vweird.f32 %v5560_v10 }
 0x44d   : > { %vm2468_vm13 = vmor %vm2466_vm12, %vm2467_vm11 }
 0x44e   : > { %v2462_v6 = vmul.f32 %v5560_v10, %v2461_v11 }
 0x450   : > { %v2463_v4 = vmul.f32 0.5, %v2462_v6 }
 0x452   : > { %v2464_v44 = vsub.f32 1.5, %v2463_v4 }
 0x454   : > { %v2465_v9 = vmul.f32 %v5560_v10, %v2464_v44 }
 0x456   : > { %v7832_v42 = vsel %vm2468_vm13, %v5560_v10, %v2465_v9 }
 0x457   : > { %v2501_v52 = vmul.f32 %v7832_v42, %v2356_v17  ;;  %v2470_v35 = vmul.f32 %v7832_v42, %v7602_v48  ;;  %v2472_v33 = vmul.f32 %v7832_v42, %v7610_v20  ;;  %v2471_v0 = vmul.f32 %v7832_v42, %v7606_v34 }
 0x458   : > { %v2473_v36 = vmul.f32 %v7832_v42, %v7614_v26  ;;  %v2474_v17 = vmul.f32 %v7832_v42, %v7622_v18  ;;  %v2475_v27 = vmul.f32 %v7832_v42, %v7628_v51  ;;  %v2476_v62 = vmul.f32 %v7832_v42, %v7636_v24 }
 0x459   : > { %v2536_v13 = vmul.f32 %v7830_v60, %v2501_v52  ;;  %v2505_v48 = vmul.f32 %v7830_v60, %v2470_v35  ;;  %v2507_v50 = vmul.f32 %v7830_v60, %v2472_v33  ;;  %v2477_v20 = vmul.f32 %v7832_v42, %v7643_v22 }
 0x45a   : > { %v2506_v34 = vmul.f32 %v7830_v60, %v2471_v0  ;;  %v2508_v26 = vmul.f32 %v7830_v60, %v2473_v36  ;;  %v2478_v18 = vmul.f32 %v7832_v42, %v7650_v15  ;;  %v2479_v51 = vmul.f32 %v7832_v42, %v7657_v28 }
 0x45b   : > { %v2571_v31 = vadd.f32 %v7837_v23, %v2536_v13  ;;  %v2509_v32 = vmul.f32 %v7830_v60, %v2474_v17  ;;  %v2480_v24 = vmul.f32 %v7832_v42, %v7664_v47  ;;  %v2481_v21 = vmul.f32 %v7832_v42, %v7671_v63 }
 0x45c   : > { %v2482_v22 = vmul.f32 %v7832_v42, %v7678_v12  ;;  %v2510_v37 = vmul.f32 %v7830_v60, %v2475_v27  ;;  %v2483_v3 = vmul.f32 %v7832_v42, %v7685_v19  ;;  %v2511_v15 = vmul.f32 %v7830_v60, %v2476_v62 }
 0x45d   : > { %v2603_v1 = vmax.f32 %v2571_v31, 0.0  ;;  %v2540_v28 = vadd.f32 %v7837_v23, %v2505_v48  ;;  %v2542_v54 = vadd.f32 %v7837_v23, %v2507_v50  ;;  %v2484_v47 = vmul.f32 %v7832_v42, %v7692_v49 }
 0x45e   : > { %v2512_v55 = vmul.f32 %v7830_v60, %v2477_v20  ;;  %v2541_v63 = vadd.f32 %v7837_v23, %v2506_v34  ;;  %v2543_v12 = vadd.f32 %v7837_v23, %v2508_v26  ;;  %v2485_v56 = vmul.f32 %v7832_v42, %v7699_v45 }
 0x45f   : > { %2689 = vst.msk [vmem:[#allocation2 + $0x189] sm:$0xff] %vm333_vm0, %v2603_v1  ;;  %v2486_v19 = vmul.f32 %v7832_v42, %v7706_v25  ;;  %v2513_v5 = vmul.f32 %v7830_v60, %v2478_v18  ;;  %v2544_v61 = vadd.f32 %v7837_v23, %v2509_v32  ;;  %v2487_v41 = vmul.f32 %v7832_v42, %v7713_v40 }
 0x460   : > { %v2488_v49 = vmul.f32 %v7832_v42, %v7720_v14  ;;  %v2514_v2 = vmul.f32 %v7830_v60, %v2479_v51  ;;  %v2545_v10 = vadd.f32 %v7837_v23, %v2510_v37  ;;  %v2515_v11 = vmul.f32 %v7830_v60, %v2480_v24 }
 0x461   : > { %v2546_v45 = vadd.f32 %v7837_v23, %v2511_v15  ;;  %v2572_v6 = vmax.f32 %v2540_v28, 0.0  ;;  %v2574_v25 = vmax.f32 %v2542_v54, 0.0  ;;  %v2516_v29 = vmul.f32 %v7830_v60, %v2481_v21 }
 0x462   : > { %v2547_v4 = vadd.f32 %v7837_v23, %v2512_v55  ;;  %v2573_v44 = vmax.f32 %v2541_v63, 0.0  ;;  %v2575_v9 = vmax.f32 %v2543_v12, 0.0  ;;  %v2489_v40 = vmul.f32 %v7832_v42, %v7727_v30 }
 0x463   : > { %v2517_v14 = vmul.f32 %v7830_v60, %v2482_v22  ;;  %v2548_v52 = vadd.f32 %v7837_v23, %v2513_v5  ;;  %v2576_v13 = vmax.f32 %v2544_v61, 0.0  ;;  %2660 = vst.msk [vmem:[#allocation2 + $0x31] sm:$0xff] %vm333_vm0, %v2574_v25  ;;  %v2490_v31 = vmul.f32 %v7832_v42, %v7734_v39 }
 0x464   : > { %v2518_v1 = vmul.f32 %v7830_v60, %v2483_v3  ;;  %v2549_v35 = vadd.f32 %v7837_v23, %v2514_v2  ;;  %v2577_v33 = vmax.f32 %v2545_v10, 0.0  ;;  %2661 = vst.msk [vmem:[#allocation2 + $0x39] sm:$0xff] %vm333_vm0, %v2575_v9  ;;  %v2491_v30 = vmul.f32 %v7832_v42, %v7741_v53 }
 0x465   : > { %v2519_v0 = vmul.f32 %v7830_v60, %v2484_v47  ;;  %v2550_v36 = vadd.f32 %v7837_v23, %v2515_v11  ;;  %v2578_v17 = vmax.f32 %v2546_v45, 0.0  ;;  %2658 = vst.msk [vmem:[#allocation2 + $0x19] sm:$0xff] %vm333_vm0, %v2572_v6  ;;  %v2492_v39 = vmul.f32 %v7832_v42, %v7748_v16 }
 0x466   : > { %v2520_v27 = vmul.f32 %v7830_v60, %v2485_v56  ;;  %v2551_v62 = vadd.f32 %v7837_v23, %v2516_v29  ;;  %v2579_v48 = vmax.f32 %v2547_v4, 0.0  ;;  %2659 = vst.msk [vmem:[#allocation2 + $0x21] sm:$0xff] %vm333_vm0, %v2573_v44  ;;  %v2493_v53 = vmul.f32 %v7832_v42, %v7755_v7 }
 0x467   : > { %v2521_v50 = vmul.f32 %v7830_v60, %v2486_v19  ;;  %v2552_v20 = vadd.f32 %v7837_v23, %v2517_v14  ;;  %v2580_v34 = vmax.f32 %v2548_v52, 0.0  ;;  %2662 = vst.msk [vmem:[#allocation2 + $0x49] sm:$0xff] %vm333_vm0, %v2576_v13  ;;  %v2494_v16 = vmul.f32 %v7832_v42, %v7762_v59 }
 0x468   : > { %v2522_v26 = vmul.f32 %v7830_v60, %v2487_v41  ;;  %v2553_v18 = vadd.f32 %v7837_v23, %v2518_v1  ;;  %v2581_v51 = vmax.f32 %v2549_v35, 0.0  ;;  %2663 = vst.msk [vmem:[#allocation2 + $0x51] sm:$0xff] %vm333_vm0, %v2577_v33  ;;  %v2495_v7 = vmul.f32 %v7832_v42, %v7769_v58 }
 0x469   : > { %v2523_v32 = vmul.f32 %v7830_v60, %v2488_v49  ;;  %v2554_v24 = vadd.f32 %v7837_v23, %v2519_v0  ;;  %v2582_v21 = vmax.f32 %v2550_v36, 0.0  ;;  %2664 = vst.msk [vmem:[#allocation2 + $0x61] sm:$0xff] %vm333_vm0, %v2578_v17  ;;  %v2496_v59 = vmul.f32 %v7832_v42, %v7776_v8 }
 0x46a   : > { %v2524_v22 = vmul.f32 %v7830_v60, %v2489_v40  ;;  %v2555_v37 = vadd.f32 %v7837_v23, %v2520_v27  ;;  %v2583_v3 = vmax.f32 %v2551_v62, 0.0  ;;  %2665 = vst.msk [vmem:[#allocation2 + $0x69] sm:$0xff] %vm333_vm0, %v2579_v48  ;;  %v2726_v15 = vld [vmem:[#allocation2 + $0x31] sm:$0xff]  ;;  %v2497_v58 = vmul.f32 %v7832_v42, %v7783_v57 }
 0x46b   : > { %v2525_v28 = vmul.f32 %v7830_v60, %v2490_v31  ;;  %v2556_v54 = vadd.f32 %v7837_v23, %v2521_v50  ;;  %v2584_v47 = vmax.f32 %v2552_v20, 0.0  ;;  %v7945_v55 = vld [vmem:[#allocation2 + $0x32] sm:$0xff]  ;;  %2666 = vst.msk [vmem:[#allocation2 + $0x79] sm:$0xff] %vm333_vm0, %v2580_v34  ;;  %v2526_v63 = vmul.f32 %v7830_v60, %v2491_v30  ;;  %v7989_v36 = vld [vmem:[#allocation2 + $0x3a] sm:$0xff] }
 0x46c   : > { %v2727_v8 = vld [vmem:[#allocation2 + $0x39] sm:$0xff]  ;;  %v2557_v12 = vadd.f32 %v7837_v23, %v2522_v26  ;;  %v2585_v56 = vmax.f32 %v2553_v18, 0.0  ;;  %4927 = vmatmul.msk.f32.vlgmr.msra.gmra.mxu2 %vm333_vm0, %v7945_v55  ;;  %2667 = vst.msk [vmem:[#allocation2 + $0x81] sm:$0xff] %vm333_vm0, %v2581_v51  ;;  %v2498_v5 = vmul.f32 %v7832_v42, %v7790_v38  ;;  %v2527_v61 = vmul.f32 %v7830_v60, %v2492_v39 }
 0x46d   : > { %v7953_v57 = vpack.i.bf16 %v2727_v8, %v2726_v15  ;;  %v2724_v19 = vld [vmem:[#allocation2 + $0x19] sm:$0xff]  ;;  %v2558_v41 = vadd.f32 %v7837_v23, %v2523_v32  ;;  %v2586_v49 = vmax.f32 %v2554_v24, 0.0  ;;  %2668 = vst.msk [vmem:[#allocation2 + $0x91] sm:$0xff] %vm333_vm0, %v2582_v21  ;;  %v2725_v2 = vld [vmem:[#allocation2 + $0x21] sm:$0xff]  ;;  %v2528_v10 = vmul.f32 %v7830_v60, %v2493_v53 }
 0x46e   : > { %v2559_v11 = vadd.f32 %v7837_v23, %v2524_v22  ;;  %v2587_v45 = vmax.f32 %v2555_v37, 0.0  ;;  %2669 = vst.msk [vmem:[#allocation2 + $0x99] sm:$0xff] %vm333_vm0, %v2583_v3  ;;  %v2728_v6 = vld [vmem:[#allocation2 + $0x49] sm:$0xff]  ;;  %v7965_v38 = vpack.i.bf16 %v2725_v2, %v2724_v19  ;;  %v2499_v25 = vmul.f32 %v7832_v42, %v7797_v43 }
 0x46f   : > { %5019 = vrot.lane.b32.xlu0 %v7953_v57, %s5577_s18  ;;  %v2529_v29 = vmul.f32 %v7830_v60, %v2494_v16  ;;  %v2560_v4 = vadd.f32 %v7837_v23, %v2525_v28  ;;  %v2588_v44 = vmax.f32 %v2556_v54, 0.0  ;;  %2670 = vst.msk [vmem:[#allocation2 + $0xa9] sm:$0xff] %vm333_vm0, %v2584_v47  ;;  %v2729_v9 = vld [vmem:[#allocation2 + $0x51] sm:$0xff]  ;;  %v2530_v40 = vmul.f32 %v7830_v60, %v2495_v7 }
 0x470   : > { %v2561_v14 = vadd.f32 %v7837_v23, %v2526_v63  ;;  %v2589_v52 = vmax.f32 %v2557_v12, 0.0  ;;  %2671 = vst.msk [vmem:[#allocation2 + $0xb1] sm:$0xff] %vm333_vm0, %v2585_v56  ;;  %v7975_v13 = vpack.i.bf16 %v2729_v9, %v2728_v6  ;;  %5014 = vrot.lane.b32.xlu2 %v7965_v38, %s5577_s18  ;;  %v2500_v43 = vmul.f32 %v7832_v42, %v7804_v46  ;;  %v2730_v62 = vld [vmem:[#allocation2 + $0x61] sm:$0xff]  ;;  %v8027_v63 = vld [vmem:[#allocation2 + $0x4a] sm:$0xff] }
 0x471   : > { %v2531_v31 = vmul.f32 %v7830_v60, %v2496_v59  ;;  %v2562_v1 = vadd.f32 %v7837_v23, %v2527_v61  ;;  %v2590_v35 = vmax.f32 %v2558_v41, 0.0  ;;  %2672 = vst.msk [vmem:[#allocation2 + $0xc1] sm:$0xff] %vm333_vm0, %v2586_v49  ;;  %v2532_v33 = vmul.f32 %v7830_v60, %v2497_v58  ;;  %v2731_v48 = vld [vmem:[#allocation2 + $0x69] sm:$0xff] }
 0x472   : > { %v2563_v30 = vadd.f32 %v7837_v23, %v2528_v10  ;;  %v2591_v0 = vmax.f32 %v2559_v11, 0.0  ;;  %2673 = vst.msk [vmem:[#allocation2 + $0xc9] sm:$0xff] %vm333_vm0, %v2587_v45  ;;  %5024 = vrot.lane.b32.xlu1 %v7975_v13, %s5577_s18  ;;  %v7991_v46 = vld [vmem:[#allocation2 + $0x79] sm:$0xff]  ;;  %v2533_v42 = vmul.f32 %v7830_v60, %v2498_v5  ;;  %v2564_v17 = vadd.f32 %v7837_v23, %v2529_v29 }
 0x473   : > { %v2592_v39 = vmax.f32 %v2560_v4, 0.0  ;;  %2674 = vst.msk [vmem:[#allocation2 + $0xd9] sm:$0xff] %vm333_vm0, %v2588_v44  ;;  %v7996_v27 = vld [vmem:[#allocation2 + $0x81] sm:$0xff]  ;;  %v2534_v53 = vmul.f32 %v7830_v60, %v2499_v25  ;;  %v2565_v50 = vadd.f32 %v7837_v23, %v2530_v40  ;;  %v2593_v20 = vmax.f32 %v2561_v14, 0.0  ;;  %v2949_v29 = vld [vmem:[#allocation2 + $0x52] sm:$0xff] }
 0x474   : > { %2675 = vst.msk [vmem:[#allocation2 + $0xe1] sm:$0xff] %vm333_vm0, %v2589_v52  ;;  %4928 = vmatmul.msk.f32.gmra.mxu2 %vm333_vm0, %v7989_v36  ;;  %v8005_v34 = vpack.i.bf16 %v7996_v27, %v7991_v46  ;;  %v2535_v16 = vmul.f32 %v7830_v60, %v2500_v43  ;;  %v2566_v26 = vadd.f32 %v7837_v23, %v2531_v31  ;;  %v2594_v18 = vmax.f32 %v2562_v1, 0.0  ;;  %v2734_v51 = vld [vmem:[#allocation2 + $0x91] sm:$0xff] }
 0x475   : > { %2676 = vst.msk [vmem:[#allocation2 + $0xf1] sm:$0xff] %vm333_vm0, %v2590_v35  ;;  %v2735_v7 = vld [vmem:[#allocation2 + $0x99] sm:$0xff]  ;;  %v2567_v32 = vadd.f32 %v7837_v23, %v2532_v33  ;;  %v2595_v24 = vmax.f32 %v2563_v30, 0.0  ;;  %v8014_v21 = vpack.i.bf16 %v2731_v48, %v2730_v62  ;;  %v2568_v59 = vadd.f32 %v7837_v23, %v2533_v42 }
 0x476   : > { %2677 = vst.msk [vmem:[#allocation2 + $0xf9] sm:$0xff] %vm333_vm0, %v2591_v0  ;;  %v2596_v60 = vmax.f32 %v2564_v17, 0.0  ;;  %v2569_v22 = vadd.f32 %v7837_v23, %v2534_v53  ;;  %v2597_v37 = vmax.f32 %v2565_v50, 0.0  ;;  %v5038_v3 = vpack.i.bf16 %v2735_v7, %v2734_v51  ;;  %v2736_v12 = vld [vmem:[#allocation2 + $0xa9] sm:$0xff] }
 0x477   : > { %5034 = vrot.lane.b32.xlu0 %v8005_v34, %s5577_s18  ;;  %2678 = vst.msk [vmem:[#allocation2 + $0x109] sm:$0xff] %vm333_vm0, %v2592_v39  ;;  %v2570_v15 = vadd.f32 %v7837_v23, %v2535_v16  ;;  %v2598_v58 = vmax.f32 %v2566_v26, 0.0  ;;  %v2599_v47 = vmax.f32 %v2567_v32, 0.0  ;;  %v2600_v8 = vmax.f32 %v2568_v59, 0.0  ;;  %v8029_v56 = vld [vmem:[#allocation2 + $0xb1] sm:$0xff]  ;;  %v2950_v17 = vld [vmem:[#allocation2 + $0x62] sm:$0xff] }
 0x478   : > { %2679 = vst.msk [vmem:[#allocation2 + $0x111] sm:$0xff] %vm333_vm0, %v2593_v20  ;;  %5029 = vrot.lane.b32.xlu2 %v8014_v21, %s5577_s18  ;;  %v2738_v28 = vld [vmem:[#allocation2 + $0xc1] sm:$0xff]  ;;  %v2601_v19 = vmax.f32 %v2569_v22, 0.0  ;;  %v5043_v49 = vpack.i.bf16 %v8029_v56, %v2736_v12 }
 0x479   : > { %2680 = vst.msk [vmem:[#allocation2 + $0x121] sm:$0xff] %vm333_vm0, %v2594_v18  ;;  %v2739_v54 = vld [vmem:[#allocation2 + $0xc9] sm:$0xff]  ;;  %v2602_v5 = vmax.f32 %v2570_v15, 0.0  ;;  %v2756_v20 = vld [vmem:[#allocation2 + $0x1a] sm:$0xff]  ;;  %v8106_v15 = vld [vmem:[#allocation2 + $0x92] sm:$0xff] }
 0x47a   : > { %2681 = vst.msk [vmem:[#allocation2 + $0x129] sm:$0xff] %vm333_vm0, %v2595_v24  ;;  %5039 = vrot.lane.b32.xlu1 %v5038_v3, %s5577_s18  ;;  %v5048_v23 = vpack.i.bf16 %v2739_v54, %v2738_v28  ;;  %v2740_v61 = vld [vmem:[#allocation2 + $0xd9] sm:$0xff]  ;;  %v2757_v16 = vld [vmem:[#allocation2 + $0x22] sm:$0xff]  ;;  %v2755_v18 = vld [vmem:[#allocation2 + $0xa] sm:$0xff]  ;;  %v8079_v24 = vpack.i.bf16 %v7989_v36, %v7945_v55  ;;  %v8095_v55 = vpack.i.bf16 %v2949_v29, %v8027_v63 }
 0x47b   : > { %2682 = vst.msk [vmem:[#allocation2 + $0x139] sm:$0xff] %vm333_vm0, %v2596_v60  ;;  %v2741_v41 = vld [vmem:[#allocation2 + $0xe1] sm:$0xff]  ;;  %v8103_v3 = vld [vmem:[#allocation2 + $0xb2] sm:$0xff] }
 0x47c   : > { %2683 = vst.msk [vmem:[#allocation2 + $0x141] sm:$0xff] %vm333_vm0, %v2597_v37  ;;  %4929 = vmatmul.msk.f32.gmra.mxu2 %vm333_vm0, %v8027_v63  ;;  %v5053_v2 = vpack.i.bf16 %v2741_v41, %v2740_v61  ;;  %v2742_v9 = vld [vmem:[#allocation2 + $0xf1] sm:$0xff]  ;;  %v2754_v26 = vld [vmem:[#allocation2 + $0x2] sm:$0xff]  ;;  %v8084_v59 = vld [vmem:[#allocation2 + $0x7a] sm:$0xff] }
 0x47d   : > { %2684 = vst.msk [vmem:[#allocation2 + $0x151] sm:$0xff] %vm333_vm0, %v2598_v58  ;;  %v2743_v40 = vld [vmem:[#allocation2 + $0xf9] sm:$0xff]  ;;  %v5088_v32 = vpack.i.bf16 %v2755_v18, %v2754_v26  ;;  %v8090_v22 = vld [vmem:[#allocation2 + $0x82] sm:$0xff]  ;;  %v8101_v37 = vld [vmem:[#allocation2 + $0xaa] sm:$0xff] }
 0x47e   : > { %2685 = vst.msk [vmem:[#allocation2 + $0x159] sm:$0xff] %vm333_vm0, %v2599_v47  ;;  %v2744_v45 = vld [vmem:[#allocation2 + $0x109] sm:$0xff]  ;;  %v5058_v30 = vpack.i.bf16 %v2743_v40, %v2742_v9  ;;  %v5113_v36 = vpack.i.bf16 %v8090_v22, %v8084_v59  ;;  %v8108_v58 = vld [vmem:[#allocation2 + $0x9a] sm:$0xff]  ;;  %v5123_v28 = vpack.i.bf16 %v8103_v3, %v8101_v37 }
 0x47f   : > { %5049 = vrot.lane.b32.xlu0 %v5048_v23, %s5577_s18  ;;  %2686 = vst.msk [vmem:[#allocation2 + $0x169] sm:$0xff] %vm333_vm0, %v2600_v8  ;;  %v2745_v6 = vld [vmem:[#allocation2 + $0x111] sm:$0xff]  ;;  %v2770_v54 = vld [vmem:[#allocation2 + $0xc2] sm:$0xff]  ;;  %v5118_v8 = vpack.i.bf16 %v8108_v58, %v8106_v15  ;;  %v2772_v23 = vld [vmem:[#allocation2 + $0xda] sm:$0xff] }
 0x480   : > { %2687 = vst.msk [vmem:[#allocation2 + $0x171] sm:$0xff] %vm333_vm0, %v2601_v19  ;;  %5044 = vrot.lane.b32.xlu2 %v5043_v49, %s5577_s18  ;;  %v8041_v10 = vld [vmem:[#allocation2 + $0x121] sm:$0xff]  ;;  %v5063_v43 = vpack.i.bf16 %v2745_v6, %v2744_v45  ;;  %v2771_v47 = vld [vmem:[#allocation2 + $0xca] sm:$0xff]  ;;  %v8131_v49 = vld [vmem:[#allocation2 + $0x112] sm:$0xff] }
 0x481   : > { %2688 = vst.msk [vmem:[#allocation2 + $0x181] sm:$0xff] %vm333_vm0, %v2602_v5  ;;  %v8044_v11 = vld [vmem:[#allocation2 + $0x129] sm:$0xff]  ;;  %v5268_v25 = vpack.i.bf16 %v8041_v10, %v7991_v46  ;;  %v5128_v63 = vpack.i.bf16 %v2771_v47, %v2770_v54  ;;  %v8120_v19 = vld [vmem:[#allocation2 + $0xfa] sm:$0xff] }
 0x482   : > { %5054 = vrot.lane.b32.xlu1 %v5053_v2, %s5577_s18  ;;  %v2748_v4 = vld [vmem:[#allocation2 + $0x139] sm:$0xff]  ;;  %v5293_v44 = vpack.i.bf16 %v8044_v11, %v7996_v27  ;;  %v5068_v42 = vpack.i.bf16 %v8044_v11, %v8041_v10  ;;  %v8123_v5 = vld [vmem:[#allocation2 + $0xe2] sm:$0xff]  ;;  %v8129_v41 = vld [vmem:[#allocation2 + $0x10a] sm:$0xff] }
 0x483   : > { %v2749_v14 = vld [vmem:[#allocation2 + $0x141] sm:$0xff]  ;;  %v8051_v52 = vpack.i.bf16 %v2748_v4, %v2734_v51  ;;  %v2951_v51 = vld [vmem:[#allocation2 + $0x6a] sm:$0xff]  ;;  %v5133_v2 = vpack.i.bf16 %v8123_v5, %v2772_v23  ;;  %v5143_v45 = vpack.i.bf16 %v8131_v49, %v8129_v41 }
 0x484   : > { %4930 = vmatmul.msk.f32.gmra.mxu2 %vm333_vm0, %v2949_v29  ;;  %v2750_v31 = vld [vmem:[#allocation2 + $0x151] sm:$0xff]  ;;  %v8054_v1 = vpack.i.bf16 %v2749_v14, %v2735_v7  ;;  %v5073_v53 = vpack.i.bf16 %v2749_v14, %v2748_v4  ;;  %v5093_v7 = vpack.i.bf16 %v2757_v16, %v2756_v20  ;;  %v8088_v60 = vpack.i.bf16 %v2951_v51, %v2950_v17  ;;  %v8138_v6 = vld [vmem:[#allocation2 + $0x13a] sm:$0xff]  ;;  %v8140_v29 = vld [vmem:[#allocation2 + $0x142] sm:$0xff] }
 0x485   : > { %v8056_v35 = vld [vmem:[#allocation2 + $0x159] sm:$0xff]  ;;  %v8058_v33 = vpack.i.bf16 %v2750_v31, %v2736_v12  ;;  %v8143_v4 = vld [vmem:[#allocation2 + $0x122] sm:$0xff]  ;;  %v8145_v9 = vld [vmem:[#allocation2 + $0x12a] sm:$0xff]  ;;  %v5153_v40 = vpack.i.bf16 %v8140_v29, %v8138_v6 }
 0x486   : > { %v5078_v39 = vpack.i.bf16 %v8056_v35, %v2750_v31  ;;  %v8069_v62 = vld [vmem:[#allocation2 + $0x169] sm:$0xff]  ;;  %v8118_v12 = vld [vmem:[#allocation2 + $0xf2] sm:$0xff]  ;;  %v5148_v31 = vpack.i.bf16 %v8145_v9, %v8143_v4 }
 0x487   : > { %5064 = vrot.lane.b32.xlu0 %v5063_v43, %s5577_s18  ;;  %v2753_v48 = vld [vmem:[#allocation2 + $0x171] sm:$0xff]  ;;  %v5138_v61 = vpack.i.bf16 %v8120_v19, %v8118_v12  ;;  %v8153_v43 = vld [vmem:[#allocation2 + $0x15a] sm:$0xff]  ;;  %v2884_v20 = vld [vmem:[#allocation2 + $0x48] sm:$0xff] }
 0x488   : > { %5059 = vrot.lane.b32.xlu2 %v5058_v30, %s5577_s18  ;;  %v5083_v50 = vpack.i.bf16 %v2753_v48, %v8069_v62  ;;  %v8151_v14 = vld [vmem:[#allocation2 + $0x152] sm:$0xff] }
 0x489   : > { %v5158_v30 = vpack.i.bf16 %v8153_v43, %v8151_v14  ;;  %v8174_v48 = vld [vmem:[#allocation2 + $0x30] sm:$0xff] }
 0x48a   : > { %5069 = vrot.lane.b32.xlu1 %v5068_v42, %s5577_s18  ;;  %v8162_v42 = vld [vmem:[#allocation2 + $0x18] sm:$0xff]  ;;  %v2885_v16 = vld [vmem:[#allocation2 + $0x50] sm:$0xff] }
 0x48b   : > { %v5203_v26 = vpack.i.bf16 %v2885_v16, %v2884_v20 }
 0x48c   : > { %4931 = vmatmul.msk.f32.gmra.mxu2 %vm333_vm0, %v2950_v17  ;;  %v8164_v17 = vld [vmem:[#allocation2 + $0x20] sm:$0xff] }
 0x48f   : > { %5079 = vrot.lane.b32.xlu0 %v5078_v39, %s5577_s18  ;;  %v5163_v39 = vpack.i.bf16 %v8164_v17, %v8162_v42 }
 0x490   : > { %5074 = vrot.lane.b32.xlu2 %v5073_v53, %s5577_s18  ;;  %v8176_v53 = vld [vmem:[#allocation2 + $0x38] sm:$0xff] }
 0x492   : > { %5084 = vrot.lane.b32.xlu1 %v5083_v50, %s5577_s18  ;;  %s5582_s18 = smov 64   ;;  %v5188_v50 = vpack.i.bf16 %v8176_v53, %v8174_v48 }
 0x494   : > { %4932 = vmatmul.msk.f32.gmra.mxu2 %vm333_vm0, %v2951_v51  ;;  %v8200_v51 = vld [vmem:[#allocation2 + $0x60] sm:$0xff] }
 0x497   : > { %5094 = vrot.lane.b32.xlu0 %v5093_v7, %s5581_s22 }
 0x498   : > { %5089 = vrot.lane.b32.xlu2 %v5088_v32, %s5581_s22  ;;  %v8206_v32 = vpop.permute.xlu1 %5009 }
 0x49a   : > { %5099 = vrot.lane.b32.xlu1 %v8079_v24, %s5581_s22 }
 0x49c   : > { %4933 = vmatmul.msk.f32.gmra.mxu2 %vm333_vm0, %v8084_v59 }
 0x49f   : > { %5109 = vrot.lane.b32.xlu0 %v8088_v60, %s5581_s22 }
 0x4a0   : > { %5104 = vrot.lane.b32.xlu2 %v8095_v55, %s5581_s22 }
 0x4a2   : > { %5114 = vrot.lane.b32.xlu1 %v5113_v36, %s5581_s22 }
 0x4a4   : > { %4934 = vmatmul.msk.f32.gmra.mxu2 %vm333_vm0, %v8090_v22 }
 0x4a7   : > { %5124 = vrot.lane.b32.xlu0 %v5123_v28, %s5581_s22 }
 0x4a8   : > { %5119 = vrot.lane.b32.xlu2 %v5118_v8, %s5581_s22  ;;  %v8235_v8 = vld [vmem:[#allocation2 + $0x80] sm:$0xff] }
 0x4aa   : > { %5129 = vrot.lane.b32.xlu1 %v5128_v63, %s5581_s22 }
 0x4ac   : > { %4935 = vmatmul.msk.f32.gmra.mxu2 %vm333_vm0, %v8106_v15 }
 0x4af   : > { %5139 = vrot.lane.b32.xlu0 %v5138_v61, %s5581_s22 }
 0x4b0   : > { %5134 = vrot.lane.b32.xlu2 %v5133_v2, %s5581_s22  ;;  %v2702_v2 = vld [vmem:[#allocation2 + $0x90] sm:$0xff] }
 0x4b2   : > { %5144 = vrot.lane.b32.xlu1 %v5143_v45, %s5581_s22  ;;  %v8259_v45 = vld [vmem:[#allocation2 + $0x138] sm:$0xff] }
 0x4b4   : > { %4936 = vmatmul.msk.f32.gmra.mxu2 %vm333_vm0, %v8108_v58 }
 0x4b7   : > { %5154 = vrot.lane.b32.xlu0 %v5153_v40, %s5581_s22 }
 0x4b8   : > { %5149 = vrot.lane.b32.xlu2 %v5148_v31, %s5581_s22 }
 0x4ba   : > { %5159 = vrot.lane.b32.xlu1 %v5158_v30, %s5581_s22  ;;  %v8263_v30 = vpack.i.bf16 %v8259_v45, %v2702_v2 }
 0x4bc   : > { %4937 = vmatmul.msk.f32.gmra.mxu2 %vm333_vm0, %v8101_v37 }
 0x4bf   : > { %5169 = vrot.lane.b32.xlu0 %v7965_v38, %s5582_s18 }
 0x4c0   : > { %5164 = vrot.lane.b32.xlu2 %v5163_v39, %s5583_s27 }
 0x4c2   : > { %5174 = vrot.lane.b32.xlu1 %v5093_v7, %s5584_s28  ;;  %v8202_v7 = vld [vmem:[#allocation2 + $0x68] sm:$0xff] }
 0x4c4   : > { %4938 = vmatmul.msk.f32.gmra.mxu2 %vm333_vm0, %v8103_v3 }
 0x4c7   : > { %5184 = vrot.lane.b32.xlu0 %v7953_v57, %s5585_s29 }
 0x4c8   : > { %5179 = vrot.lane.b32.xlu2 %v5188_v50, %s5586_s11 }
 0x4ca   : > { %5189 = vrot.lane.b32.xlu1 %v5188_v50, %s5583_s27  ;;  %v8186_v38 = vpop.permute.xlu2 %5014 }
 0x4cc   : > { %4939 = vmatmul.msk.f32.gmra.mxu2 %vm333_vm0, %v2770_v54 }
 0x4cf   : > { %5199 = vrot.lane.b32.xlu0 %v8079_v24, %s5584_s28  ;;  %v5228_v24 = vpack.i.bf16 %v8202_v7, %v8200_v51 }
 0x4d0   : > { %5194 = vrot.lane.b32.xlu2 %v7953_v57, %s5582_s18 }
 0x4d2   : > { %5204 = vrot.lane.b32.xlu1 %v5203_v26, %s5586_s11  ;;  %v8194_v18 = vpop.permute.xlu2 %5029 }
 0x4d4   : > { %4940 = vmatmul.msk.f32.gmra.mxu2 %vm333_vm0, %v2771_v47  ;;  %v8233_v47 = vld [vmem:[#allocation2 + $0x78] sm:$0xff] }
 0x4d7   : > { %5214 = vrot.lane.b32.xlu0 %v5203_v26, %s5583_s27 }
 0x4d8   : > { %5209 = vrot.lane.b32.xlu2 %v7975_v13, %s5585_s29 }
 0x4da   : > { %5219 = vrot.lane.b32.xlu1 %v7975_v13, %s5582_s18  ;;  %v8208_v57 = vpop.permute.xlu2 %5044 }
 0x4dc   : > { %4941 = vmatmul.msk.f32.gmra.mxu2 %vm333_vm0, %v2772_v23  ;;  %v8239_v23 = vld [vmem:[#allocation2 + $0x120] sm:$0xff] }
 0x4df   : > { %5229 = vrot.lane.b32.xlu0 %v5228_v24, %s5586_s11 }
 0x4e0   : > { %5224 = vrot.lane.b32.xlu2 %v8095_v55, %s5584_s28 }
 0x4e1   : > { %v8216_v36 = vpop.permute.xlu0 %5019 }
 0x4e2   : > { %5234 = vrot.lane.b32.xlu1 %v8014_v21, %s5585_s29  ;;  %v8220_v13 = vpop.permute.xlu2 %5059 }
 0x4e4   : > { %v5025_v28 = vpop.permute.xlu1 %5024  ;;  %4942 = vmatmul.msk.f32.gmra.mxu2 %vm333_vm0, %v8123_v5 }
 0x4e5   : > { %v5027_v40 = vunpack.i.h.bf16 %v5025_v28  ;;  %v5026_v31 = vunpack.i.l.bf16 %v5025_v28 }
 0x4e7   : > { %5244 = vrot.lane.b32.xlu0 %v8014_v21, %s5582_s18  ;;  %v5253_v21 = vpack.i.bf16 %v8235_v8, %v8233_v47  ;;  %v3881_v28 = vsel %vm333_vm0, %v2885_v16, %v5027_v40  ;;  %v8297_v40 = vld [vmem:[#allocation2 + $0x140] sm:$0xff] }
 0x4e8   : > { %5239 = vrot.lane.b32.xlu2 %v5228_v24, %s5583_s27  ;;  %v3880_v24 = vsel %vm333_vm0, %v2884_v20, %v5026_v31  ;;  %v4118_v20 = vld [vmem:[%s9657_s5 + $0x78] sm:$0xff] }
 0x4e9   : > { %v8227_v54 = vpop.permute.xlu0 %5034  ;;  %4221 = vmatpush.msra.mxu1 %v4118_v20  ;;  %4968 = vmatpush.msrb.mxu3 %v4118_v20  ;;  %v4115_v20 = vld [vmem:[%s9657_s5 + $0x60] sm:$0xff] }
 0x4ea   : > { %5249 = vrot.lane.b32.xlu1 %v8088_v60, %s5584_s28  ;;  %v8231_v55 = vpop.permute.xlu2 %5074  ;;  %v5263_v60 = vpack.i.bf16 %v8239_v23, %v8233_v47 }
 0x4ec   : > { %v5040_v63 = vpop.permute.xlu1 %5039  ;;  %4943 = vmatmul.msk.f32.gmra.mxu2 %vm333_vm0, %v8118_v12 }
 0x4ed   : > { %v5042_v16 = vunpack.i.h.bf16 %v5040_v63 }
 0x4ef   : > { %5259 = vrot.lane.b32.xlu0 %v8005_v34, %s5585_s29  ;;  %v5273_v34 = vpack.i.bf16 %v8143_v4, %v8084_v59 }
 0x4f0   : > { %5254 = vrot.lane.b32.xlu2 %v5253_v21, %s5586_s11 }
 0x4f1   : > { %v8248_v5 = vpop.permute.xlu0 %5049 }
 0x4f2   : > { %5264 = vrot.lane.b32.xlu1 %v5263_v60, %s5583_s27  ;;  %v8251_v61 = vpop.permute.xlu2 %5089  ;;  %v5041_v60 = vunpack.i.l.bf16 %v5040_v63  ;;  %v4117_v63 = vld [vmem:[%s9657_s5 + $0x70] sm:$0xff] }
 0x4f3   : > { %4222 = vmatpush.msra.mxu1 %v4117_v63  ;;  %4969 = vmatpush.msrb.mxu3 %v4117_v63 }
 0x4f4   : > { %v8253_v12 = vpop.permute.xlu1 %5054  ;;  %4944 = vmatmul.msk.f32.gmra.mxu2 %vm333_vm0, %v8120_v19  ;;  %v8271_v19 = vld [vmem:[#allocation2 + $0x128] sm:$0xff] }
 0x4f5   : > { %v5288_v46 = vpack.i.bf16 %v8271_v19, %v8235_v8 }
 0x4f7   : > { %5274 = vrot.lane.b32.xlu0 %v5273_v34, %s5584_s28  ;;  %v2703_v34 = vld [vmem:[#allocation2 + $0x98] sm:$0xff] }
 0x4f8   : > { %5269 = vrot.lane.b32.xlu2 %v5268_v25, %s5582_s18  ;;  %v8313_v27 = vpack.i.bf16 %v8297_v40, %v2703_v34 }
 0x4f9   : > { %v8269_v39 = vpop.permute.xlu0 %5064 }
 0x4fa   : > { %5279 = vrot.lane.b32.xlu1 %v8263_v30, %s5586_s11  ;;  %v5105_v59 = vpop.permute.xlu2 %5104 }
 0x4fb   : > { %v5107_v50 = vunpack.i.h.bf16 %v5105_v59  ;;  %v5106_v26 = vunpack.i.l.bf16 %v5105_v59 }
 0x4fc   : > { %v8277_v21 = vpop.permute.xlu1 %5069  ;;  %4945 = vmatmul.msk.f32.gmra.mxu2 %vm333_vm0, %v8129_v41 }
 0x4fd   : > { %v8284_v10 = vsel %vm1997_vm9, %v3881_v28, %v5107_v50  ;;  %v8287_v25 = vsel %vm1997_vm9, %v3880_v24, %v5106_v26  ;;  %v3887_v26 = vsel %vm333_vm0, %v2703_v34, %v5042_v16  ;;  %v3886_v24 = vsel %vm333_vm0, %v2702_v2, %v5041_v60 }
 0x4fe   : > { %v5298_v2 = vpack.i.bf16 %v8145_v9, %v8090_v22  ;;  %v5057_v16 = vunpack.i.h.bf16 %v8253_v12  ;;  %v5056_v60 = vunpack.i.l.bf16 %v8253_v12  ;;  %v4114_v22 = vld [vmem:[%s9657_s5 + $0x58] sm:$0xff] }
 0x4ff   : > { %5289 = vrot.lane.b32.xlu0 %v5288_v46, %s5583_s27  ;;  %v5017_v46 = vunpack.i.h.bf16 %v8186_v38 }
 0x500   : > { %5284 = vrot.lane.b32.xlu2 %v8051_v52, %s5585_s29 }
 0x501   : > { %v8295_v41 = vpop.permute.xlu0 %5079  ;;  %v3877_v63 = vsel %vm333_vm0, %v8164_v17, %v5017_v46  ;;  %v4113_v17 = vld [vmem:[%s9657_s5 + $0x50] sm:$0xff] }
 0x502   : > { %5294 = vrot.lane.b32.xlu1 %v5293_v44, %s5582_s18  ;;  %v5120_v31 = vpop.permute.xlu2 %5119 }
 0x503   : > { %v5122_v59 = vunpack.i.h.bf16 %v5120_v31  ;;  %v5121_v50 = vunpack.i.l.bf16 %v5120_v31 }
 0x504   : > { %v8308_v28 = vpop.permute.xlu1 %5084  ;;  %4946 = vmatmul.msk.f32.gmra.mxu2 %vm333_vm0, %v8131_v49  ;;  %v4116_v49 = vld [vmem:[%s9657_s5 + $0x68] sm:$0xff] }
 0x505   : > { %9986 = vst [vmem:[#allocation9_spill] sm:$0xff] %v8308_v28  ;;  %v8316_v11 = vsel %vm1997_vm9, %v3887_v26, %v5122_v59  ;;  %v8319_v44 = vsel %vm1997_vm9, %v3886_v24, %v5121_v50  ;;  %4223 = vmatpush.msra.mxu1 %v4116_v49  ;;  %4970 = vmatpush.msrb.mxu3 %v4116_v49  ;;  %v5022_v59 = vunpack.i.h.bf16 %v8216_v36  ;;  %v5021_v50 = vunpack.i.l.bf16 %v8216_v36  ;;  %v8347_v26 = vld [vmem:[#allocation2 + $0xd8] sm:$0xff]  ;;  %v8349_v24 = vld [vmem:[#allocation2 + $0xe0] sm:$0xff] }
 0x506   : > { %9987 = vst [vmem:[#allocation3_spill] sm:$0xff] %v8316_v11  ;;  %v3893_v36 = vsel %vm333_vm0, %v8349_v24, %v5057_v16  ;;  %v3892_v46 = vsel %vm333_vm0, %v8347_v26, %v5056_v60  ;;  %v5031_v16 = vunpack.i.l.bf16 %v8194_v18 }
 0x507   : > { %5304 = vrot.lane.b32.xlu0 %v8313_v27, %s5586_s11  ;;  %4224 = vmatpush.msra.mxu1 %v4115_v20  ;;  %v3878_v60 = vsel %vm333_vm0, %v8174_v48, %v5021_v50  ;;  %v4111_v48 = vld [vmem:[%s9657_s5 + $0x40] sm:$0xff]  ;;  %v2704_v50 = vld [vmem:[#allocation2 + $0xa8] sm:$0xff] }
 0x508   : > { %5299 = vrot.lane.b32.xlu2 %v5298_v2, %s5584_s28  ;;  %4971 = vmatpush.msrb.mxu3 %v4115_v20  ;;  %v5032_v20 = vunpack.i.h.bf16 %v8194_v18  ;;  %v4112_v18 = vld [vmem:[%s9657_s5 + $0x48] sm:$0xff] }
 0x509   : > { %v8335_v34 = vpop.permute.xlu0 %5094  ;;  %4225 = vmatpush.msra.mxu1 %v4114_v22 }
 0x50a   : > { %v5097_v31 = vunpack.i.h.bf16 %v8335_v34  ;;  %5309 = vrot.lane.b32.xlu1 %v8054_v1, %s5585_s29  ;;  %v5135_v12 = vpop.permute.xlu2 %5134  ;;  %4972 = vmatpush.msrb.mxu3 %v4114_v22  ;;  %v5323_v22 = vpack.i.bf16 %v8138_v6, %v8106_v15  ;;  %v3882_v15 = vsel %vm333_vm0, %v8200_v51, %v5031_v16  ;;  %v4109_v51 = vld [vmem:[%s9657_s5 + $0x30] sm:$0xff] }
 0x50b   : > { %v5137_v49 = vunpack.i.h.bf16 %v5135_v12  ;;  %v5136_v0 = vunpack.i.l.bf16 %v5135_v12  ;;  %4226 = vmatpush.msra.mxu1 %v4113_v17 }
 0x50c   : > { %v8352_v2 = vsel %vm1997_vm9, %v3877_v63, %v5097_v31  ;;  %v5100_v28 = vpop.permute.xlu1 %5099  ;;  %4947 = vmatmul.msk.f32.gmra.mxu2 %vm333_vm0, %v8143_v4  ;;  %v3879_v4 = vsel %vm333_vm0, %v8176_v53, %v5022_v59  ;;  %4973 = vmatpush.msrb.mxu3 %v4113_v17  ;;  %v5072_v53 = vunpack.i.h.bf16 %v8277_v21  ;;  %v4110_v17 = vld [vmem:[%s9657_s5 + $0x38] sm:$0xff] }
 0x50d   : > { %v5102_v31 = vunpack.i.h.bf16 %v5100_v28  ;;  %v5101_v63 = vunpack.i.l.bf16 %v5100_v28  ;;  %v8364_v12 = vsel %vm1997_vm9, %v3893_v36, %v5137_v49  ;;  %v8367_v11 = vsel %vm1997_vm9, %v3892_v46, %v5136_v0  ;;  %4227 = vmatpush.msra.mxu1 %v4112_v18  ;;  %v8395_v49 = vld [vmem:[#allocation2 + $0x150] sm:$0xff] }
 0x50e   : > { %4974 = vmatpush.msrb.mxu3 %v4112_v18  ;;  %v8423_v16 = vpack.i.bf16 %v8395_v49, %v2704_v50 }
 0x50f   : > { %5319 = vrot.lane.b32.xlu0 %v8051_v52, %s5582_s18  ;;  %v8378_v28 = vsel %vm1997_vm9, %v3878_v60, %v5101_v63  ;;  %v8381_v0 = vsel %vm1997_vm9, %v3879_v4, %v5102_v31  ;;  %v5071_v52 = vunpack.i.l.bf16 %v8277_v21  ;;  %v3883_v21 = vsel %vm333_vm0, %v8202_v7, %v5032_v20  ;;  %4228 = vmatpush.msra.mxu1 %v4111_v48 }
 0x510   : > { %5314 = vrot.lane.b32.xlu2 %v8263_v30, %s5583_s27  ;;  %v5037_v30 = vunpack.i.h.bf16 %v8227_v54  ;;  %v5036_v31 = vunpack.i.l.bf16 %v8227_v54  ;;  %4975 = vmatpush.msrb.mxu3 %v4111_v48  ;;  %v3899_v7 = vsel %vm333_vm0, %v8271_v19, %v5072_v53  ;;  %v5047_v19 = vunpack.i.h.bf16 %v8208_v57 }
 0x511   : > { %v5110_v59 = vpop.permute.xlu0 %5109  ;;  %v3898_v54 = vsel %vm333_vm0, %v8239_v23, %v5071_v52  ;;  %4229 = vmatpush.msra.mxu1 %v4110_v17  ;;  %v4108_v23 = vld [vmem:[%s9657_s5 + $0x28] sm:$0xff] }
 0x512   : > { %v5112_v36 = vunpack.i.h.bf16 %v5110_v59  ;;  %v5111_v46 = vunpack.i.l.bf16 %v5110_v59  ;;  %5324 = vrot.lane.b32.xlu1 %v5323_v22, %s5584_s28  ;;  %v5150_v63 = vpop.permute.xlu2 %5149  ;;  %4976 = vmatpush.msrb.mxu3 %v4110_v17  ;;  %v3885_v53 = vsel %vm333_vm0, %v8235_v8, %v5037_v30  ;;  %v3884_v52 = vsel %vm333_vm0, %v8233_v47, %v5036_v31  ;;  %v2705_v47 = vld [vmem:[#allocation2 + $0xb0] sm:$0xff]  ;;  %v4106_v31 = vld [vmem:[%s9657_s5 + $0x18] sm:$0xff] }
 0x513   : > { %v5152_v18 = vunpack.i.h.bf16 %v5150_v63  ;;  %v5151_v59 = vunpack.i.l.bf16 %v5150_v63  ;;  %4230 = vmatpush.msra.mxu1 %v4109_v51  ;;  %v3889_v63 = vsel %vm333_vm0, %v2705_v47, %v5047_v19 }
 0x514   : > { %v8408_v60 = vsel %vm1997_vm9, %v3882_v15, %v5111_v46  ;;  %v8411_v4 = vsel %vm1997_vm9, %v3883_v21, %v5112_v36  ;;  %v5115_v20 = vpop.permute.xlu1 %5114  ;;  %4948 = vmatmul.msk.f32.gmra.mxu2 %vm333_vm0, %v8145_v9  ;;  %v5046_v9 = vunpack.i.l.bf16 %v8208_v57  ;;  %v4107_v57 = vld [vmem:[%s9657_s5 + $0x20] sm:$0xff]  ;;  %4977 = vmatpush.msrb.mxu3 %v4109_v51  ;;  %v5051_v51 = vunpack.i.l.bf16 %v8248_v5 }
 0x515   : > { %v5117_v22 = vunpack.i.h.bf16 %v5115_v20  ;;  %v5116_v36 = vunpack.i.l.bf16 %v5115_v20  ;;  %v8426_v46 = vsel %vm1997_vm9, %v3899_v7, %v5152_v18  ;;  %v8429_v48 = vsel %vm1997_vm9, %v3898_v54, %v5151_v59  ;;  %4231 = vmatpush.msra.mxu1 %v4108_v23 }
 0x516   : > { %4978 = vmatpush.msrb.mxu3 %v4108_v23  ;;  %v3888_v18 = vsel %vm333_vm0, %v2704_v50, %v5046_v9  ;;  %v5052_v59 = vunpack.i.h.bf16 %v8248_v5  ;;  %v4105_v50 = vld [vmem:[%s9657_s5 + $0x10] sm:$0xff]  ;;  %v5348_v5 = vpack.i.bf16 %v8140_v29, %v8108_v58  ;;  %v8481_v23 = vld [vmem:[#allocation2 + $0x158] sm:$0xff] }
 0x517   : > { %5334 = vrot.lane.b32.xlu0 %v8058_v33, %s5585_s29  ;;  %v8443_v21 = vsel %vm1997_vm9, %v3884_v52, %v5116_v36  ;;  %v8446_v15 = vsel %vm1997_vm9, %v3885_v53, %v5117_v22  ;;  %4232 = vmatpush.msra.mxu1 %v4107_v57  ;;  %v8479_v36 = vld [vmem:[#allocation2 + $0xc8] sm:$0xff]  ;;  %v5062_v53 = vunpack.i.h.bf16 %v8220_v13  ;;  %v5061_v52 = vunpack.i.l.bf16 %v8220_v13  ;;  %v4103_v13 = vld [vmem:[%s9657_s5] sm:$0xff] }
 0x518   : > { %5329 = vrot.lane.b32.xlu2 %v8423_v16, %s5586_s11  ;;  %4979 = vmatpush.msrb.mxu3 %v4107_v57 }
 0x519   : > { %v5125_v8 = vpop.permute.xlu0 %5124  ;;  %4233 = vmatpush.msra.mxu1 %v4106_v31 }
 0x51a   : > { %v5127_v17 = vunpack.i.h.bf16 %v5125_v8  ;;  %v5126_v30 = vunpack.i.l.bf16 %v5125_v8  ;;  %5339 = vrot.lane.b32.xlu1 %v8313_v27, %s5583_s27  ;;  %v8462_v7 = vpop.permute.xlu2 %5164  ;;  %v8477_v27 = vld [vmem:[#allocation2 + $0xc0] sm:$0xff]  ;;  %4980 = vmatpush.msrb.mxu3 %v4106_v31 }
 0x51b   : > { %v3890_v58 = vsel %vm333_vm0, %v8477_v27, %v5051_v51  ;;  %4234 = vmatpush.msra.mxu1 %v4105_v50 }
 0x51c   : > { %v8465_v54 = vsel %vm1997_vm9, %v3888_v18, %v5126_v30  ;;  %v8468_v20 = vsel %vm1997_vm9, %v3889_v63, %v5127_v17  ;;  %v5130_v22 = vpop.permute.xlu1 %5129  ;;  %4949 = vmatmul.msk.f32.gmra.mxu2 %vm333_vm0, %v8138_v6  ;;  %v3891_v6 = vsel %vm333_vm0, %v8479_v36, %v5052_v59  ;;  %v4104_v17 = vld [vmem:[%s9657_s5 + $0x8] sm:$0xff]  ;;  %4981 = vmatpush.msrb.mxu3 %v4105_v50  ;;  %v2710_v63 = vld [vmem:[#allocation2 + $0xf0] sm:$0xff]  ;;  %v2711_v18 = vld [vmem:[#allocation2 + $0xf8] sm:$0xff]  ;;  %v5066_v50 = vunpack.i.l.bf16 %v8269_v39 }
 0x51d   : > { %v5132_v19 = vunpack.i.h.bf16 %v5130_v22  ;;  %v5131_v9 = vunpack.i.l.bf16 %v5130_v22  ;;  %v8503_v30 = vpack.i.bf16 %v8481_v23, %v2705_v47  ;;  %4235 = vmatpush.msra.mxu1 %v4104_v17  ;;  %v3895_v22 = vsel %vm333_vm0, %v2711_v18, %v5062_v53 }
 0x51e   : > { %4982 = vmatpush.msrb.mxu3 %v4104_v17 }
 0x51f   : > { %5349 = vrot.lane.b32.xlu0 %v5348_v5, %s5584_s28  ;;  %v8491_v57 = vsel %vm1997_vm9, %v3890_v58, %v5131_v9  ;;  %v8494_v8 = vsel %vm1997_vm9, %v3891_v6, %v5132_v19  ;;  %v3894_v5 = vsel %vm333_vm0, %v2710_v63, %v5061_v52  ;;  %v5067_v19 = vunpack.i.h.bf16 %v8269_v39  ;;  %4236 = vmatpush.msra.mxu1 %v4103_v13  ;;  %v5563_v39 = vld [vmem:[%s9657_s5 + $0x88] sm:$0xff]  ;;  %v2713_v6 = vld [vmem:[#allocation2 + $0x110] sm:$0xff] }
 0x520   : > { %5344 = vrot.lane.b32.xlu2 %v8054_v1, %s5582_s18  ;;  %4983 = vmatpush.msrb.mxu3 %v4103_v13  ;;  %v2712_v52 = vld [vmem:[#allocation2 + $0x108] sm:$0xff]  ;;  %v5076_v63 = vunpack.i.l.bf16 %v8231_v55 }
 0x521   : > { %v5140_v31 = vpop.permute.xlu0 %5139  ;;  %v3897_v18 = vsel %vm333_vm0, %v2713_v6, %v5067_v19  ;;  %v3896_v13 = vsel %vm333_vm0, %v2712_v52, %v5066_v50  ;;  %v5082_v52 = vunpack.i.h.bf16 %v8295_v41  ;;  %v5081_v6 = vunpack.i.l.bf16 %v8295_v41 }
 0x522   : > { %v5142_v59 = vunpack.i.h.bf16 %v5140_v31  ;;  %v5141_v51 = vunpack.i.l.bf16 %v5140_v31  ;;  %5354 = vrot.lane.b32.xlu1 %v8503_v30, %s5586_s11  ;;  %v8513_v47 = vpop.permute.xlu2 %5179  ;;  %4984 = vmatpush.msra.mxu3 %v5563_v39  ;;  %v5077_v31 = vunpack.i.h.bf16 %v8231_v55  ;;  %v9988_v55 = vpack.i.bf16 %v8056_v35, %v8029_v56  ;;  %v8551_v39 = vpop.f32.mrf.mxu2 }
 0x523   : > { %v5011_v41 = vunpack.i.l.bf16 %v8206_v32 }
 0x524   : > { %v8516_v1 = vsel %vm1997_vm9, %v3894_v5, %v5141_v51  ;;  %v8519_v9 = vsel %vm1997_vm9, %v3895_v22, %v5142_v59  ;;  %v5145_v53 = vpop.permute.xlu1 %5144  ;;  %4950 = vmatmul.msk.f32.gmra.mxu2 %vm333_vm0, %v8140_v29  ;;  %v5564_v29 = vld [vmem:[%s9657_s5 + $0x80] sm:$0xff]  ;;  %v8545_v5 = vld [vmem:[#allocation2 + $0x168] sm:$0xff]  ;;  %v3901_v50 = vsel %vm333_vm0, %v8297_v40, %v5077_v31 }
 0x525   : > { %v5147_v58 = vunpack.i.h.bf16 %v5145_v53  ;;  %v5146_v17 = vunpack.i.l.bf16 %v5145_v53  ;;  %4985 = vmatpush.msra.mxu3 %v5564_v29  ;;  %v3900_v53 = vsel %vm333_vm0, %v8259_v45, %v5076_v63  ;;  %v8569_v45 = vpack.i.bf16 %v8545_v5, %v8477_v27  ;;  %v8572_v31 = vld [vmem:[#allocation2 + $0xc1] sm:$0xff] }
 0x526   : > { %v2690_v63 = vld [vmem:[#allocation2] sm:$0xff]  ;;  %v3902_v29 = vsel %vm333_vm0, %v8395_v49, %v5081_v6  ;;  %v5373_v27 = vpack.i.bf16 %v8151_v14, %v8101_v37  ;;  %v2831_v37 = vld [vmem:[#allocation2 + $0xb1] sm:$0xff] }
 0x527   : > { %5364 = vrot.lane.b32.xlu0 %v8423_v16, %s5583_s27  ;;  %v8536_v59 = vsel %vm1997_vm9, %v3896_v13, %v5146_v17  ;;  %v8539_v51 = vsel %vm1997_vm9, %v3897_v18, %v5147_v58  ;;  %v5091_v18 = vunpack.i.l.bf16 %v8251_v61  ;;  %v3903_v13 = vsel %vm333_vm0, %v8481_v23, %v5082_v52 }
 0x528   : > { %5359 = vrot.lane.b32.xlu2 %v9988_v55, %s5585_s29  ;;  %v5166_v55 = vunpack.i.l.bf16 %v8462_v7  ;;  %v5383_v23 = vpack.i.bf16 %v8069_v62, %v8572_v31 }
 0x529   : > { %v5155_v22 = vpop.permute.xlu0 %5154 }
 0x52a   : > { %v5157_v16 = vunpack.i.h.bf16 %v5155_v22  ;;  %v5156_v19 = vunpack.i.l.bf16 %v5155_v22  ;;  %5369 = vrot.lane.b32.xlu1 %v8058_v33, %s5582_s18  ;;  %v8557_v56 = vpop.permute.xlu2 %5194 }
 0x52c   : > { %v8560_v35 = vsel %vm1997_vm9, %v3900_v53, %v5156_v19  ;;  %v8563_v58 = vsel %vm1997_vm9, %v3901_v50, %v5157_v16  ;;  %v5160_v40 = vpop.permute.xlu1 %5159  ;;  %4951 = vmatmul.msk.f32.gmra.mxu2 %vm333_vm0, %v8151_v14  ;;  %v3874_v19 = vsel %vm333_vm0, %v2690_v63, %v5011_v41  ;;  %v2845_v14 = vld [vmem:[#allocation2 + $0x159] sm:$0xff] }
 0x52d   : > { %v5162_v17 = vunpack.i.h.bf16 %v5160_v40  ;;  %v5161_v33 = vunpack.i.l.bf16 %v5160_v40  ;;  %v3906_v53 = vsel %vm1997_vm9, %v3874_v19, %v5091_v18  ;;  %v8599_v40 = vpop.f32.mrf.mxu2  ;;  %v5393_v41 = vpack.i.bf16 %v2845_v14, %v2831_v37  ;;  %v2691_v18 = vld [vmem:[#allocation2 + $0x8] sm:$0xff]  ;;  %v2941_v14 = vld [vmem:[#allocation2 + $0x171] sm:$0xff] }
 0x52e   : > { %v3939_v6 = vsel %vm3938_vm14, %v3906_v53, %v5166_v55  ;;  %v5181_v55 = vunpack.i.l.bf16 %v8513_v47  ;;  %v5398_v19 = vpack.i.bf16 %v8153_v43, %v8103_v3  ;;  %v2927_v37 = vld [vmem:[#allocation2 + $0xc9] sm:$0xff]  ;;  %v5016_v3 = vunpack.i.l.bf16 %v8186_v38 }
 0x52f   : > { %5379 = vrot.lane.b32.xlu0 %v8569_v45, %s5586_s11  ;;  %v8585_v22 = vsel %vm1997_vm9, %v3902_v29, %v5161_v33  ;;  %v8588_v16 = vsel %vm1997_vm9, %v3903_v13, %v5162_v17  ;;  %v5012_v33 = vunpack.i.h.bf16 %v8206_v32  ;;  %v5092_v13 = vunpack.i.h.bf16 %v8251_v61 }
 0x530   : > { %5374 = vrot.lane.b32.xlu2 %v5373_v27, %s5584_s28  ;;  %v5167_v29 = vunpack.i.h.bf16 %v8462_v7 }
 0x531   : > { %v5170_v49 = vpop.permute.xlu0 %5169  ;;  %v3875_v61 = vsel %vm333_vm0, %v2691_v18, %v5012_v33  ;;  %v5408_v18 = vpack.i.bf16 %v2941_v14, %v2927_v37  ;;  %v8637_v37 = vld [vmem:[#allocation2 + $0x16a] sm:$0xff] }
 0x532   : > { %v5171_v50 = vunpack.i.l.bf16 %v5170_v49  ;;  %5384 = vrot.lane.b32.xlu1 %v5383_v23, %s5585_s29  ;;  %v8596_v52 = vpop.permute.xlu2 %5209  ;;  %v5172_v23 = vunpack.i.h.bf16 %v5170_v49  ;;  %v3907_v7 = vsel %vm1997_vm9, %v3875_v61, %v5092_v13  ;;  %v2846_v14 = vld [vmem:[#allocation2 + $0x169] sm:$0xff] }
 0x534   : > { %v5175_v62 = vpop.permute.xlu1 %5174  ;;  %v3972_v17 = vsel %vm3971_vm15, %v3939_v6, %v5171_v50  ;;  %4952 = vmatmul.msk.f32.gmra.mxu2 %vm333_vm0, %v8153_v43  ;;  %v8621_v43 = vld [vmem:[#allocation2 + $0x170] sm:$0xff] }
 0x535   : > { %v5176_v63 = vunpack.i.l.bf16 %v5175_v62  ;;  %v5177_v6 = vunpack.i.h.bf16 %v5175_v62  ;;  %v5403_v38 = vpack.i.bf16 %v8621_v43, %v8479_v36  ;;  %v5196_v36 = vunpack.i.l.bf16 %v8557_v56 }
 0x537   : > { %5394 = vrot.lane.b32.xlu0 %v5393_v41, %s5582_s18  ;;  %v4005_v27 = vsel %vm4004_vm1, %v3972_v17, %v5176_v63  ;;  %v5096_v41 = vunpack.i.l.bf16 %v8335_v34  ;;  %v5182_v34 = vunpack.i.h.bf16 %v8513_v47 }
 0x538   : > { %5389 = vrot.lane.b32.xlu2 %v8503_v30, %s5583_s27  ;;  %v4038_v49 = vsel %vm4037_vm2, %v4005_v27, %v5181_v55  ;;  %v3940_v30 = vsel %vm3938_vm14, %v3907_v7, %v5167_v29  ;;  %v3876_v27 = vsel %vm333_vm0, %v8162_v42, %v5016_v3 }
 0x539   : > { %v5185_v32 = vpop.permute.xlu0 %5184  ;;  %v3973_v33 = vsel %vm3971_vm15, %v3940_v30, %v5172_v23  ;;  %v3908_v55 = vsel %vm1997_vm9, %v3876_v27, %v5096_v41 }
 0x53a   : > { %v5186_v50 = vunpack.i.l.bf16 %v5185_v32  ;;  %5399 = vrot.lane.b32.xlu1 %v5398_v19, %s5584_s28  ;;  %v8617_v53 = vpop.permute.xlu2 %5224  ;;  %v5187_v29 = vunpack.i.h.bf16 %v5185_v32  ;;  %v4006_v62 = vsel %vm4004_vm1, %v3973_v33, %v5177_v6 }
 0x53b   : > { %v4039_v32 = vsel %vm4037_vm2, %v4006_v62, %v5182_v34 }
 0x53c   : > { %v4071_v17 = vsel %vm4070_vm3, %v4038_v49, %v5186_v50  ;;  %v5190_v63 = vpop.permute.xlu1 %5189  ;;  %v2864_v50 = vld [vmem:[#allocation2 + $0xc2] sm:$0xff]  ;;  %v4072_v47 = vsel %vm4070_vm3, %v4039_v32, %v5187_v29  ;;  %v5211_v29 = vunpack.i.l.bf16 %v8596_v52 }
 0x53d   : > { %4237 = vmatmul.f32.vlgmr.msra.gmra.mxu1 %v4071_v17  ;;  %v5191_v13 = vunpack.i.l.bf16 %v5190_v63  ;;  %v5423_v49 = vpack.i.bf16 %v8637_v37, %v2864_v50  ;;  %v5192_v30 = vunpack.i.h.bf16 %v5190_v63  ;;  %v2910_v17 = vld [vmem:[#allocation2 + $0x180] sm:$0xff] }
 0x53e   : > { %v5428_v33 = vpack.i.bf16 %v2910_v17, %v8347_v26  ;;  %v2928_v26 = vld [vmem:[#allocation2 + $0xd9] sm:$0xff] }
 0x53f   : > { %5409 = vrot.lane.b32.xlu0 %v5408_v18, %s5585_s29  ;;  %v3941_v19 = vsel %vm3938_vm14, %v3908_v55, %v5191_v13  ;;  %v3942_v63 = vsel %vm3938_vm14, %v8352_v2, %v5192_v30  ;;  %v5197_v55 = vunpack.i.h.bf16 %v8557_v56  ;;  %v8676_v17 = vld [vmem:[#allocation2 + $0x172] sm:$0xff] }
 0x540   : > { %5404 = vrot.lane.b32.xlu2 %v5403_v38, %s5586_s11  ;;  %v3974_v3 = vsel %vm3971_vm15, %v3941_v19, %v5196_v36  ;;  %v2942_v19 = vld [vmem:[#allocation2 + $0x181] sm:$0xff] }
 0x541   : > { %v5200_v23 = vpop.permute.xlu0 %5199  ;;  %v3975_v36 = vsel %vm3971_vm15, %v3942_v63, %v5197_v55  ;;  %v5433_v2 = vpack.i.bf16 %v2942_v19, %v2928_v26  ;;  %v2929_v63 = vld [vmem:[#allocation2 + $0xe1] sm:$0xff] }
 0x542   : > { %v5201_v61 = vunpack.i.l.bf16 %v5200_v23  ;;  %5414 = vrot.lane.b32.xlu1 %v8569_v45, %s5583_s27  ;;  %v8642_v42 = vpop.permute.xlu2 %5239  ;;  %v5418_v45 = vpack.i.bf16 %v2846_v14, %v8572_v31  ;;  %v5202_v62 = vunpack.i.h.bf16 %v5200_v23 }
 0x544   : > { %v5205_v7 = vpop.permute.xlu1 %5204  ;;  %v4007_v41 = vsel %vm4004_vm1, %v3974_v3, %v5201_v61  ;;  %v8670_v3 = vld [vmem:[#allocation2 + $0x188] sm:$0xff] }
 0x545   : > { %4240 = vmatmul.f32.gmra.mxu1 %v4072_v47  ;;  %v5206_v6 = vunpack.i.l.bf16 %v5205_v7  ;;  %v5207_v61 = vunpack.i.h.bf16 %v5205_v7  ;;  %v4008_v47 = vsel %vm4004_vm1, %v3975_v36, %v5202_v62 }
 0x547   : > { %5424 = vrot.lane.b32.xlu0 %v5423_v49, %s5584_s28  ;;  %v4040_v27 = vsel %vm4037_vm2, %v4007_v41, %v5206_v6  ;;  %v4041_v14 = vsel %vm4037_vm2, %v4008_v47, %v5207_v61  ;;  %v5212_v49 = vunpack.i.h.bf16 %v8596_v52  ;;  %v2865_v6 = vld [vmem:[#allocation2 + $0xca] sm:$0xff]  ;;  %v5453_v52 = vpack.i.bf16 %v8670_v3, %v8349_v24 }
 0x548   : > { %5419 = vrot.lane.b32.xlu2 %v5418_v45, %s5582_s18  ;;  %v4073_v31 = vsel %vm4070_vm3, %v4040_v27, %v5211_v29  ;;  %v5448_v62 = vpack.i.bf16 %v8676_v17, %v2865_v6 }
 0x549   : > { %v5215_v13 = vpop.permute.xlu0 %5214 }
 0x54a   : > { %5429 = vrot.lane.b32.xlu1 %v5428_v33, %s5586_s11  ;;  %v8659_v34 = vpop.permute.xlu2 %5254  ;;  %v5216_v32 = vunpack.i.l.bf16 %v5215_v13  ;;  %v5217_v29 = vunpack.i.h.bf16 %v5215_v13 }
 0x54c   : > { %v5220_v50 = vpop.permute.xlu1 %5219  ;;  %v3943_v7 = vsel %vm3938_vm14, %v8378_v28, %v5216_v32  ;;  %v5226_v28 = vunpack.i.l.bf16 %v8617_v53  ;;  %v3944_v13 = vsel %vm3938_vm14, %v8381_v0, %v5217_v29  ;;  %v5463_v0 = vpack.i.bf16 %v8676_v17, %v8637_v37  ;;  %v8718_v29 = vld [vmem:[#allocation2 + $0x182] sm:$0xff] }
 0x54d   : > { %4243 = vmatmul.f32.gmra.mxu1 %v4073_v31  ;;  %v5221_v56 = vunpack.i.l.bf16 %v5220_v50  ;;  %v5222_v26 = vunpack.i.h.bf16 %v5220_v50 }
 0x54f   : > { %5439 = vrot.lane.b32.xlu0 %v5403_v38, %s5583_s27  ;;  %v4074_v38 = vsel %vm4070_vm3, %v4041_v14, %v5212_v49  ;;  %v3976_v27 = vsel %vm3971_vm15, %v3943_v7, %v5221_v56  ;;  %v3977_v50 = vsel %vm3971_vm15, %v3944_v13, %v5222_v26  ;;  %v5227_v14 = vunpack.i.h.bf16 %v8617_v53  ;;  %v2912_v53 = vld [vmem:[#allocation2 + $0x198] sm:$0xff] }
 0x550   : > { %5434 = vrot.lane.b32.xlu2 %v5433_v2, %s5585_s29  ;;  %v4009_v31 = vsel %vm4004_vm1, %v3976_v27, %v5226_v28  ;;  %v5241_v49 = vunpack.i.l.bf16 %v8642_v42  ;;  %v2866_v28 = vld [vmem:[#allocation2 + $0xda] sm:$0xff]  ;;  %v5242_v26 = vunpack.i.h.bf16 %v8642_v42 }
 0x551   : > { %v5230_v23 = vpop.permute.xlu0 %5229 }
 0x552   : > { %5444 = vrot.lane.b32.xlu1 %v5408_v18, %s5582_s18  ;;  %v8673_v30 = vpop.permute.xlu2 %5269  ;;  %v5231_v45 = vunpack.i.l.bf16 %v5230_v23  ;;  %v2943_v18 = vld [vmem:[#allocation2 + $0x189] sm:$0xff]  ;;  %v5232_v47 = vunpack.i.h.bf16 %v5230_v23  ;;  %v3945_v37 = vsel %vm3938_vm14, %v8287_v25, %v5241_v49  ;;  %v5478_v25 = vpack.i.bf16 %v8718_v29, %v2866_v28 }
 0x553   : > { %v8685_v19 = vpack.i.bf16 %v2943_v18, %v2929_v63  ;;  %v5272_v49 = vunpack.i.h.bf16 %v8673_v30 }
 0x554   : > { %v5235_v41 = vpop.permute.xlu1 %5234  ;;  %v4042_v61 = vsel %vm4037_vm2, %v4009_v31, %v5231_v45  ;;  %v2944_v31 = vld [vmem:[#allocation2 + $0x199] sm:$0xff] }
 0x555   : > { %4246 = vmatmul.f32.gmra.mxu1 %v4074_v38  ;;  %v5236_v55 = vunpack.i.l.bf16 %v5235_v41  ;;  %v5237_v7 = vunpack.i.h.bf16 %v5235_v41  ;;  %v4010_v38 = vsel %vm4004_vm1, %v3977_v50, %v5227_v14 }
 0x556   : > { %v4043_v45 = vsel %vm4037_vm2, %v4010_v38, %v5232_v47 }
 0x557   : > { %5454 = vrot.lane.b32.xlu0 %v5453_v52, %s5586_s11  ;;  %v4075_v32 = vsel %vm4070_vm3, %v4042_v61, %v5236_v55  ;;  %v8709_v52 = vld [vmem:[#allocation2 + $0xf0] sm:$0xff]  ;;  %v4076_v27 = vsel %vm4070_vm3, %v4043_v45, %v5237_v7  ;;  %v2803_v45 = vld [vmem:[#allocation2 + $0xe0] sm:$0xff] }
 0x558   : > { %5449 = vrot.lane.b32.xlu2 %v5448_v62, %s5584_s28  ;;  %v5483_v62 = vpack.i.bf16 %v2912_v53, %v8709_v52 }
 0x559   : > { %v5245_v24 = vpop.permute.xlu0 %5244 }
 0x55a   : > { %5459 = vrot.lane.b32.xlu1 %v8685_v19, %s5585_s29  ;;  %v8693_v36 = vpop.permute.xlu2 %5284  ;;  %v5246_v6 = vunpack.i.l.bf16 %v5245_v24  ;;  %v5247_v47 = vunpack.i.h.bf16 %v5245_v24  ;;  %v3946_v24 = vsel %vm3938_vm14, %v8284_v10, %v5242_v26 }
 0x55b   : > { %v5287_v10 = vunpack.i.h.bf16 %v8693_v36 }
 0x55c   : > { %v8696_v56 = vpop.permute.xlu1 %5249  ;;  %v3978_v63 = vsel %vm3971_vm15, %v3945_v37, %v5246_v6  ;;  %v3979_v37 = vsel %vm3971_vm15, %v3946_v24, %v5247_v47  ;;  %v2913_v24 = vld [vmem:[#allocation2 + $0x1a0] sm:$0xff] }
 0x55d   : > { %4249 = vmatmul.f32.gmra.mxu1 %v4075_v32  ;;  %v5251_v41 = vunpack.i.l.bf16 %v8696_v56  ;;  %v5256_v32 = vunpack.i.l.bf16 %v8659_v34  ;;  %v5252_v6 = vunpack.i.h.bf16 %v8696_v56  ;;  %v5493_v56 = vpack.i.bf16 %v8670_v3, %v2803_v45 }
 0x55f   : > { %5469 = vrot.lane.b32.xlu0 %v5428_v33, %s5583_s27  ;;  %v4011_v13 = vsel %vm4004_vm1, %v3978_v63, %v5251_v41  ;;  %v4012_v26 = vsel %vm4004_vm1, %v3979_v37, %v5252_v6 }
 0x560   : > { %5464 = vrot.lane.b32.xlu2 %v5463_v0, %s5581_s22  ;;  %v4044_v38 = vsel %vm4037_vm2, %v4011_v13, %v5256_v32 }
 0x561   : > { %v8706_v23 = vpop.permute.xlu0 %5259 }
 0x562   : > { %5474 = vrot.lane.b32.xlu1 %v5433_v2, %s5582_s18  ;;  %v8712_v33 = vpop.permute.xlu2 %5299  ;;  %v8722_v2 = vld [vmem:[#allocation2 + $0xf1] sm:$0xff]  ;;  %v5261_v61 = vunpack.i.l.bf16 %v8706_v23 }
 0x563   : > { %v5488_v14 = vpack.i.bf16 %v2944_v31, %v8722_v2  ;;  %v5262_v31 = vunpack.i.h.bf16 %v8706_v23  ;;  %v2931_v23 = vld [vmem:[#allocation2 + $0xf9] sm:$0xff] }
 0x564   : > { %v5265_v18 = vpop.permute.xlu1 %5264 }
 0x565   : > { %4252 = vmatmul.f32.gmra.mxu1 %v4076_v27  ;;  %v5267_v55 = vunpack.i.h.bf16 %v5265_v18  ;;  %v5266_v28 = vunpack.i.l.bf16 %v5265_v18 }
 0x567   : > { %5484 = vrot.lane.b32.xlu0 %v5483_v62, %s5586_s11  ;;  %v3961_v50 = vsel %vm3938_vm14, %v8536_v59, %v5267_v55  ;;  %v4077_v59 = vsel %vm4070_vm3, %v4044_v38, %v5261_v61  ;;  %v2867_v62 = vld [vmem:[#allocation2 + $0xe2] sm:$0xff]  ;;  %v8746_v55 = vld [vmem:[#allocation2 + $0x18a] sm:$0xff]  ;;  %v5257_v61 = vunpack.i.h.bf16 %v8659_v34  ;;  %v2805_v38 = vld [vmem:[#allocation2 + $0xf8] sm:$0xff] }
 0x568   : > { %5479 = vrot.lane.b32.xlu2 %v5478_v25, %s5584_s28  ;;  %v3994_v53 = vsel %vm3971_vm15, %v3961_v50, %v5272_v49  ;;  %v5503_v18 = vpack.i.bf16 %v8746_v55, %v2867_v62  ;;  %v2945_v50 = vld [vmem:[#allocation2 + $0x1a1] sm:$0xff] }
 0x569   : > { %v5275_v0 = vpop.permute.xlu0 %5274  ;;  %v4045_v49 = vsel %vm4037_vm2, %v4012_v26, %v5257_v61  ;;  %v2868_v26 = vld [vmem:[#allocation2 + $0xf2] sm:$0xff]  ;;  %v2869_v61 = vld [vmem:[#allocation2 + $0xfa] sm:$0xff] }
 0x56a   : > { %v5277_v7 = vunpack.i.h.bf16 %v5275_v0  ;;  %5489 = vrot.lane.b32.xlu1 %v5488_v14, %s5585_s29  ;;  %v8736_v42 = vpop.permute.xlu2 %5314  ;;  %v5276_v47 = vunpack.i.l.bf16 %v5275_v0  ;;  %v5271_v14 = vunpack.i.l.bf16 %v8673_v30 }
 0x56c   : > { %v5280_v41 = vpop.permute.xlu1 %5279  ;;  %v4027_v27 = vsel %vm4004_vm1, %v3994_v53, %v5277_v7  ;;  %v4078_v7 = vsel %vm4070_vm3, %v4045_v49, %v5262_v31  ;;  %v2901_v49 = vld [vmem:[#allocation2 + $0x110] sm:$0xff] }
 0x56d   : > { %4255 = vmatmul.f32.gmra.mxu1 %v4077_v59  ;;  %v5282_v63 = vunpack.i.h.bf16 %v5280_v41  ;;  %v5281_v6 = vunpack.i.l.bf16 %v5280_v41 }
 0x56f   : > { %5499 = vrot.lane.b32.xlu0 %v8685_v19, %s5582_s18  ;;  %v4060_v25 = vsel %vm4037_vm2, %v4027_v27, %v5282_v63  ;;  %v3947_v19 = vsel %vm3938_vm14, %v8408_v60, %v5266_v28  ;;  %v5513_v60 = vpack.i.bf16 %v2945_v50, %v2931_v23  ;;  %v5508_v27 = vpack.i.bf16 %v2913_v24, %v2805_v38 }
 0x570   : > { %5494 = vrot.lane.b32.xlu2 %v5493_v56, %s5583_s27  ;;  %v4093_v13 = vsel %vm4070_vm3, %v4060_v25, %v5287_v10  ;;  %v3980_v0 = vsel %vm3971_vm15, %v3947_v19, %v5271_v14  ;;  %v5518_v63 = vpack.i.bf16 %v2805_v38, %v8709_v52  ;;  %v5286_v56 = vunpack.i.l.bf16 %v8693_v36  ;;  %v2900_v14 = vld [vmem:[#allocation2 + $0x108] sm:$0xff] }
 0x571   : > { %v5290_v32 = vpop.permute.xlu0 %5289  ;;  %4303 = vmatmul.f32.vlgmr.msrb.gmra.mxu3 %v4093_v13  ;;  %v4013_v37 = vsel %vm4004_vm1, %v3980_v0, %v5276_v47  ;;  %v5528_v47 = vpack.i.bf16 %v2869_v61, %v2868_v26  ;;  %v5523_v38 = vpack.i.bf16 %v2931_v23, %v8722_v2  ;;  %v5316_v24 = vunpack.i.l.bf16 %v8736_v42 }
 0x572   : > { %v5292_v3 = vunpack.i.h.bf16 %v5290_v32  ;;  %5504 = vrot.lane.b32.xlu1 %v5503_v18, %s5584_s28  ;;  %v8763_v34 = vpop.permute.xlu2 %5329  ;;  %v5291_v53 = vunpack.i.l.bf16 %v5290_v32  ;;  %v4046_v62 = vsel %vm4037_vm2, %v4013_v37, %v5281_v6  ;;  %v5533_v0 = vpack.i.bf16 %v2901_v49, %v2900_v14  ;;  %v2870_v14 = vld [vmem:[#allocation2 + $0x10a] sm:$0xff] }
 0x573   : > { %v4079_v18 = vsel %vm4070_vm3, %v4046_v62, %v5286_v56  ;;  %v3949_v2 = vsel %vm3938_vm14, %v8443_v21, %v5316_v24 }
 0x574   : > { %v5295_v59 = vpop.permute.xlu1 %5294  ;;  %v3962_v30 = vsel %vm3938_vm14, %v8539_v51, %v5292_v3  ;;  %v5302_v51 = vunpack.i.h.bf16 %v8712_v33  ;;  %v3948_v31 = vsel %vm3938_vm14, %v8411_v4, %v5291_v53  ;;  %v5301_v4 = vunpack.i.l.bf16 %v8712_v33 }
 0x575   : > { %4258 = vmatmul.f32.gmra.mxu1 %v4078_v7  ;;  %v5297_v45 = vunpack.i.h.bf16 %v5295_v59  ;;  %v5296_v28 = vunpack.i.l.bf16 %v5295_v59  ;;  %v5317_v7 = vunpack.i.h.bf16 %v8736_v42 }
 0x577   : > { %5514 = vrot.lane.b32.xlu0 %v5513_v60, %s5585_s29  ;;  %v3995_v10 = vsel %vm3971_vm15, %v3962_v30, %v5297_v45  ;;  %v3981_v3 = vsel %vm3971_vm15, %v3948_v31, %v5296_v28  ;;  %v3963_v42 = vsel %vm3938_vm14, %v8429_v48, %v5317_v7  ;;  %v2839_v28 = vld [vmem:[#allocation2 + $0x111] sm:$0xff]  ;;  %v5332_v48 = vunpack.i.h.bf16 %v8763_v34 }
 0x578   : > { %5509 = vrot.lane.b32.xlu2 %v5508_v27, %s5586_s11  ;;  %v4028_v13 = vsel %vm4004_vm1, %v3995_v10, %v5302_v51  ;;  %v4014_v60 = vsel %vm4004_vm1, %v3981_v3, %v5301_v4  ;;  %v2838_v27 = vld [vmem:[#allocation2 + $0x109] sm:$0xff] }
 0x579   : > { %v5305_v41 = vpop.permute.xlu0 %5304  ;;  %v5548_v51 = vpack.i.bf16 %v2839_v28, %v2838_v27  ;;  %v2871_v28 = vld [vmem:[#allocation2 + $0x112] sm:$0xff] }
 0x57a   : > { %v5307_v25 = vunpack.i.h.bf16 %v5305_v41  ;;  %5519 = vrot.lane.b32.xlu1 %v5518_v63, %s5583_s27  ;;  %v8781_v52 = vpop.permute.xlu2 %5344  ;;  %v5306_v19 = vunpack.i.l.bf16 %v5305_v41 }
 0x57b   : > { %v5347_v24 = vunpack.i.h.bf16 %v8781_v52 }
 0x57c   : > { %v5310_v32 = vpop.permute.xlu1 %5309  ;;  %v4061_v36 = vsel %vm4037_vm2, %v4028_v13, %v5307_v25  ;;  %v4047_v45 = vsel %vm4037_vm2, %v4014_v60, %v5306_v19  ;;  %v5331_v25 = vunpack.i.l.bf16 %v8763_v34 }
 0x57d   : > { %4261 = vmatmul.f32.gmra.mxu1 %v4079_v18  ;;  %v5312_v50 = vunpack.i.h.bf16 %v5310_v32  ;;  %v5311_v6 = vunpack.i.l.bf16 %v5310_v32 }
 0x57f   : > { %5529 = vrot.lane.b32.xlu0 %v5528_v47, %s5584_s28  ;;  %v4094_v59 = vsel %vm4070_vm3, %v4061_v36, %v5312_v50  ;;  %v4080_v23 = vsel %vm4070_vm3, %v4047_v45, %v5311_v6  ;;  %v2902_v50 = vld [vmem:[#allocation2 + $0x120] sm:$0xff]  ;;  %v5346_v6 = vunpack.i.l.bf16 %v8781_v52 }
 0x580   : > { %4306 = vmatmul.f32.gmra.mxu3 %v4094_v59  ;;  %5524 = vrot.lane.b32.xlu2 %v5523_v38, %s5582_s18  ;;  %v2934_v59 = vld [vmem:[#allocation2 + $0x121] sm:$0xff] }
 0x581   : > { %v5320_v33 = vpop.permute.xlu0 %5319 }
 0x582   : > { %v5322_v30 = vunpack.i.h.bf16 %v5320_v33  ;;  %v5321_v53 = vunpack.i.l.bf16 %v5320_v33  ;;  %5534 = vrot.lane.b32.xlu1 %v5533_v0, %s5586_s11  ;;  %v8797_v37 = vpop.permute.xlu2 %5359 }
 0x583   : > { %v5362_v52 = vunpack.i.h.bf16 %v8797_v37  ;;  %v5361_v27 = vunpack.i.l.bf16 %v8797_v37 }
 0x584   : > { %v5325_v63 = vpop.permute.xlu1 %5324  ;;  %v3982_v41 = vsel %vm3971_vm15, %v3949_v2, %v5321_v53  ;;  %v3996_v62 = vsel %vm3971_vm15, %v3963_v42, %v5322_v30 }
 0x585   : > { %4264 = vmatmul.f32.gmra.mxu1 %v4080_v23  ;;  %v5327_v10 = vunpack.i.h.bf16 %v5325_v63  ;;  %v5326_v56 = vunpack.i.l.bf16 %v5325_v63  ;;  %v2903_v23 = vld [vmem:[#allocation2 + $0x128] sm:$0xff] }
 0x587   : > { %5544 = vrot.lane.b32.xlu0 %v5533_v0, %s5583_s27  ;;  %v4015_v21 = vsel %vm4004_vm1, %v3982_v41, %v5326_v56  ;;  %v4029_v31 = vsel %vm4004_vm1, %v3996_v62, %v5327_v10 }
 0x588   : > { %5539 = vrot.lane.b32.xlu2 %v5548_v51, %s5585_s29  ;;  %v4048_v32 = vsel %vm4037_vm2, %v4015_v21, %v5331_v25  ;;  %v4062_v19 = vsel %vm4037_vm2, %v4029_v31, %v5332_v48 }
 0x589   : > { %v5335_v26 = vpop.permute.xlu0 %5334 }
 0x58a   : > { %v5337_v61 = vunpack.i.h.bf16 %v5335_v26  ;;  %v5336_v18 = vunpack.i.l.bf16 %v5335_v26  ;;  %5549 = vrot.lane.b32.xlu1 %v5548_v51, %s5582_s18  ;;  %v8813_v13 = vpop.permute.xlu2 %5374  ;;  %v2935_v51 = vld [vmem:[#allocation2 + $0x129] sm:$0xff] }
 0x58c   : > { %v4081_v36 = vsel %vm4070_vm3, %v4048_v32, %v5336_v18  ;;  %v4095_v47 = vsel %vm4070_vm3, %v4062_v19, %v5337_v61  ;;  %v5340_v3 = vpop.permute.xlu1 %5339 }
 0x58d   : > { %4267 = vmatmul.f32.gmra.mxu1 %v4081_v36  ;;  %4309 = vmatmul.f32.gmra.mxu3 %v4095_v47  ;;  %v5342_v34 = vunpack.i.h.bf16 %v5340_v3  ;;  %v5341_v4 = vunpack.i.l.bf16 %v5340_v3  ;;  %v5377_v47 = vunpack.i.h.bf16 %v8813_v13  ;;  %v5376_v3 = vunpack.i.l.bf16 %v8813_v13 }
 0x58f   : > { %3690 = vrot.lane.b32.xlu0 %v2902_v50, %s5586_s11  ;;  %v3950_v49 = vsel %vm3938_vm14, %v8446_v15, %v5341_v4  ;;  %v3964_v7 = vsel %vm3938_vm14, %v8426_v46, %v5342_v34 }
 0x590   : > { %3562 = vrot.lane.b32.xlu2 %v2870_v14, %s5584_s28  ;;  %v3983_v45 = vsel %vm3971_vm15, %v3950_v49, %v5346_v6  ;;  %v3997_v15 = vsel %vm3971_vm15, %v3964_v7, %v5347_v24 }
 0x591   : > { %v5350_v38 = vpop.permute.xlu0 %5349 }
 0x592   : > { %v5352_v60 = vunpack.i.h.bf16 %v5350_v38  ;;  %v5351_v0 = vunpack.i.l.bf16 %v5350_v38  ;;  %3818 = vrot.lane.b32.xlu1 %v2934_v59, %s5585_s29  ;;  %v5390_v33 = vpop.permute.xlu2 %5389 }
 0x593   : > { %v5392_v6 = vunpack.i.h.bf16 %v5390_v33  ;;  %v5391_v59 = vunpack.i.l.bf16 %v5390_v33 }
 0x594   : > { %v5355_v30 = vpop.permute.xlu1 %5354  ;;  %v4016_v46 = vsel %vm4004_vm1, %v3983_v45, %v5351_v0  ;;  %v4030_v53 = vsel %vm4004_vm1, %v3997_v15, %v5352_v60 }
 0x595   : > { %v5357_v2 = vunpack.i.h.bf16 %v5355_v30  ;;  %v5356_v42 = vunpack.i.l.bf16 %v5355_v30  ;;  %v9989_v30 = vld [vmem:[#allocation3_spill] sm:$0xff] }
 0x597   : > { %3692 = vrot.lane.b32.xlu0 %v2903_v23, %s5586_s11  ;;  %v4049_v63 = vsel %vm4037_vm2, %v4016_v46, %v5356_v42  ;;  %v4063_v41 = vsel %vm4037_vm2, %v4030_v53, %v5357_v2  ;;  %v3952_v46 = vsel %vm3938_vm14, %v9989_v30, %v5391_v59  ;;  %v3966_v53 = vsel %vm3938_vm14, %v8563_v58, %v5392_v6 }
 0x598   : > { %3564 = vrot.lane.b32.xlu2 %v2871_v28, %s5584_s28  ;;  %v4082_v62 = vsel %vm4070_vm3, %v4049_v63, %v5361_v27  ;;  %v4096_v10 = vsel %vm4070_vm3, %v4063_v41, %v5362_v52  ;;  %v8863_v41 = vpop.f32.mrf.mxu2 }
 0x599   : > { %v5365_v56 = vpop.permute.xlu0 %5364  ;;  %4270 = vmatmul.f32.gmra.mxu1 %v4082_v62  ;;  %4312 = vmatmul.f32.gmra.mxu3 %v4096_v10 }
 0x59a   : > { %v5367_v21 = vunpack.i.h.bf16 %v5365_v56  ;;  %v5366_v31 = vunpack.i.l.bf16 %v5365_v56  ;;  %3820 = vrot.lane.b32.xlu1 %v2935_v51, %s5585_s29  ;;  %v5405_v37 = vpop.permute.xlu2 %5404 }
 0x59b   : > { %v5407_v62 = vunpack.i.h.bf16 %v5405_v37  ;;  %v5406_v10 = vunpack.i.l.bf16 %v5405_v37 }
 0x59c   : > { %v5370_v48 = vpop.permute.xlu1 %5369  ;;  %v3951_v61 = vsel %vm3938_vm14, %v8319_v44, %v5366_v31  ;;  %v3965_v18 = vsel %vm3938_vm14, %v8560_v35, %v5367_v21 }
 0x59d   : > { %v5372_v25 = vunpack.i.h.bf16 %v5370_v48  ;;  %v5371_v26 = vunpack.i.l.bf16 %v5370_v48 }
 0x59f   : > { %v3984_v19 = vsel %vm3971_vm15, %v3951_v61, %v5371_v26  ;;  %v3998_v36 = vsel %vm3971_vm15, %v3965_v18, %v5372_v25 }
 0x5a0   : > { %v4017_v14 = vsel %vm4004_vm1, %v3984_v19, %v5376_v3  ;;  %v4031_v49 = vsel %vm4004_vm1, %v3998_v36, %v5377_v47 }
 0x5a1   : > { %v5380_v32 = vpop.permute.xlu0 %5379 }
 0x5a2   : > { %v5382_v34 = vunpack.i.h.bf16 %v5380_v32  ;;  %v5381_v4 = vunpack.i.l.bf16 %v5380_v32  ;;  %v5420_v50 = vpop.permute.xlu2 %5419 }
 0x5a3   : > { %v5422_v47 = vunpack.i.h.bf16 %v5420_v50  ;;  %v5421_v3 = vunpack.i.l.bf16 %v5420_v50 }
 0x5a4   : > { %v5385_v44 = vpop.permute.xlu1 %5384  ;;  %v4050_v7 = vsel %vm4037_vm2, %v4017_v14, %v5381_v4  ;;  %v4064_v35 = vsel %vm4037_vm2, %v4031_v49, %v5382_v34  ;;  %v8873_v14 = vpop.f32.mrf.mxu2 }
 0x5a5   : > { %v5387_v38 = vunpack.i.h.bf16 %v5385_v44  ;;  %v5386_v24 = vunpack.i.l.bf16 %v5385_v44 }
 0x5a7   : > { %v4083_v60 = vsel %vm4070_vm3, %v4050_v7, %v5386_v24  ;;  %v4097_v13 = vsel %vm4070_vm3, %v4064_v35, %v5387_v38 }
 0x5a8   : > { %4273 = vmatmul.f32.gmra.mxu1 %v4083_v60  ;;  %4315 = vmatmul.f32.gmra.mxu3 %v4097_v13 }
 0x5a9   : > { %v5395_v0 = vpop.permute.xlu0 %5394 }
 0x5aa   : > { %v5397_v45 = vunpack.i.h.bf16 %v5395_v0  ;;  %v5396_v15 = vunpack.i.l.bf16 %v5395_v0  ;;  %v5435_v27 = vpop.permute.xlu2 %5434 }
 0x5ab   : > { %v5437_v6 = vunpack.i.h.bf16 %v5435_v27 }
 0x5ac   : > { %v5400_v2 = vpop.permute.xlu1 %5399  ;;  %v3985_v42 = vsel %vm3971_vm15, %v3952_v46, %v5396_v15  ;;  %v3999_v33 = vsel %vm3971_vm15, %v3966_v53, %v5397_v45  ;;  %v8885_v46 = vpop.f32.mrf.mxu2 }
 0x5ad   : > { %v5402_v23 = vunpack.i.h.bf16 %v5400_v2  ;;  %v5401_v52 = vunpack.i.l.bf16 %v5400_v2 }
 0x5af   : > { %v4018_v28 = vsel %vm4004_vm1, %v3985_v42, %v5401_v52  ;;  %v4032_v63 = vsel %vm4004_vm1, %v3999_v33, %v5402_v23 }
 0x5b0   : > { %v4051_v58 = vsel %vm4037_vm2, %v4018_v28, %v5406_v10  ;;  %v4065_v31 = vsel %vm4037_vm2, %v4032_v63, %v5407_v62 }
 0x5b1   : > { %v5410_v56 = vpop.permute.xlu0 %5409 }
 0x5b2   : > { %v5412_v51 = vunpack.i.h.bf16 %v5410_v56  ;;  %v5411_v21 = vunpack.i.l.bf16 %v5410_v56  ;;  %v5450_v32 = vpop.permute.xlu2 %5449 }
 0x5b3   : > { %v5452_v63 = vunpack.i.h.bf16 %v5450_v32  ;;  %v5451_v62 = vunpack.i.l.bf16 %v5450_v32 }
 0x5b4   : > { %v4084_v48 = vsel %vm4070_vm3, %v4051_v58, %v5411_v21  ;;  %v4098_v25 = vsel %vm4070_vm3, %v4065_v31, %v5412_v51  ;;  %v5415_v26 = vpop.permute.xlu1 %5414 }
 0x5b5   : > { %4276 = vmatmul.f32.gmra.mxu1 %v4084_v48  ;;  %4318 = vmatmul.f32.gmra.mxu3 %v4098_v25  ;;  %v5417_v61 = vunpack.i.h.bf16 %v5415_v26  ;;  %v5416_v18 = vunpack.i.l.bf16 %v5415_v26  ;;  %v8897_v26 = vpop.f32.mrf.mxu2 }
 0x5b7   : > { %v3967_v37 = vsel %vm3938_vm14, %v8585_v22, %v5417_v61  ;;  %v3953_v19 = vsel %vm3938_vm14, %v8465_v54, %v5416_v18  ;;  %v5436_v54 = vunpack.i.l.bf16 %v5435_v27  ;;  %v9990_v61 = vld [vmem:[#allocation9_spill] sm:$0xff] }
 0x5b8   : > { %v3986_v49 = vsel %vm3971_vm15, %v3953_v19, %v5421_v3  ;;  %v4000_v44 = vsel %vm3971_vm15, %v3967_v37, %v5422_v47  ;;  %v5086_v18 = vunpack.i.l.bf16 %v9990_v61 }
 0x5b9   : > { %v5425_v36 = vpop.permute.xlu0 %5424 }
 0x5ba   : > { %v5427_v34 = vunpack.i.h.bf16 %v5425_v36  ;;  %v5426_v4 = vunpack.i.l.bf16 %v5425_v36  ;;  %v8883_v45 = vpop.permute.xlu2 %5464 }
 0x5bb   : > { %v5466_v19 = vunpack.i.l.bf16 %v8883_v45 }
 0x5bc   : > { %v5430_v7 = vpop.permute.xlu1 %5429  ;;  %v4019_v35 = vsel %vm4004_vm1, %v3986_v49, %v5426_v4  ;;  %v4033_v38 = vsel %vm4004_vm1, %v4000_v44, %v5427_v34  ;;  %v8903_v34 = vpop.f32.mrf.mxu1  ;;  %v3904_v4 = vsel %vm333_vm0, %v8545_v5, %v5086_v18 }
 0x5bd   : > { %v5432_v22 = vunpack.i.h.bf16 %v5430_v7  ;;  %v5431_v24 = vunpack.i.l.bf16 %v5430_v7  ;;  %v3936_v49 = vsel %vm1997_vm9, %v3904_v4, %v5466_v19 }
 0x5bf   : > { %v4052_v59 = vsel %vm4037_vm2, %v4019_v35, %v5431_v24  ;;  %v4066_v50 = vsel %vm4037_vm2, %v4033_v38, %v5432_v22 }
 0x5c0   : > { %v4085_v60 = vsel %vm4070_vm3, %v4052_v59, %v5436_v54  ;;  %v4099_v13 = vsel %vm4070_vm3, %v4066_v50, %v5437_v6  ;;  %v8911_v6 = vpop.f32.mrf.mxu2 }
 0x5c1   : > { %v5440_v0 = vpop.permute.xlu0 %5439  ;;  %4279 = vmatmul.f32.gmra.mxu1 %v4085_v60  ;;  %4321 = vmatmul.f32.gmra.mxu3 %v4099_v13 }
 0x5c2   : > { %v5442_v15 = vunpack.i.h.bf16 %v5440_v0  ;;  %v5441_v30 = vunpack.i.l.bf16 %v5440_v0  ;;  %v5480_v51 = vpop.permute.xlu2 %5479 }
 0x5c3   : > { %v5482_v60 = vunpack.i.h.bf16 %v5480_v51  ;;  %v5481_v5 = vunpack.i.l.bf16 %v5480_v51 }
 0x5c4   : > { %v5445_v53 = vpop.permute.xlu1 %5444  ;;  %v3968_v33 = vsel %vm3938_vm14, %v8588_v16, %v5442_v15  ;;  %v3954_v23 = vsel %vm3938_vm14, %v8468_v20, %v5441_v30 }
 0x5c5   : > { %v5447_v2 = vunpack.i.h.bf16 %v5445_v53  ;;  %v5446_v42 = vunpack.i.l.bf16 %v5445_v53  ;;  %v8917_v53 = vpop.f32.mrf.mxu1 }
 0x5c7   : > { %v3987_v27 = vsel %vm3971_vm15, %v3954_v23, %v5446_v42  ;;  %v4001_v28 = vsel %vm3971_vm15, %v3968_v33, %v5447_v2  ;;  %v5087_v33 = vunpack.i.h.bf16 %v9990_v61 }
 0x5c8   : > { %v4020_v21 = vsel %vm4004_vm1, %v3987_v27, %v5451_v62  ;;  %v4034_v58 = vsel %vm4004_vm1, %v4001_v28, %v5452_v63  ;;  %v5467_v27 = vunpack.i.h.bf16 %v8883_v45 }
 0x5c9   : > { %v5455_v52 = vpop.permute.xlu0 %5454 }
 0x5ca   : > { %v5457_v10 = vunpack.i.h.bf16 %v5455_v52  ;;  %v5456_v56 = vunpack.i.l.bf16 %v5455_v52  ;;  %v5495_v7 = vpop.permute.xlu2 %5494 }
 0x5cb   : > { %v5497_v28 = vunpack.i.h.bf16 %v5495_v7  ;;  %v5496_v63 = vunpack.i.l.bf16 %v5495_v7 }
 0x5cc   : > { %v5460_v31 = vpop.permute.xlu1 %5459  ;;  %v4053_v16 = vsel %vm4037_vm2, %v4020_v21, %v5456_v56  ;;  %v4067_v48 = vsel %vm4037_vm2, %v4034_v58, %v5457_v10  ;;  %v3905_v21 = vsel %vm333_vm0, %v8621_v43, %v5087_v33 }
 0x5cd   : > { %v5462_v20 = vunpack.i.h.bf16 %v5460_v31  ;;  %v5461_v25 = vunpack.i.l.bf16 %v5460_v31  ;;  %v3956_v45 = vsel %vm3938_vm14, %v8494_v8, %v5496_v63  ;;  %v8935_v19 = vpop.f32.mrf.mxu1 }
 0x5cf   : > { %v4086_v32 = vsel %vm4070_vm3, %v4053_v16, %v5461_v25  ;;  %v4100_v37 = vsel %vm4070_vm3, %v4067_v48, %v5462_v20  ;;  %v8927_v16 = vpop.f32.mrf.mxu2  ;;  %v3937_v48 = vsel %vm1997_vm9, %v3905_v21, %v5467_v27 }
 0x5d0   : > { %4282 = vmatmul.f32.gmra.mxu1 %v4086_v32  ;;  %4324 = vmatmul.f32.gmra.mxu3 %v4100_v37  ;;  %v3970_v20 = vsel %vm3938_vm14, %v3937_v48, %v5497_v28 }
 0x5d1   : > { %v5470_v36 = vpop.permute.xlu0 %5469 }
 0x5d2   : > { %v5472_v47 = vunpack.i.h.bf16 %v5470_v36  ;;  %v5471_v3 = vunpack.i.l.bf16 %v5470_v36  ;;  %v5510_v62 = vpop.permute.xlu2 %5509 }
 0x5d4   : > { %v5475_v44 = vpop.permute.xlu1 %5474  ;;  %v3955_v22 = vsel %vm3938_vm14, %v8491_v57, %v5471_v3  ;;  %v3969_v24 = vsel %vm3938_vm14, %v3936_v49, %v5472_v47  ;;  %v5512_v47 = vunpack.i.h.bf16 %v5510_v62  ;;  %v5511_v3 = vunpack.i.l.bf16 %v5510_v62 }
 0x5d5   : > { %v5477_v35 = vunpack.i.h.bf16 %v5475_v44  ;;  %v5476_v38 = vunpack.i.l.bf16 %v5475_v44 }
 0x5d7   : > { %v3988_v59 = vsel %vm3971_vm15, %v3955_v22, %v5476_v38  ;;  %v4002_v50 = vsel %vm3971_vm15, %v3969_v24, %v5477_v35  ;;  %v8943_v24 = vpop.f32.mrf.mxu2 }
 0x5d8   : > { %v4021_v15 = vsel %vm4004_vm1, %v3988_v59, %v5481_v5  ;;  %v4035_v30 = vsel %vm4004_vm1, %v4002_v50, %v5482_v60  ;;  %v8945_v50 = vpop.f32.mrf.mxu1 }
 0x5d9   : > { %v5485_v54 = vpop.permute.xlu0 %5484 }
 0x5da   : > { %v5487_v13 = vunpack.i.h.bf16 %v5485_v54  ;;  %v5486_v0 = vunpack.i.l.bf16 %v5485_v54  ;;  %v5525_v49 = vpop.permute.xlu2 %5524 }
 0x5db   : > { %v5527_v63 = vunpack.i.h.bf16 %v5525_v49 }
 0x5dc   : > { %v5490_v57 = vpop.permute.xlu1 %5489  ;;  %v4054_v2 = vsel %vm4037_vm2, %v4021_v15, %v5486_v0  ;;  %v4068_v42 = vsel %vm4037_vm2, %v4035_v30, %v5487_v13  ;;  %v5526_v13 = vunpack.i.l.bf16 %v5525_v49 }
 0x5dd   : > { %v5492_v23 = vunpack.i.h.bf16 %v5490_v57  ;;  %v5491_v52 = vunpack.i.l.bf16 %v5490_v57  ;;  %v2972_v57 = vld [vmem:[#allocation2 + $0x16a] sm:$0xff] }
 0x5df   : > { %v4087_v10 = vsel %vm4070_vm3, %v4054_v2, %v5491_v52  ;;  %v4101_v56 = vsel %vm4070_vm3, %v4068_v42, %v5492_v23  ;;  %v8952_v52 = vpop.f32.mrf.mxu2 }
 0x5e0   : > { %4285 = vmatmul.f32.gmra.mxu1 %v4087_v10  ;;  %4327 = vmatmul.f32.gmra.mxu3 %v4101_v56 }
 0x5e1   : > { %v5500_v51 = vpop.permute.xlu0 %5499 }
 0x5e2   : > { %v5502_v58 = vunpack.i.h.bf16 %v5500_v51  ;;  %v5501_v31 = vunpack.i.l.bf16 %v5500_v51  ;;  %v5540_v30 = vpop.permute.xlu2 %5539 }
 0x5e3   : > { %v5541_v27 = vunpack.i.l.bf16 %v5540_v30 }
 0x5e4   : > { %v5505_v25 = vpop.permute.xlu1 %5504  ;;  %v3989_v61 = vsel %vm3971_vm15, %v3956_v45, %v5501_v31  ;;  %v4003_v18 = vsel %vm3971_vm15, %v3970_v20, %v5502_v58  ;;  %v8959_v58 = vpop.f32.mrf.mxu1 }
 0x5e5   : > { %v5507_v32 = vunpack.i.h.bf16 %v5505_v25  ;;  %v5506_v37 = vunpack.i.l.bf16 %v5505_v25  ;;  %v5542_v25 = vunpack.i.h.bf16 %v5540_v30 }
 0x5e7   : > { %v4022_v43 = vsel %vm4004_vm1, %v3989_v61, %v5506_v37  ;;  %v4036_v36 = vsel %vm4004_vm1, %v4003_v18, %v5507_v32  ;;  %v8967_v18 = vpop.f32.mrf.mxu2 }
 0x5e8   : > { %v4055_v7 = vsel %vm4037_vm2, %v4022_v43, %v5511_v3  ;;  %v4069_v35 = vsel %vm4037_vm2, %v4036_v36, %v5512_v47 }
 0x5e9   : > { %v5515_v4 = vpop.permute.xlu0 %5514 }
 0x5ea   : > { %v5517_v8 = vunpack.i.h.bf16 %v5515_v4  ;;  %v5516_v44 = vunpack.i.l.bf16 %v5515_v4  ;;  %v3563_v43 = vpop.permute.xlu2 %3562 }
 0x5ec   : > { %v4088_v38 = vsel %vm4070_vm3, %v4055_v7, %v5516_v44  ;;  %v4102_v22 = vsel %vm4070_vm3, %v4069_v35, %v5517_v8  ;;  %v5520_v54 = vpop.permute.xlu1 %5519  ;;  %v8971_v3 = vpop.f32.mrf.mxu1 }
 0x5ed   : > { %4288 = vmatmul.f32.gmra.mxu1 %v4088_v38  ;;  %4330 = vmatmul.f32.gmra.mxu3 %v4102_v22  ;;  %v5521_v59 = vunpack.i.l.bf16 %v5520_v54  ;;  %v5522_v15 = vunpack.i.h.bf16 %v5520_v54 }
 0x5ef   : > { %v3957_v60 = vsel %vm3938_vm14, %v8367_v11, %v5521_v59  ;;  %v3958_v11 = vsel %vm3938_vm14, %v8364_v12, %v5522_v15  ;;  %v8981_v35 = vpop.f32.mrf.mxu2  ;;  %v2977_v15 = vld [vmem:[#allocation2 + $0x1a2] sm:$0xff] }
 0x5f0   : > { %v3990_v2 = vsel %vm3971_vm15, %v3957_v60, %v5526_v13  ;;  %v3991_v21 = vsel %vm3971_vm15, %v3958_v11, %v5527_v63 }
 0x5f1   : > { %v5530_v5 = vpop.permute.xlu0 %5529 }
 0x5f2   : > { %v5531_v0 = vunpack.i.l.bf16 %v5530_v5  ;;  %v5532_v28 = vunpack.i.h.bf16 %v5530_v5  ;;  %v3565_v22 = vpop.permute.xlu2 %3564  ;;  %v2976_v5 = vld [vmem:[#allocation2 + $0x19a] sm:$0xff] }
 0x5f4   : > { %v5535_v42 = vpop.permute.xlu1 %5534  ;;  %v4023_v33 = vsel %vm4004_vm1, %v3990_v2, %v5531_v0  ;;  %v4024_v48 = vsel %vm4004_vm1, %v3991_v21, %v5532_v28  ;;  %v4256_v60 = vpop.f32.mrf.mxu1 }
 0x5f5   : > { %4953 = vmatmul.msk.f32.vlgmr.msra.gmra.mxu3 %vm333_vm0, %v2972_v57  ;;  %v5536_v23 = vunpack.i.l.bf16 %v5535_v42  ;;  %v5537_v51 = vunpack.i.h.bf16 %v5535_v42 }
 0x5f7   : > { %v4056_v62 = vsel %vm4037_vm2, %v4023_v33, %v5536_v23  ;;  %v4057_v20 = vsel %vm4037_vm2, %v4024_v48, %v5537_v51  ;;  %v8988_v13 = vpop.f32.mrf.mxu2 }
 0x5f8   : > { %v4089_v10 = vsel %vm4070_vm3, %v4056_v62, %v5541_v27  ;;  %v4090_v32 = vsel %vm4070_vm3, %v4057_v20, %v5542_v25 }
 0x5f9   : > { %v5545_v56 = vpop.permute.xlu0 %5544  ;;  %4291 = vmatmul.f32.gmra.mxu1 %v4089_v10 }
 0x5fa   : > { %v5546_v31 = vunpack.i.l.bf16 %v5545_v56  ;;  %v5547_v47 = vunpack.i.h.bf16 %v5545_v56 }
 0x5fc   : > { %v5550_v45 = vpop.permute.xlu1 %5549  ;;  %v3959_v61 = vsel %vm3938_vm14, %v8516_v1, %v5546_v31  ;;  %v3960_v8 = vsel %vm3938_vm14, %v8519_v9, %v5547_v47  ;;  %v4259_v0 = vpop.f32.mrf.mxu1 }
 0x5fd   : > { %4954 = vmatmul.msk.f32.gmra.mxu3 %vm333_vm0, %v8676_v17  ;;  %v5551_v12 = vunpack.i.l.bf16 %v5550_v45  ;;  %v5552_v49 = vunpack.i.h.bf16 %v5550_v45 }
 0x5ff   : > { %v3992_v36 = vsel %vm3971_vm15, %v3959_v61, %v5551_v12  ;;  %v3993_v7 = vsel %vm3971_vm15, %v3960_v8, %v5552_v49  ;;  %v8992_v30 = vpop.f32.mrf.mxu2  ;;  %v9023_v61 = vld [vmem:[%s9658_s6] ss:$0 sm:$0xff] }
 0x600   : > { %v4025_v4 = vsel %vm4004_vm1, %v3992_v36, %v3563_v43  ;;  %v4026_v54 = vsel %vm4004_vm1, %v3993_v7, %v3565_v22  ;;  %v4239_v43 = vadd.f32 %v9023_v61, %v8903_v34  ;;  %v4245_v36 = vadd.f32 %v9023_v61, %v8935_v19 }
 0x601   : > { %v3691_v37 = vpop.permute.xlu0 %3690  ;;  %4294 = vmatmul.f32.gmra.mxu1 %v4090_v32  ;;  %v4251_v34 = vadd.f32 %v9023_v61, %v8959_v58  ;;  %v4257_v58 = vadd.f32 %v9023_v61, %v4256_v60 }
 0x602   : > { %v4058_v1 = vsel %vm4037_vm2, %v4025_v4, %v3691_v37  ;;  %v4242_v37 = vadd.f32 %v9023_v61, %v8917_v53  ;;  %v4248_v4 = vadd.f32 %v9023_v61, %v8945_v50  ;;  %v9044_v53 = vadd.f32 %v8863_v41, %v4245_v36 }
 0x603   : > { %v4254_v50 = vadd.f32 %v9023_v61, %v8971_v3  ;;  %v4260_v3 = vadd.f32 %v9023_v61, %v4259_v0 }
 0x604   : > { %v3819_v17 = vpop.permute.xlu1 %3818  ;;  %v4262_v57 = vpop.f32.mrf.mxu1  ;;  %v4452_v41 = vsel %vm333_vm0, %v9044_v53, 0.0 }
 0x605   : > { %4955 = vmatmul.msk.f32.gmra.mxu3 %vm333_vm0, %v8718_v29  ;;  %v4091_v44 = vsel %vm4070_vm3, %v4058_v1, %v3819_v17  ;;  %v9036_v17 = vadd.f32 %v8599_v40, %v4242_v37  ;;  %v9041_v1 = vadd.f32 %v8551_v39, %v4239_v43  ;;  %v9053_v40 = vadd.f32 %v8873_v14, %v4248_v4 }
 0x606   : > { %v9068_v14 = vadd.f32 %v8897_v26, %v4254_v50  ;;  %v4263_v60 = vadd.f32 %v9023_v61, %v4262_v57  ;;  %v9084_v0 = vadd.f32 %v8927_v16, %v4260_v3 }
 0x607   : > { %v8996_v2 = vpop.f32.mrf.mxu2  ;;  %v4450_v19 = vsel %vm333_vm0, %v9036_v17, 0.0  ;;  %v4449_v39 = vsel %vm333_vm0, %v9041_v1, 0.0 }
 0x608   : > { %v4451_v7 = vadd.f32 %v4450_v19, %v4449_v39  ;;  %v4458_v26 = vsel %vm333_vm0, %v9068_v14, 0.0  ;;  %v4462_v4 = vsel %vm333_vm0, %v9084_v0, 0.0 }
 0x609   : > { %4297 = vmatmul.f32.gmra.mxu1 %v4091_v44  ;;  %v3693_v38 = vpop.permute.xlu0 %3692  ;;  %v9062_v44 = vadd.f32 %v8885_v46, %v4251_v34  ;;  %v9076_v46 = vadd.f32 %v8911_v6, %v4257_v58  ;;  %v9090_v6 = vadd.f32 %v8943_v24, %v4263_v60 }
 0x60a   : > { %v4059_v59 = vsel %vm4037_vm2, %v4026_v54, %v3693_v38  ;;  %v4454_v38 = vsel %vm333_vm0, %v9053_v40, 0.0  ;;  %v4453_v54 = vadd.f32 %v4452_v41, %v4451_v7 }
 0x60b   : > { %v4460_v43 = vsel %vm333_vm0, %v9076_v46, 0.0  ;;  %v4464_v50 = vsel %vm333_vm0, %v9090_v6, 0.0 }
 0x60c   : > { %v3821_v29 = vpop.permute.xlu1 %3820  ;;  %v4265_v42 = vpop.f32.mrf.mxu1 }
 0x60d   : > { %4956 = vmatmul.msk.f32.gmra.mxu3 %vm333_vm0, %v8746_v55  ;;  %v4092_v9 = vsel %vm4070_vm3, %v4059_v59, %v3821_v29  ;;  %v8994_v55 = vpop.f32.mrf.mxu3  ;;  %v4456_v59 = vsel %vm333_vm0, %v9062_v44, 0.0 }
 0x60f   : > { %v9000_v23 = vpop.f32.mrf.mxu2 }
 0x611   : > { %4300 = vmatmul.f32.gmra.mxu1 %v4092_v9 }
 0x614   : > { %v4268_v27 = vpop.f32.mrf.mxu1 }
 0x615   : > { %4957 = vmatmul.msk.f32.gmra.mxu3 %vm333_vm0, %v2976_v5  ;;  %v8998_v33 = vpop.f32.mrf.mxu3  ;;  %v4455_v5 = vadd.f32 %v4454_v38, %v4453_v54  ;;  %v4269_v57 = vadd.f32 %v9023_v61, %v4268_v27 }
 0x617   : > { %v9004_v28 = vpop.f32.mrf.mxu2  ;;  %v4457_v37 = vadd.f32 %v4456_v59, %v4455_v5  ;;  %v9102_v39 = vadd.f32 %v8967_v18, %v4269_v57 }
 0x619   : > { %v4459_v36 = vadd.f32 %v4458_v26, %v4457_v37  ;;  %v4468_v3 = vsel %vm333_vm0, %v9102_v39, 0.0 }
 0x61b   : > { %v4461_v19 = vadd.f32 %v4460_v43, %v4459_v36 }
 0x61c   : > { %v4271_v63 = vpop.f32.mrf.mxu1 }
 0x61d   : > { %4958 = vmatmul.msk.f32.gmra.mxu3 %vm333_vm0, %v2977_v15  ;;  %v9002_v11 = vpop.f32.mrf.mxu3  ;;  %v4266_v15 = vadd.f32 %v9023_v61, %v4265_v42  ;;  %v4272_v16 = vadd.f32 %v9023_v61, %v4271_v63  ;;  %v4463_v58 = vadd.f32 %v4462_v4, %v4461_v19 }
 0x61f   : > { %v9008_v10 = vpop.f32.mrf.mxu2  ;;  %v9096_v34 = vadd.f32 %v8952_v52, %v4266_v15  ;;  %v9110_v7 = vadd.f32 %v8981_v35, %v4272_v16  ;;  %v4465_v38 = vadd.f32 %v4464_v50, %v4463_v58 }
 0x621   : > { %v4466_v52 = vsel %vm333_vm0, %v9096_v34, 0.0  ;;  %v4470_v59 = vsel %vm333_vm0, %v9110_v7, 0.0 }
 0x622   : > { %v4467_v54 = vadd.f32 %v4466_v52, %v4465_v38 }
 0x624   : > { %v4469_v5 = vadd.f32 %v4468_v3, %v4467_v54 }
 0x625   : > { %v9006_v62 = vpop.f32.mrf.mxu3  ;;  %v4274_v56 = vpop.f32.mrf.mxu1 }
 0x626   : > { %v4275_v24 = vadd.f32 %v9023_v61, %v4274_v56  ;;  %v4471_v37 = vadd.f32 %v4470_v59, %v4469_v5 }
 0x627   : > { %v9014_v48 = vpop.f32.mrf.mxu2 }
 0x628   : > { %v9116_v18 = vadd.f32 %v8988_v13, %v4275_v24 }
 0x62a   : > { %v4472_v26 = vsel %vm333_vm0, %v9116_v18, 0.0 }
 0x62b   : > { %v4473_v36 = vadd.f32 %v4472_v26, %v4471_v37 }
 0x62d   : > { %v9010_v51 = vpop.f32.mrf.mxu3 }
 0x62f   : > { %v9018_v20 = vpop.f32.mrf.mxu2 }
 0x632   : > { %v4277_v21 = vpop.f32.mrf.mxu1 }
 0x633   : > { %v4278_v63 = vadd.f32 %v9023_v61, %v4277_v21 }
 0x635   : > { %v9122_v60 = vadd.f32 %v8992_v30, %v4278_v63 }
 0x637   : > { %v9033_v47 = vpop.f32.mrf.mxu2  ;;  %v4474_v43 = vsel %vm333_vm0, %v9122_v60, 0.0 }
 0x638   : > { %v9012_v31 = vpop.f32.mrf.mxu3  ;;  %v4475_v16 = vadd.f32 %v4474_v43, %v4473_v36 }
 0x63e   : > { %v4280_v45 = vpop.f32.mrf.mxu1 }
 0x63f   : > { %v9071_v22 = vpop.f32.mrf.mxu2  ;;  %v4281_v56 = vadd.f32 %v9023_v61, %v4280_v45 }
 0x641   : > { %v9128_v15 = vadd.f32 %v8996_v2, %v4281_v56 }
 0x643   : > { %v4476_v4 = vsel %vm333_vm0, %v9128_v15, 0.0 }
 0x644   : > { %v9016_v12 = vpop.f32.mrf.mxu3 }
 0x647   : > { %v4417_v41 = vpop.f32.mrf.mxu2 }
 0x64d   : > { %v4283_v25 = vpop.f32.mrf.mxu1 }
 0x64e   : > { %v4284_v35 = vadd.f32 %v9023_v61, %v4283_v25 }
 0x64f   : > { %v4420_v57 = vpop.f32.mrf.mxu2 }
 0x650   : > { %v9134_v30 = vadd.f32 %v9000_v23, %v4284_v35  ;;  %v4305_v35 = vadd.f32 %v9023_v61, %v8994_v55  ;;  %v4311_v55 = vadd.f32 %v9023_v61, %v9002_v11 }
 0x652   : > { %v4478_v19 = vsel %vm333_vm0, %v9134_v30, 0.0 }
 0x653   : > { %v9025_v32 = vpop.f32.mrf.mxu3 }
 0x657   : > { %v4423_v59 = vpop.f32.mrf.mxu2 }
 0x65d   : > { %v4286_v49 = vpop.f32.mrf.mxu1 }
 0x65e   : > { %v4287_v13 = vadd.f32 %v9023_v61, %v4286_v49 }
 0x660   : > { %v9140_v2 = vadd.f32 %v9004_v28, %v4287_v13 }
 0x662   : > { %v4480_v58 = vsel %vm333_vm0, %v9140_v2, 0.0 }
 0x663   : > { %v9048_v8 = vpop.f32.mrf.mxu3 }
 0x66a   : > { %v4289_v29 = vpop.f32.mrf.mxu1 }
 0x66b   : > { %v4290_v25 = vadd.f32 %v9023_v61, %v4289_v29  ;;  %v4477_v29 = vadd.f32 %v4476_v4, %v4475_v16 }
 0x66d   : > { %v9146_v50 = vadd.f32 %v9008_v10, %v4290_v25  ;;  %v4479_v63 = vadd.f32 %v4478_v19, %v4477_v29  ;;  %v9174_v25 = vadd.f32 %v4417_v41, %v4305_v35  ;;  %v9186_v29 = vadd.f32 %v4423_v59, %v4311_v55  ;;  %v4426_v41 = vpop.f32.mrf.mxu2 }
 0x66e   : > { %v4323_v59 = vadd.f32 %v9023_v61, %v9016_v12  ;;  %v4326_v35 = vadd.f32 %v9023_v61, %v9025_v32 }
 0x66f   : > { %v4482_v38 = vsel %vm333_vm0, %v9146_v50, 0.0  ;;  %v4481_v3 = vadd.f32 %v4480_v58, %v4479_v63  ;;  %v4320_v63 = vadd.f32 %v9023_v61, %v9012_v31 }
 0x670   : > { %v9079_v9 = vpop.f32.mrf.mxu3 }
 0x671   : > { %v4332_v12 = vadd.f32 %v9023_v61, %v9079_v9 }
 0x676   : > { %v4292_v42 = vpop.f32.mrf.mxu1 }
 0x677   : > { %v4293_v49 = vadd.f32 %v9023_v61, %v4292_v42 }
 0x678   : > { %v9105_v27 = vpop.f32.mrf.mxu3 }
 0x679   : > { %v9152_v52 = vadd.f32 %v9014_v48, %v4293_v49  ;;  %v4483_v48 = vadd.f32 %v4482_v38, %v4481_v3 }
 0x67b   : > { %v4484_v56 = vsel %vm333_vm0, %v9152_v52, 0.0 }
 0x67e   : > { %v4295_v21 = vpop.f32.mrf.mxu1 }
 0x67f   : > { %v4296_v23 = vadd.f32 %v9023_v61, %v4295_v21  ;;  %v4485_v21 = vadd.f32 %v4484_v56, %v4483_v48 }
 0x680   : > { %v4432_v45 = vpop.f32.mrf.mxu3 }
 0x681   : > { %v9158_v10 = vadd.f32 %v9018_v20, %v4296_v23  ;;  %v4308_v20 = vadd.f32 %v9023_v61, %v8998_v33  ;;  %v4314_v33 = vadd.f32 %v9023_v61, %v9006_v62  ;;  %v4492_v23 = vsel %vm333_vm0, %v9174_v25, 0.0 }
 0x682   : > { %v4433_v48 = vadd.f32 %v4432_v45, %v4320_v63 }
 0x683   : > { %v4486_v5 = vsel %vm333_vm0, %v9158_v10, 0.0  ;;  %v9179_v49 = vadd.f32 %v4420_v57, %v4308_v20  ;;  %v4317_v57 = vadd.f32 %v9023_v61, %v9010_v51 }
 0x684   : > { %v4487_v43 = vadd.f32 %v4486_v5, %v4485_v21 }
 0x685   : > { %v4494_v11 = vsel %vm333_vm0, %v9179_v49, 0.0  ;;  %v9199_v38 = vadd.f32 %v9105_v27, %v4317_v57  ;;  %v4329_v27 = vadd.f32 %v9023_v61, %v9048_v8 }
 0x686   : > { %v4298_v24 = vpop.f32.mrf.mxu1 }
 0x687   : > { %v4299_v28 = vadd.f32 %v9023_v61, %v4298_v24  ;;  %v4500_v5 = vsel %vm333_vm0, %v9199_v38, 0.0 }
 0x688   : > { %v4435_v42 = vpop.f32.mrf.mxu3 }
 0x689   : > { %v9163_v54 = vadd.f32 %v9033_v47, %v4299_v28  ;;  %v4496_v28 = vsel %vm333_vm0, %v9186_v29, 0.0  ;;  %v4436_v21 = vadd.f32 %v4435_v42, %v4323_v59 }
 0x68b   : > { %v4488_v13 = vsel %vm333_vm0, %v9163_v54, 0.0  ;;  %v4504_v45 = vsel %vm333_vm0, %v4436_v21, 0.0 }
 0x68c   : > { %v4489_v4 = vadd.f32 %v4488_v13, %v4487_v43 }
 0x68e   : > { %v4301_v26 = vpop.f32.mrf.mxu1 }
 0x68f   : > { %v4302_v37 = vadd.f32 %v9023_v61, %v4301_v26  ;;  %v4502_v26 = vsel %vm333_vm0, %v4433_v48, 0.0 }
 0x690   : > { %v4438_v47 = vpop.f32.mrf.mxu3 }
 0x691   : > { %v4415_v36 = vadd.f32 %v9071_v22, %v4302_v37  ;;  %v9190_v22 = vadd.f32 %v4426_v41, %v4314_v33  ;;  %v4439_v20 = vadd.f32 %v4438_v47, %v4326_v35 }
 0x693   : > { %v4490_v16 = vsel %vm333_vm0, %v4415_v36, 0.0  ;;  %v4498_v56 = vsel %vm333_vm0, %v9190_v22, 0.0  ;;  %v4506_v55 = vsel %vm333_vm0, %v4439_v20, 0.0 }
 0x694   : > { %v4491_v19 = vadd.f32 %v4490_v16, %v4489_v4 }
 0x696   : > { %v4493_v24 = vadd.f32 %v4492_v23, %v4491_v19 }
 0x698   : > { %v4441_v58 = vpop.f32.mrf.mxu3  ;;  %v4495_v62 = vadd.f32 %v4494_v11, %v4493_v24 }
 0x699   : > { %v4442_v43 = vadd.f32 %v4441_v58, %v4329_v27 }
 0x69a   : > { %v4497_v3 = vadd.f32 %v4496_v28, %v4495_v62 }
 0x69b   : > { %v4508_v33 = vsel %vm333_vm0, %v4442_v43, 0.0 }
 0x69c   : > { %v4499_v51 = vadd.f32 %v4498_v56, %v4497_v3 }
 0x69e   : > { %v4501_v31 = vadd.f32 %v4500_v5, %v4499_v51 }
 0x6a0   : > { %v4503_v13 = vadd.f32 %v4502_v26, %v4501_v31  ;;  %v4444_v37 = vpop.f32.mrf.mxu3 }
 0x6a1   : > { %v4445_v4 = vadd.f32 %v4444_v37, %v4332_v12 }
 0x6a2   : > { %v4505_v32 = vadd.f32 %v4504_v45, %v4503_v13 }
 0x6a3   : > { %v4510_v8 = vsel %vm333_vm0, %v4445_v4, 0.0 }
 0x6a4   : > { %v4507_v42 = vadd.f32 %v4506_v55, %v4505_v32 }
 0x6a6   : > { %v4509_v16 = vadd.f32 %v4508_v33, %v4507_v42 }
 0x6a8   : > { %v4511_v19 = vadd.f32 %v4510_v8, %v4509_v16 }
 0x6aa   : > { %v4512_v47 = vrot.slane %v4511_v19, 4 }
 0x6ac   : > { %v4513_v23 = vadd.f32 %v4512_v47, %v4511_v19 }
 0x6ae   : > { %v4514_v41 = vrot.slane %v4513_v23, 2 }
 0x6b0   : > { %v4515_v24 = vadd.f32 %v4514_v41, %v4513_v23 }
 0x6b2   : > { %v4516_v11 = vrot.slane %v4515_v24, 1 }
 0x6b4   : > { %v4517_v61 = vadd.f32 %v4516_v11, %v4515_v24 }
 0x6b6   : > { %v9218_v9 = vmul.f32 0.00390625, %v4517_v61 }
 0x6b8   : > { %v9222_v57 = vsub.f32 %v9158_v10, %v9218_v9  ;;  %v9226_v58 = vsub.f32 %v9163_v54, %v9218_v9  ;;  %v9229_v62 = vsub.f32 %v4415_v36, %v9218_v9  ;;  %v9232_v28 = vsub.f32 %v4433_v48, %v9218_v9 }
 0x6b9   : > { %v9235_v63 = vsub.f32 %v4436_v21, %v9218_v9  ;;  %v9238_v3 = vsub.f32 %v4439_v20, %v9218_v9  ;;  %v9241_v56 = vsub.f32 %v4442_v43, %v9218_v9  ;;  %v9244_v10 = vsub.f32 %v4445_v4, %v9218_v9 }
 0x6ba   : > { %v9248_v54 = vsub.f32 %v9041_v1, %v9218_v9  ;;  %v9252_v36 = vsub.f32 %v9036_v17, %v9218_v9  ;;  %v9256_v59 = vsub.f32 %v9044_v53, %v9218_v9  ;;  %v9260_v48 = vsub.f32 %v9053_v40, %v9218_v9 }
 0x6bb   : > { %v9268_v1 = vsub.f32 %v9062_v44, %v9218_v9  ;;  %v9274_v53 = vsub.f32 %v9068_v14, %v9218_v9  ;;  %v9282_v27 = vsub.f32 %v9076_v46, %v9218_v9  ;;  %v9289_v14 = vsub.f32 %v9084_v0, %v9218_v9 }
 0x6bc   : > { %v4551_v51 = vmul.f32 %v9248_v54, %v9248_v54  ;;  %v4552_v35 = vmul.f32 %v9252_v36, %v9252_v36  ;;  %v4553_v17 = vmul.f32 %v9256_v59, %v9256_v59  ;;  %v4554_v40 = vmul.f32 %v9260_v48, %v9260_v48 }
 0x6bd   : > { %v4555_v44 = vmul.f32 %v9268_v1, %v9268_v1  ;;  %v4556_v13 = vmul.f32 %v9274_v53, %v9274_v53  ;;  %v9296_v46 = vsub.f32 %v9090_v6, %v9218_v9  ;;  %v4557_v45 = vmul.f32 %v9282_v27, %v9282_v27 }
 0x6be   : > { %v4583_v5 = vsel %vm333_vm0, %v4551_v51, 0.0  ;;  %v4584_v21 = vsel %vm333_vm0, %v4552_v35, 0.0  ;;  %v4586_v26 = vsel %vm333_vm0, %v4553_v17, 0.0  ;;  %v4588_v37 = vsel %vm333_vm0, %v4554_v40, 0.0 }
 0x6bf   : > { %v4585_v31 = vadd.f32 %v4584_v21, %v4583_v5  ;;  %v4590_v43 = vsel %vm333_vm0, %v4555_v44, 0.0  ;;  %v9303_v0 = vsub.f32 %v9096_v34, %v9218_v9  ;;  %v4558_v55 = vmul.f32 %v9289_v14, %v9289_v14 }
 0x6c0   : > { %v4592_v4 = vsel %vm333_vm0, %v4556_v13, 0.0  ;;  %v9310_v6 = vsub.f32 %v9102_v39, %v9218_v9  ;;  %v4559_v33 = vmul.f32 %v9296_v46, %v9296_v46  ;;  %v4594_v16 = vsel %vm333_vm0, %v4557_v45, 0.0 }
 0x6c1   : > { %v4587_v20 = vadd.f32 %v4586_v26, %v4585_v31  ;;  %v9317_v34 = vsub.f32 %v9110_v7, %v9218_v9  ;;  %v4560_v19 = vmul.f32 %v9303_v0, %v9303_v0  ;;  %v4596_v47 = vsel %vm333_vm0, %v4558_v55, 0.0 }
 0x6c2   : > { %v9324_v39 = vsub.f32 %v9116_v18, %v9218_v9  ;;  %v4561_v41 = vmul.f32 %v9310_v6, %v9310_v6  ;;  %v4598_v24 = vsel %vm333_vm0, %v4559_v33, 0.0  ;;  %v9331_v7 = vsub.f32 %v9122_v60, %v9218_v9 }
 0x6c3   : > { %v4589_v12 = vadd.f32 %v4588_v37, %v4587_v20  ;;  %v4562_v61 = vmul.f32 %v9317_v34, %v9317_v34  ;;  %v4600_v51 = vsel %vm333_vm0, %v4560_v19, 0.0  ;;  %v9338_v18 = vsub.f32 %v9128_v15, %v9218_v9 }
 0x6c4   : > { %v4563_v17 = vmul.f32 %v9324_v39, %v9324_v39  ;;  %v4602_v40 = vsel %vm333_vm0, %v4561_v41, 0.0  ;;  %v9345_v60 = vsub.f32 %v9134_v30, %v9218_v9  ;;  %v4564_v21 = vmul.f32 %v9331_v7, %v9331_v7 }
 0x6c5   : > { %v4591_v32 = vadd.f32 %v4590_v43, %v4589_v12  ;;  %v4604_v31 = vsel %vm333_vm0, %v4562_v61, 0.0  ;;  %v9352_v15 = vsub.f32 %v9140_v2, %v9218_v9  ;;  %v4565_v26 = vmul.f32 %v9338_v18, %v9338_v18 }
 0x6c6   : > { %v4606_v20 = vsel %vm333_vm0, %v4563_v17, 0.0  ;;  %v9359_v30 = vsub.f32 %v9146_v50, %v9218_v9  ;;  %v4566_v37 = vmul.f32 %v9345_v60, %v9345_v60  ;;  %v4608_v12 = vsel %vm333_vm0, %v4564_v21, 0.0 }
 0x6c7   : > { %v4593_v42 = vadd.f32 %v4592_v4, %v4591_v32  ;;  %v9366_v2 = vsub.f32 %v9152_v52, %v9218_v9  ;;  %v4567_v43 = vmul.f32 %v9352_v15, %v9352_v15  ;;  %v4610_v32 = vsel %vm333_vm0, %v4565_v26, 0.0 }
 0x6c8   : > { %v4568_v50 = vmul.f32 %v9359_v30, %v9359_v30  ;;  %v4612_v4 = vsel %vm333_vm0, %v4566_v37, 0.0  ;;  %v4570_v52 = vmul.f32 %v9222_v57, %v9222_v57  ;;  %v4571_v41 = vmul.f32 %v9226_v58, %v9226_v58 }
 0x6c9   : > { %v4595_v8 = vadd.f32 %v4594_v16, %v4593_v42  ;;  %v4569_v33 = vmul.f32 %v9366_v2, %v9366_v2  ;;  %v4614_v16 = vsel %vm333_vm0, %v4567_v43, 0.0  ;;  %v9389_v61 = vsub.f32 %v9179_v49, %v9218_v9 }
 0x6ca   : > { %v4616_v19 = vsel %vm333_vm0, %v4568_v50, 0.0  ;;  %v9403_v49 = vsub.f32 %v9190_v22, %v9218_v9 }
 0x6cb   : > { %v4597_v23 = vadd.f32 %v4596_v47, %v4595_v8 }
 0x6cc   : > { %v4576_v22 = vmul.f32 %v9403_v49, %v9403_v49 }
 0x6cd   : > { %v4599_v11 = vadd.f32 %v4598_v24, %v4597_v23  ;;  %v9382_v23 = vsub.f32 %v9174_v25, %v9218_v9  ;;  %v4618_v24 = vsel %vm333_vm0, %v4569_v33, 0.0  ;;  %v9396_v25 = vsub.f32 %v9186_v29, %v9218_v9 }
 0x6ce   : > { %v9410_v29 = vsub.f32 %v9199_v38, %v9218_v9  ;;  %v4578_v38 = vmul.f32 %v9232_v28, %v9232_v28  ;;  %v4632_v9 = vsel %vm333_vm0, %v4576_v22, 0.0 }
 0x6cf   : > { %v4601_v35 = vadd.f32 %v4600_v51, %v4599_v11  ;;  %v4572_v51 = vmul.f32 %v9229_v62, %v9229_v62 }
 0x6d0   : > { %v4577_v43 = vmul.f32 %v9410_v29, %v9410_v29 }
 0x6d1   : > { %v4603_v5 = vadd.f32 %v4602_v40, %v4601_v35  ;;  %v4620_v35 = vsel %vm333_vm0, %v4570_v52, 0.0  ;;  %v4573_v40 = vmul.f32 %v9382_v23, %v9382_v23 }
 0x6d3   : > { %v4605_v44 = vadd.f32 %v4604_v31, %v4603_v5  ;;  %v4622_v5 = vsel %vm333_vm0, %v4571_v41, 0.0  ;;  %v4574_v31 = vmul.f32 %v9389_v61, %v9389_v61 }
 0x6d5   : > { %v4607_v13 = vadd.f32 %v4606_v20, %v4605_v44  ;;  %v4624_v44 = vsel %vm333_vm0, %v4572_v51, 0.0  ;;  %v4575_v20 = vmul.f32 %v9396_v25, %v9396_v25 }
 0x6d7   : > { %v4609_v45 = vadd.f32 %v4608_v12, %v4607_v13  ;;  %v4626_v13 = vsel %vm333_vm0, %v4573_v40, 0.0  ;;  %v4628_v12 = vsel %vm333_vm0, %v4574_v31, 0.0 }
 0x6d9   : > { %v4611_v55 = vadd.f32 %v4610_v32, %v4609_v45  ;;  %v4630_v32 = vsel %vm333_vm0, %v4575_v20, 0.0 }
 0x6db   : > { %v4613_v42 = vadd.f32 %v4612_v4, %v4611_v55  ;;  %v4579_v4 = vmul.f32 %v9235_v63, %v9235_v63 }
 0x6dd   : > { %v4615_v8 = vadd.f32 %v4614_v16, %v4613_v42  ;;  %v4634_v42 = vsel %vm333_vm0, %v4577_v43, 0.0  ;;  %v4580_v16 = vmul.f32 %v9238_v3, %v9238_v3 }
 0x6df   : > { %v4617_v47 = vadd.f32 %v4616_v19, %v4615_v8  ;;  %v4636_v8 = vsel %vm333_vm0, %v4578_v38, 0.0  ;;  %v4581_v19 = vmul.f32 %v9241_v56, %v9241_v56 }
 0x6e1   : > { %v4619_v11 = vadd.f32 %v4618_v24, %v4617_v47  ;;  %v4638_v47 = vsel %vm333_vm0, %v4579_v4, 0.0  ;;  %v4582_v24 = vmul.f32 %v9244_v10, %v9244_v10 }
 0x6e3   : > { %v4621_v17 = vadd.f32 %v4620_v35, %v4619_v11  ;;  %v4640_v11 = vsel %vm333_vm0, %v4580_v16, 0.0  ;;  %v4642_v35 = vsel %vm333_vm0, %v4581_v19, 0.0  ;;  %v4644_v40 = vsel %vm333_vm0, %v4582_v24, 0.0 }
 0x6e5   : > { %v4623_v21 = vadd.f32 %v4622_v5, %v4621_v17 }
 0x6e7   : > { %v4625_v26 = vadd.f32 %v4624_v44, %v4623_v21 }
 0x6e9   : > { %v4627_v37 = vadd.f32 %v4626_v13, %v4625_v26 }
 0x6eb   : > { %v4629_v45 = vadd.f32 %v4628_v12, %v4627_v37 }
 0x6ed   : > { %v4631_v55 = vadd.f32 %v4630_v32, %v4629_v45 }
 0x6ef   : > { %v4633_v50 = vadd.f32 %v4632_v9, %v4631_v55 }
 0x6f1   : > { %v4635_v33 = vadd.f32 %v4634_v42, %v4633_v50 }
 0x6f3   : > { %v4637_v52 = vadd.f32 %v4636_v8, %v4635_v33  ;;  %v9449_v33 = vld [vmem:[%s9659_s7] ss:$0 sm:$0xff] }
 0x6f5   : > { %v4639_v41 = vadd.f32 %v4638_v47, %v4637_v52  ;;  %v9465_v47 = vld [vmem:[%s9660_s8] ss:$0 sm:$0xff] }
 0x6f7   : > { %v4641_v51 = vadd.f32 %v4640_v11, %v4639_v41 }
 0x6f9   : > { %v4643_v17 = vadd.f32 %v4642_v35, %v4641_v51 }
 0x6fb   : > { %v4645_v5 = vadd.f32 %v4644_v40, %v4643_v17 }
 0x6fd   : > { %v4646_v21 = vrot.slane %v4645_v5, 4 }
 0x6ff   : > { %v4647_v31 = vadd.f32 %v4646_v21, %v4645_v5 }
 0x701   : > { %v4648_v44 = vrot.slane %v4647_v31, 2 }
 0x703   : > { %v4649_v26 = vadd.f32 %v4648_v44, %v4647_v31 }
 0x705   : > { %v4650_v20 = vrot.slane %v4649_v26, 1 }
 0x707   : > { %v4651_v13 = vadd.f32 %v4650_v20, %v4649_v26 }
 0x709   : > { %v4652_v37 = vmul.f32 0.00390625, %v4651_v13 }
 0x70b   : > { %v4653_v22 = vadd.f32 1e-05, %v4652_v37 }
 0x70d   : > { %5561 = vrsqrt.f32 %v4653_v22  ;;  %vm4660_vm5 = vweird.f32 %v4653_v22 }
 0x713   : > { %v5562_v12 = vpop.eup %5561 }
 0x714   : > { %v4655_v45 = vmul.f32 %v5562_v12, %v4653_v22  ;;  %vm4661_vm4 = vweird.f32 %v5562_v12 }
 0x715   : > { %vm4662_vm6 = vmor %vm4660_vm5, %vm4661_vm4 }
 0x716   : > { %v4656_v43 = vmul.f32 %v5562_v12, %v4655_v45 }
 0x718   : > { %v4657_v32 = vmul.f32 0.5, %v4656_v43 }
 0x71a   : > { %v4658_v55 = vsub.f32 1.5, %v4657_v32 }
 0x71c   : > { %v4659_v38 = vmul.f32 %v5562_v12, %v4658_v55 }
 0x71e   : > { %v9438_v9 = vsel %vm4662_vm6, %v5562_v12, %v4659_v38 }
 0x71f   : > { %v4664_v50 = vmul.f32 %v9438_v9, %v9248_v54  ;;  %v4665_v4 = vmul.f32 %v9438_v9, %v9252_v36  ;;  %v4666_v42 = vmul.f32 %v9438_v9, %v9256_v59  ;;  %v4667_v16 = vmul.f32 %v9438_v9, %v9260_v48 }
 0x720   : > { %v4668_v8 = vmul.f32 %v9438_v9, %v9268_v1  ;;  %v4669_v54 = vmul.f32 %v9438_v9, %v9274_v53  ;;  %v4670_v36 = vmul.f32 %v9438_v9, %v9282_v27  ;;  %v4671_v48 = vmul.f32 %v9438_v9, %v9289_v14 }
 0x721   : > { %v4699_v52 = vmul.f32 %v9449_v33, %v4664_v50  ;;  %v4700_v59 = vmul.f32 %v9449_v33, %v4665_v4  ;;  %v4701_v19 = vmul.f32 %v9449_v33, %v4666_v42  ;;  %v4702_v1 = vmul.f32 %v9449_v33, %v4667_v16 }
 0x722   : > { %v4672_v53 = vmul.f32 %v9438_v9, %v9296_v46  ;;  %v4703_v27 = vmul.f32 %v9449_v33, %v4668_v8  ;;  %v4673_v41 = vmul.f32 %v9438_v9, %v9303_v0  ;;  %v4674_v24 = vmul.f32 %v9438_v9, %v9310_v6 }
 0x723   : > { %v4704_v11 = vmul.f32 %v9449_v33, %v4669_v54  ;;  %v4705_v51 = vmul.f32 %v9449_v33, %v4670_v36  ;;  %v4734_v14 = vadd.f32 %v9465_v47, %v4699_v52  ;;  %v4735_v35 = vadd.f32 %v9465_v47, %v4700_v59 }
 0x724   : > { %v4736_v17 = vadd.f32 %v9465_v47, %v4701_v19  ;;  %v4675_v46 = vmul.f32 %v9438_v9, %v9317_v34  ;;  %v4706_v40 = vmul.f32 %v9449_v33, %v4671_v48  ;;  %v4737_v0 = vadd.f32 %v9465_v47, %v4702_v1 }
 0x725   : > { %v4676_v6 = vmul.f32 %v9438_v9, %v9324_v39  ;;  %v4677_v5 = vmul.f32 %v9438_v9, %v9331_v7  ;;  %v4707_v21 = vmul.f32 %v9449_v33, %v4672_v53  ;;  %v4738_v31 = vadd.f32 %v9465_v47, %v4703_v27 }
 0x726   : > { %v4678_v34 = vmul.f32 %v9438_v9, %v9338_v18  ;;  %v4708_v44 = vmul.f32 %v9449_v33, %v4673_v41  ;;  %v4709_v39 = vmul.f32 %v9449_v33, %v4674_v24  ;;  %v4739_v7 = vadd.f32 %v9465_v47, %v4704_v11 }
 0x727   : > { %v4740_v26 = vadd.f32 %v9465_v47, %v4705_v51  ;;  %v4766_v20 = vmax.f32 %v4734_v14, 0.0  ;;  %v4767_v13 = vmax.f32 %v4735_v35, 0.0  ;;  %v4768_v37 = vmax.f32 %v4736_v17, 0.0 }
 0x728   : > { %v4679_v22 = vmul.f32 %v9438_v9, %v9345_v60  ;;  %v4710_v12 = vmul.f32 %v9449_v33, %v4675_v46  ;;  %v4741_v18 = vadd.f32 %v9465_v47, %v4706_v40  ;;  %v4769_v45 = vmax.f32 %v4737_v0, 0.0 }
 0x729   : > { %v4680_v43 = vmul.f32 %v9438_v9, %v9352_v15  ;;  %v4711_v32 = vmul.f32 %v9449_v33, %v4676_v6  ;;  %v4742_v55 = vadd.f32 %v9465_v47, %v4707_v21  ;;  %v4770_v38 = vmax.f32 %v4738_v31, 0.0  ;;  %4798 = vst.msk [vmem:[%s9497_s15] sm:$0xff] %vm333_vm0, %v4766_v20 }
 0x72a   : > { %v4681_v60 = vmul.f32 %v9438_v9, %v9359_v30  ;;  %v4712_v50 = vmul.f32 %v9449_v33, %v4677_v5  ;;  %v4743_v4 = vadd.f32 %v9465_v47, %v4708_v44  ;;  %v4771_v42 = vmax.f32 %v4739_v7, 0.0  ;;  %4799 = vst.msk [vmem:[%s9497_s15 + $0x8] sm:$0xff] %vm333_vm0, %v4767_v13 }
 0x72b   : > { %v4682_v15 = vmul.f32 %v9438_v9, %v9366_v2  ;;  %v4713_v16 = vmul.f32 %v9449_v33, %v4678_v34  ;;  %v4744_v8 = vadd.f32 %v9465_v47, %v4709_v39  ;;  %v4772_v54 = vmax.f32 %v4740_v26, 0.0  ;;  %4800 = vst.msk [vmem:[%s9497_s15 + $0x10] sm:$0xff] %vm333_vm0, %v4768_v37 }
 0x72c   : > { %v4683_v30 = vmul.f32 %v9438_v9, %v9222_v57  ;;  %v4714_v36 = vmul.f32 %v9449_v33, %v4679_v22  ;;  %v4745_v52 = vadd.f32 %v9465_v47, %v4710_v12  ;;  %v4773_v59 = vmax.f32 %v4741_v18, 0.0  ;;  %4801 = vst.msk [vmem:[%s9497_s15 + $0x18] sm:$0xff] %vm333_vm0, %v4769_v45 }
 0x72d   : > { %v4684_v2 = vmul.f32 %v9438_v9, %v9226_v58  ;;  %v4715_v19 = vmul.f32 %v9449_v33, %v4680_v43  ;;  %v4746_v48 = vadd.f32 %v9465_v47, %v4711_v32  ;;  %v4774_v1 = vmax.f32 %v4742_v55, 0.0  ;;  %4802 = vst.msk [vmem:[%s9497_s15 + $0x20] sm:$0xff] %vm333_vm0, %v4770_v38 }
 0x72e   : > { %v4685_v57 = vmul.f32 %v9438_v9, %v9229_v62  ;;  %v4716_v53 = vmul.f32 %v9449_v33, %v4681_v60  ;;  %v4747_v27 = vadd.f32 %v9465_v47, %v4712_v50  ;;  %v4775_v41 = vmax.f32 %v4743_v4, 0.0  ;;  %4803 = vst.msk [vmem:[%s9497_s15 + $0x28] sm:$0xff] %vm333_vm0, %v4771_v42 }
 0x72f   : > { %v4686_v58 = vmul.f32 %v9438_v9, %v9382_v23  ;;  %v4717_v24 = vmul.f32 %v9449_v33, %v4682_v15  ;;  %v4748_v11 = vadd.f32 %v9465_v47, %v4713_v16  ;;  %v4776_v51 = vmax.f32 %v4744_v8, 0.0  ;;  %4804 = vst.msk [vmem:[%s9497_s15 + $0x30] sm:$0xff] %vm333_vm0, %v4772_v54 }
 0x730   : > { %v4687_v62 = vmul.f32 %v9438_v9, %v9389_v61  ;;  %v4718_v14 = vmul.f32 %v9449_v33, %v4683_v30  ;;  %v4749_v35 = vadd.f32 %v9465_v47, %v4714_v36  ;;  %v4777_v17 = vmax.f32 %v4745_v52, 0.0  ;;  %4805 = vst.msk [vmem:[%s9497_s15 + $0x38] sm:$0xff] %vm333_vm0, %v4773_v59 }
 0x731   : > { %v4688_v23 = vmul.f32 %v9438_v9, %v9396_v25  ;;  %v4719_v46 = vmul.f32 %v9449_v33, %v4684_v2  ;;  %v4750_v40 = vadd.f32 %v9465_v47, %v4715_v19  ;;  %v4778_v0 = vmax.f32 %v4746_v48, 0.0  ;;  %4806 = vst.msk [vmem:[%s9497_s15 + $0x40] sm:$0xff] %vm333_vm0, %v4774_v1 }
 0x732   : > { %v4689_v61 = vmul.f32 %v9438_v9, %v9403_v49  ;;  %v4720_v6 = vmul.f32 %v9449_v33, %v4685_v57  ;;  %v4751_v5 = vadd.f32 %v9465_v47, %v4716_v53  ;;  %v4779_v21 = vmax.f32 %v4747_v27, 0.0  ;;  %4807 = vst.msk [vmem:[%s9497_s15 + $0x48] sm:$0xff] %vm333_vm0, %v4775_v41 }
 0x733   : > { %v4690_v25 = vmul.f32 %v9438_v9, %v9410_v29  ;;  %v4721_v31 = vmul.f32 %v9449_v33, %v4686_v58  ;;  %v4752_v34 = vadd.f32 %v9465_v47, %v4717_v24  ;;  %v4780_v44 = vmax.f32 %v4748_v11, 0.0  ;;  %4808 = vst.msk [vmem:[%s9497_s15 + $0x50] sm:$0xff] %vm333_vm0, %v4776_v51 }
 0x734   : > { %v4691_v49 = vmul.f32 %v9438_v9, %v9232_v28  ;;  %v4722_v39 = vmul.f32 %v9449_v33, %v4687_v62  ;;  %v4753_v7 = vadd.f32 %v9465_v47, %v4718_v14  ;;  %v4781_v26 = vmax.f32 %v4749_v35, 0.0  ;;  %4809 = vst.msk [vmem:[%s9497_s15 + $0x58] sm:$0xff] %vm333_vm0, %v4777_v17 }
 0x735   : > { %v4692_v29 = vmul.f32 %v9438_v9, %v9235_v63  ;;  %v4723_v20 = vmul.f32 %v9449_v33, %v4688_v23  ;;  %v4754_v13 = vadd.f32 %v9465_v47, %v4719_v46  ;;  %v4782_v37 = vmax.f32 %v4750_v40, 0.0  ;;  %4810 = vst.msk [vmem:[%s9497_s15 + $0x60] sm:$0xff] %vm333_vm0, %v4778_v0 }
 0x736   : > { %v4693_v28 = vmul.f32 %v9438_v9, %v9238_v3  ;;  %v4724_v22 = vmul.f32 %v9449_v33, %v4689_v61  ;;  %v4755_v12 = vadd.f32 %v9465_v47, %v4720_v6  ;;  %v4783_v18 = vmax.f32 %v4751_v5, 0.0  ;;  %4811 = vst.msk [vmem:[%s9497_s15 + $0x68] sm:$0xff] %vm333_vm0, %v4779_v21 }
 0x737   : > { %v4694_v63 = vmul.f32 %v9438_v9, %v9241_v56  ;;  %v4725_v45 = vmul.f32 %v9449_v33, %v4690_v25  ;;  %v4756_v43 = vadd.f32 %v9465_v47, %v4721_v31  ;;  %v4784_v32 = vmax.f32 %v4752_v34, 0.0  ;;  %4812 = vst.msk [vmem:[%s9497_s15 + $0x70] sm:$0xff] %vm333_vm0, %v4780_v44 }
 0x738   : > { %v4695_v3 = vmul.f32 %v9438_v9, %v9244_v10  ;;  %v4726_v55 = vmul.f32 %v9449_v33, %v4691_v49  ;;  %v4757_v38 = vadd.f32 %v9465_v47, %v4722_v39  ;;  %v4785_v60 = vmax.f32 %v4753_v7, 0.0  ;;  %4813 = vst.msk [vmem:[%s9497_s15 + $0x78] sm:$0xff] %vm333_vm0, %v4781_v26 }
 0x739   : > { %v4727_v56 = vmul.f32 %v9449_v33, %v4692_v29  ;;  %v4758_v50 = vadd.f32 %v9465_v47, %v4723_v20  ;;  %v4786_v4 = vmax.f32 %v4754_v13, 0.0  ;;  %4814 = vst.msk [vmem:[%s9497_s15 + $0x80] sm:$0xff] %vm333_vm0, %v4782_v37  ;;  %v4728_v42 = vmul.f32 %v9449_v33, %v4693_v28 }
 0x73a   : > { %v4759_v10 = vadd.f32 %v9465_v47, %v4724_v22  ;;  %v4787_v9 = vmax.f32 %v4755_v12, 0.0  ;;  %4815 = vst.msk [vmem:[%s9497_s15 + $0x88] sm:$0xff] %vm333_vm0, %v4783_v18  ;;  %v4729_v15 = vmul.f32 %v9449_v33, %v4694_v63  ;;  %v4760_v16 = vadd.f32 %v9465_v47, %v4725_v45 }
 0x73b   : > { %v4788_v8 = vmax.f32 %v4756_v43, 0.0  ;;  %4816 = vst.msk [vmem:[%s9497_s15 + $0x90] sm:$0xff] %vm333_vm0, %v4784_v32  ;;  %v4730_v54 = vmul.f32 %v9449_v33, %v4695_v3  ;;  %v4761_v30 = vadd.f32 %v9465_v47, %v4726_v55  ;;  %v4789_v36 = vmax.f32 %v4757_v38, 0.0 }
 0x73c   : > { %4817 = vst.msk [vmem:[%s9497_s15 + $0x98] sm:$0xff] %vm333_vm0, %v4785_v60  ;;  %v4762_v52 = vadd.f32 %v9465_v47, %v4727_v56  ;;  %v4790_v59 = vmax.f32 %v4758_v50, 0.0  ;;  %v4763_v2 = vadd.f32 %v9465_v47, %v4728_v42  ;;  %v4791_v19 = vmax.f32 %v4759_v10, 0.0 }
 0x73d   : > { %4818 = vst.msk [vmem:[%s9497_s15 + $0xa0] sm:$0xff] %vm333_vm0, %v4786_v4  ;;  %v4764_v33 = vadd.f32 %v9465_v47, %v4729_v15  ;;  %v4792_v48 = vmax.f32 %v4760_v16, 0.0  ;;  %v4765_v1 = vadd.f32 %v9465_v47, %v4730_v54  ;;  %v4793_v57 = vmax.f32 %v4761_v30, 0.0 }
 0x73e   : > { %4819 = vst.msk [vmem:[%s9497_s15 + $0xa8] sm:$0xff] %vm333_vm0, %v4787_v9  ;;  %v4794_v53 = vmax.f32 %v4762_v52, 0.0  ;;  %v4795_v27 = vmax.f32 %v4763_v2, 0.0 }
 0x73f   : > { %4820 = vst.msk [vmem:[%s9497_s15 + $0xb0] sm:$0xff] %vm333_vm0, %v4788_v8  ;;  %v4796_v41 = vmax.f32 %v4764_v33, 0.0  ;;  %v4797_v58 = vmax.f32 %v4765_v1, 0.0 }
 0x740   : > { %4821 = vst.msk [vmem:[%s9497_s15 + $0xb8] sm:$0xff] %vm333_vm0, %v4789_v36 }
 0x741   : > { %4822 = vst.msk [vmem:[%s9497_s15 + $0xc0] sm:$0xff] %vm333_vm0, %v4790_v59 }
 0x742   : > { %4823 = vst.msk [vmem:[%s9497_s15 + $0xc8] sm:$0xff] %vm333_vm0, %v4791_v19 }
 0x743   : > { %4824 = vst.msk [vmem:[%s9497_s15 + $0xd0] sm:$0xff] %vm333_vm0, %v4792_v48 }
 0x744   : > { %4825 = vst.msk [vmem:[%s9497_s15 + $0xd8] sm:$0xff] %vm333_vm0, %v4793_v57 }
 0x745   : > { %4826 = vst.msk [vmem:[%s9497_s15 + $0xe0] sm:$0xff] %vm333_vm0, %v4794_v53 }
 0x746   : > { %4827 = vst.msk [vmem:[%s9497_s15 + $0xe8] sm:$0xff] %vm333_vm0, %v4795_v27 }
 0x747   : > { %4828 = vst.msk [vmem:[%s9497_s15 + $0xf0] sm:$0xff] %vm333_vm0, %v4796_v41 }
 0x748   : > { %4829 = vst.msk [vmem:[%s9497_s15 + $0xf8] sm:$0xff] %vm333_vm0, %v4797_v58 }
 0x749 PF: > { %s19_s30 = sadd.s32 1, %s5571_s30  }
 0x74a   : > { %p16_p4 = scmp.ge.s32.totalorder %s19_s30, 4  }
 0x74c   :  { %18 = sbr.rel (!%p16_p4) target bundleno = 1 (0x1), region = 88 }

</bundles_post_ra>
